<compile_context>
chip_gen: v7x
topology: tpu7x:2x2x1
jax: 0.10.0
libtpu: 0.0.40
codegen_flags: <defaults>
</compile_context>

<pallas_src>
import functools

import jax
import jax.numpy as jnp
from jax.experimental import pallas as pl
from jax.experimental.pallas import tpu as pltpu


def _round_up(x, m):
    return ((x + m - 1) // m) * m


def _sigmoid(x):
    # sigmoid(x) == 0.5 * tanh(0.5 * x) + 0.5 : a single EUP transcendental instead of
    # exp + divide, shortening the sequential per-timestep critical path.
    return 0.5 * jnp.tanh(0.5 * x) + 0.5


def _sst_gru_block_kernel(x_next_ref, x_first_ref, wih_ref, whh_ref, bgi_ref,
                          bhn_ref, wlin_ref, blin_ref,
                          rnn_out_ref, prop_out_ref,
                          h_scratch, gi_scratch):
    """Processes one (batch block, time block) grid step.

    x_next_ref:   (T, Bb, Ip)     x for time block t+1 (lookahead)
    x_first_ref:  (T, Bb, Ip)     x for time block 0 (used only to prime at t == 0)
    wih_ref:      (Ip, 3*Hp)      W_ih^T, gate order r,z,n, each gate padded to Hp lanes
    whh_ref:      (Hp, 3*Hp)      W_hh^T, same layout
    bgi_ref:      (1, 3*Hp)       folded bias: [b_ih_r+b_hh_r, b_ih_z+b_hh_z, b_ih_n]
    bhn_ref:      (1, Hp)         b_hh_n (must stay inside r * (W_hn h + b_hn))
    wlin_ref:     (Hp, Pp)        lin_out weight^T (padded)
    blin_ref:     (1, Pp)
    rnn_out_ref:  (T, Bb, Hp)     GRU hidden outputs for this block (time-major)
    prop_out_ref: (T, Bb, Pp)     sigmoid(linear) outputs for this block
    h_scratch:    (Bb, Hp)        hidden state carried across time blocks
    gi_scratch:   (2*T, Bb, 3Hp)  double-buffered input projection (slots [0:T], [T:2T])
    """
    t = pl.program_id(1)
    T, Bb, Ip = x_next_ref.shape
    Hp = whh_ref.shape[0]
    Pp = prop_out_ref.shape[-1]

    wih = wih_ref[...]                       # (Ip, 3Hp)   matmul operand dtype
    bgi = bgi_ref[...]                       # (1, 3Hp)    f32

    # ---- First time block of this batch block: reset hidden state and prime the
    # ---- lookahead buffer with the input projection of block 0 (slot 0).
    @pl.when(t == 0)
    def _():
        h_scratch[...] = jnp.zeros_like(h_scratch)
        x0 = x_first_ref[...].reshape(T * Bb, Ip)
        gi0 = jnp.dot(x0, wih, preferred_element_type=jnp.float32) + bgi
        gi_scratch[pl.ds(0, T)] = gi0.reshape(T, Bb, 3 * Hp)

    cur_base = (t % 2) * T        # slot holding gi for the current block t
    nxt_base = T - cur_base       # slot being filled with gi for block t+1

    whh = whh_ref[...]                                     # (Hp, 3Hp)
    b_hn = jnp.broadcast_to(bhn_ref[...], (Bb, Hp))        # hoisted broadcasts
    bgi_b = jnp.broadcast_to(bgi, (Bb, 3 * Hp))

    # ---- Sequential recurrence; the lookahead input projection for block t+1 is
    # ---- interleaved per timestep so its MXU work hides under the gate math.
    def step(tt, h):
        gh = jnp.dot(h.astype(whh.dtype), whh,
                     preferred_element_type=jnp.float32)            # (Bb, 3Hp)
        gi_t = gi_scratch[cur_base + tt]                             # (Bb, 3Hp) f32
        # Hp is a multiple of 128, so all gate slices are lane-aligned.
        r = _sigmoid(gi_t[:, 0:Hp] + gh[:, 0:Hp])
        z = _sigmoid(gi_t[:, Hp:2 * Hp] + gh[:, Hp:2 * Hp])
        n = jnp.tanh(gi_t[:, 2 * Hp:] + r * (gh[:, 2 * Hp:] + b_hn))
        h_new = (1.0 - z) * n + z * h
        rnn_out_ref[tt] = h_new.astype(rnn_out_ref.dtype)
        # Lookahead: independent of the gate math above (different gi slot), so the
        # LLO scheduler can interleave it on the otherwise-idle MXU.
        gi_n = jnp.dot(x_next_ref[tt], wih,
                       preferred_element_type=jnp.float32) + bgi_b
        gi_scratch[nxt_base + tt] = gi_n
        return h_new

    h_final = jax.lax.fori_loop(0, T, step, h_scratch[...], unroll=min(T, 8))
    h_scratch[...] = h_final

    # ---- Hoisted time-parallel output Linear + Sigmoid: one big matmul per block ----
    h_all = rnn_out_ref[...].reshape(T * Bb, Hp)
    logits = jnp.dot(h_all.astype(wlin_ref.dtype), wlin_ref[...],
                     preferred_element_type=jnp.float32) + blin_ref[...]
    prop_out_ref[...] = _sigmoid(logits).reshape(T, Bb, Pp).astype(prop_out_ref.dtype)


def sst_ad_prop_forward(inputs, params, *, time_block=64,
                        compute_dtype=jnp.bfloat16, num_batch_blocks=1):
    """inputs: (batch, seq, input_size) float32.

    Returns (final_out, rnn_output):
      final_out:  (batch, seq, num_proposals)
      rnn_output: (seq, batch, h_width)     (time-major, like the PyTorch module)
    """
    B, S, I = inputs.shape
    wih_t = params["wih_t"]      # (I, 3H)   gate order r,z,n
    whh_t = params["whh_t"]      # (H, 3H)
    bih = params["bih"]          # (1, 3H)
    bhh = params["bhh"]          # (1, 3H)
    wlin_t = params["wlin_t"]    # (H, P)
    blin = params["blin"]        # (1, P)
    H = whh_t.shape[0]
    P = wlin_t.shape[1]

    cd = jnp.dtype(compute_dtype)
    f32 = jnp.float32

    # Hardware-aligned padded sizes; bf16 batch blocks are padded to 16 sublanes so
    # every batch-split window is packing-aligned.
    sublane = 8 if cd.itemsize >= 4 else 16
    Bp = _round_up(B, sublane * num_batch_blocks)
    Bb = Bp // num_batch_blocks
    Hp = _round_up(H, 128)
    Ip = _round_up(I, 128)
    Pp = _round_up(P, 128)

    # Time block: prefer a divisor of S close to time_block (no padded tail steps).
    T = min(time_block, S)
    if S % T:
        div = next((c for c in range(T, 0, -1) if S % c == 0), 1)
        if div * 2 >= T:
            T = div
    Sp = _round_up(S, T)
    n_blocks = Sp // T

    def pad_gates(w, rows, rows_p):
        # (rows, 3H) -> (rows_p, 3Hp) with each gate padded independently to Hp lanes.
        out = jnp.zeros((rows_p, 3 * Hp), f32)
        out = out.at[:rows, 0 * Hp:0 * Hp + H].set(w[:, 0 * H:1 * H].astype(f32))
        out = out.at[:rows, 1 * Hp:1 * Hp + H].set(w[:, 1 * H:2 * H].astype(f32))
        out = out.at[:rows, 2 * Hp:2 * Hp + H].set(w[:, 2 * H:3 * H].astype(f32))
        return out

    wih_p = pad_gates(wih_t, I, Ip).astype(compute_dtype)
    whh_p = pad_gates(whh_t, H, Hp).astype(compute_dtype)

    # Fold b_ih + b_hh for the r and z gates; the n gate keeps only b_ih here
    # (b_hh_n must stay inside r * (W_hn h + b_hn)). Biases stay f32.
    b_comb = jnp.concatenate(
        [bih[:, :2 * H] + bhh[:, :2 * H], bih[:, 2 * H:]], axis=-1)   # (1, 3H)
    bgi_p = pad_gates(b_comb, 1, 1)                                   # (1, 3Hp) f32
    bhn_p = jnp.zeros((1, Hp), f32).at[:, :H].set(bhh[:, 2 * H:].astype(f32))

    wlin_p = jnp.zeros((Hp, Pp), f32).at[:H, :P].set(
        wlin_t.astype(f32)).astype(compute_dtype)
    blin_p = jnp.zeros((1, Pp), f32).at[:, :P].set(blin.astype(f32))

    # Time-major, padded input with ONE extra zero time block so the lookahead
    # BlockSpec (index t+1) never goes out of bounds at the last grid step.
    x_tm = jnp.transpose(inputs, (1, 0, 2))                           # (S, B, I)
    x_p = jnp.zeros((Sp + T, Bp, Ip), compute_dtype)
    x_p = x_p.at[:S, :B, :I].set(x_tm.astype(compute_dtype))

    # Explicit VMEM budget (double-buffered inputs/outputs + invariant weights + scratch).
    est = (4 * T * Bb * Ip * cd.itemsize                       # x_next + x_first
           + 2 * (Ip + Hp) * 3 * Hp * cd.itemsize              # W_ih^T, W_hh^T
           + 2 * Hp * Pp * cd.itemsize                         # W_lin^T
           + 2 * 8 * (3 * Hp + Hp + Pp) * 4                    # biases (sublane-padded)
           + 2 * T * Bb * (Hp + Pp) * 4                        # outputs
           + (Bb * Hp + 2 * T * Bb * 3 * Hp) * 4)              # scratch
    vmem_limit = int(min(max(est * 3 // 2 + (4 << 20), 24 << 20), 60 << 20))

    grid_spec = pltpu.PrefetchScalarGridSpec(
        num_scalar_prefetch=0,
        grid=(num_batch_blocks, n_blocks),
        in_specs=[
            pl.BlockSpec((T, Bb, Ip), lambda b, t: (t + 1, b, 0)),   # x, one block ahead
            pl.BlockSpec((T, Bb, Ip), lambda b, t: (0, b, 0)),       # x block 0 (priming)
            pl.BlockSpec((Ip, 3 * Hp), lambda b, t: (0, 0)),         # W_ih^T
            pl.BlockSpec((Hp, 3 * Hp), lambda b, t: (0, 0)),         # W_hh^T
            pl.BlockSpec((1, 3 * Hp), lambda b, t: (0, 0)),          # folded gi bias
            pl.BlockSpec((1, Hp), lambda b, t: (0, 0)),              # b_hh_n
            pl.BlockSpec((Hp, Pp), lambda b, t: (0, 0)),             # W_lin^T
            pl.BlockSpec((1, Pp), lambda b, t: (0, 0)),              # b_lin
        ],
        out_specs=[
            pl.BlockSpec((T, Bb, Hp), lambda b, t: (t, b, 0)),       # rnn_output
            pl.BlockSpec((T, Bb, Pp), lambda b, t: (t, b, 0)),       # sigmoid(linear)
        ],
        scratch_shapes=[
            pltpu.VMEM((Bb, Hp), jnp.float32),                       # carried hidden state
            pltpu.VMEM((2 * T, Bb, 3 * Hp), jnp.float32),            # 2-deep gi buffer
        ],
    )

    rnn_out_p, prop_out_p = pl.pallas_call(
        _sst_gru_block_kernel,
        out_shape=(
            jax.ShapeDtypeStruct((Sp, Bp, Hp), jnp.float32),
            jax.ShapeDtypeStruct((Sp, Bp, Pp), jnp.float32),
        ),
        grid_spec=grid_spec,
        compiler_params=pltpu.CompilerParams(
            # Batch-block axis is independent (v7x dual-TC split); the time-block
            # axis carries the GRU recurrence -> sequential.
            dimension_semantics=("parallel", "arbitrary"),
            vmem_limit_bytes=vmem_limit,
        ),
    )(x_p, x_p, wih_p, whh_p, bgi_p, bhn_p, wlin_p, blin_p)

    rnn_out = rnn_out_p[:S, :B, :H]                                   # (S, B, H)
    final_out = jnp.transpose(prop_out_p[:S, :B, :P], (1, 0, 2))      # (B, S, P)
    return final_out, rnn_out


def init_params(key, input_size, h_width, num_proposals):
    """Deterministic parameter init (uniform, PyTorch-like scale)."""
    k1, k2, k3, k4, k5, k6 = jax.random.split(key, 6)
    scale = 1.0 / jnp.sqrt(h_width)
    # Stored pre-transposed for the x @ W^T convention.
    wih_t = jax.random.uniform(k1, (input_size, 3 * h_width), jnp.float32, -scale, scale)
    whh_t = jax.random.uniform(k2, (h_width, 3 * h_width), jnp.float32, -scale, scale)
    bih = jax.random.uniform(k3, (1, 3 * h_width), jnp.float32, -scale, scale)
    bhh = jax.random.uniform(k4, (1, 3 * h_width), jnp.float32, -scale, scale)
    wlin_t = jax.random.uniform(k5, (h_width, num_proposals), jnp.float32, -scale, scale)
    blin = jax.random.uniform(k6, (1, num_proposals), jnp.float32, -scale, scale)
    return dict(wih_t=wih_t, whh_t=whh_t, bih=bih, bhh=bhh, wlin_t=wlin_t, blin=blin)


def _reference_forward(inputs, params):
    """Pure-JAX f32 reference of the same math (sanity check)."""
    B, S, I = inputs.shape
    H = params["whh_t"].shape[0]
    x_tm = jnp.transpose(inputs, (1, 0, 2))

    def step(h, x):
        gi = x @ params["wih_t"] + params["bih"]
        gh = h @ params["whh_t"] + params["bhh"]
        i_r, i_z, i_n = gi[:, :H], gi[:, H:2 * H], gi[:, 2 * H:]
        h_r, h_z, h_n = gh[:, :H], gh[:, H:2 * H], gh[:, 2 * H:]
        r = jax.nn.sigmoid(i_r + h_r)
        z = jax.nn.sigmoid(i_z + h_z)
        n = jnp.tanh(i_n + r * h_n)
        h_new = (1.0 - z) * n + z * h
        return h_new, h_new

    h0 = jnp.zeros((B, H), jnp.float32)
    _, rnn_out = jax.lax.scan(step, h0, x_tm)               # (S, B, H)
    logits = rnn_out @ params["wlin_t"] + params["blin"]     # (S, B, P)
    final_out = jnp.transpose(jax.nn.sigmoid(logits), (1, 0, 2))
    return final_out, rnn_out


if __name__ == "__main__":
    # Small shapes consistent with the module's forward.
    batch, seq, input_size, h_width, num_proposals = 4, 8, 32, 32, 16

    key = jax.random.PRNGKey(0)
    k_x, k_p = jax.random.split(key)
    inputs = jax.random.normal(k_x, (batch, seq, input_size), jnp.float32)
    params = init_params(k_p, input_size, h_width, num_proposals)

    ref_final, ref_rnn = _reference_forward(inputs, params)

    def check(final_out, rnn_out, atol, rtol, tag):
        assert final_out.shape == (batch, seq, num_proposals), tag
        assert rnn_out.shape == (seq, batch, h_width), tag
        assert jnp.allclose(final_out, ref_final, atol=atol, rtol=rtol), tag
        assert jnp.allclose(rnn_out, ref_rnn, atol=atol, rtol=rtol), tag

    # 1) f32, whole sequence in one time block — tight tolerance.
    f1 = jax.jit(functools.partial(sst_ad_prop_forward, time_block=64,
                                   compute_dtype=jnp.float32))
    o1 = f1(inputs, params)
    jax.block_until_ready(o1)
    check(*o1, 5e-5, 5e-5, "f32 single block")

    # 2) f32, multiple time blocks — exercises hidden-state carry + gi lookahead slots.
    f2 = jax.jit(functools.partial(sst_ad_prop_forward, time_block=4,
                                   compute_dtype=jnp.float32))
    o2 = f2(inputs, params)
    jax.block_until_ready(o2)
    check(*o2, 5e-5, 5e-5, "f32 multi block")

    # 3) f32, two batch blocks — v7x dual-TensorCore style grid split.
    f3 = jax.jit(functools.partial(sst_ad_prop_forward, time_block=4,
                                   compute_dtype=jnp.float32, num_batch_blocks=2))
    o3 = f3(inputs, params)
    jax.block_until_ready(o3)
    check(*o3, 5e-5, 5e-5, "f32 batch split")

    # 4) default bf16 MXU operands (f32 gate math / accumulation) — looser tolerance.
    f4 = jax.jit(functools.partial(sst_ad_prop_forward, time_block=4))
    o4 = f4(inputs, params)
    jax.block_until_ready(o4)
    check(*o4, 7.5e-2, 7.5e-2, "bf16 default")

    print("KERNEL_OK")
</pallas_src>

<mosaic_0001>
module attributes {stable_mosaic.version = 11 : i64} {
  func.func @_sst_gru_block_kernel(%arg0: i32, %arg1: i32, %arg2: memref<8x8x128xf32, #tpu.memory_space<vmem>>, %arg3: memref<8x8x128xf32, #tpu.memory_space<vmem>>, %arg4: memref<128x384xf32, #tpu.memory_space<vmem>>, %arg5: memref<128x384xf32, #tpu.memory_space<vmem>>, %arg6: memref<1x384xf32, #tpu.memory_space<vmem>>, %arg7: memref<1x128xf32, #tpu.memory_space<vmem>>, %arg8: memref<128x128xf32, #tpu.memory_space<vmem>>, %arg9: memref<1x128xf32, #tpu.memory_space<vmem>>, %arg10: memref<8x8x128xf32, #tpu.memory_space<vmem>>, %arg11: memref<8x8x128xf32, #tpu.memory_space<vmem>>, %arg12: memref<8x128xf32, #tpu.memory_space<vmem>>, %arg13: memref<16x8x384xf32, #tpu.memory_space<vmem>>) attributes {dimension_semantics = [#tpu.dimension_semantics<parallel>, #tpu.dimension_semantics<arbitrary>], iteration_bounds = array<i64: 1, 1>, scalar_prefetch = 0 : i64, scratch_operands = 2 : i64, tpu.core_type = #tpu.core_type<tc>, window_params = [{transform_indices = @transform_0, window_bounds = array<i64: 8, 8, 128>}, {transform_indices = @transform_1, window_bounds = array<i64: 8, 8, 128>}, {pipeline_mode = #tpu.pipeline_mode<synchronous>, transform_indices = @transform_2, window_bounds = array<i64: 128, 384>}, {pipeline_mode = #tpu.pipeline_mode<synchronous>, transform_indices = @transform_3, window_bounds = array<i64: 128, 384>}, {pipeline_mode = #tpu.pipeline_mode<synchronous>, transform_indices = @transform_4, window_bounds = array<i64: 1, 384>}, {pipeline_mode = #tpu.pipeline_mode<synchronous>, transform_indices = @transform_5, window_bounds = array<i64: 1, 128>}, {pipeline_mode = #tpu.pipeline_mode<synchronous>, transform_indices = @transform_6, window_bounds = array<i64: 128, 128>}, {pipeline_mode = #tpu.pipeline_mode<synchronous>, transform_indices = @transform_7, window_bounds = array<i64: 1, 128>}, {transform_indices = @transform_8, window_bounds = array<i64: 8, 8, 128>}, {transform_indices = @transform_9, window_bounds = array<i64: 8, 8, 128>}]} {
    %c0 = arith.constant 0 : index
    %c0_0 = arith.constant 0 : index
    %0 = vector.load %arg4[%c0, %c0_0] : memref<128x384xf32, #tpu.memory_space<vmem>>, vector<128x384xf32>
    %c0_1 = arith.constant 0 : index
    %c0_2 = arith.constant 0 : index
    %1 = vector.load %arg6[%c0_1, %c0_2] : memref<1x384xf32, #tpu.memory_space<vmem>>, vector<1x384xf32>
    %c0_i32 = arith.constant 0 : i32
    %2 = arith.cmpi eq, %arg1, %c0_i32 : i32
    %3 = arith.extui %2 : i1 to i32
    %c0_i32_3 = arith.constant 0 : i32
    %4 = arith.cmpi ne, %3, %c0_i32_3 : i32
    scf.if %4 {
      %cst_170 = arith.constant 0.000000e+00 : f32
      %441 = vector.broadcast %cst_170 : f32 to vector<8x128xf32>
      %c0_171 = arith.constant 0 : index
      %c0_172 = arith.constant 0 : index
      %442 = vector.load %arg12[%c0_171, %c0_172] : memref<8x128xf32, #tpu.memory_space<vmem>>, vector<8x128xf32>
      tpu.vector_store %arg12[%c0_171, %c0_172], %441 {strides = array<i32>} : memref<8x128xf32, #tpu.memory_space<vmem>>, vector<8x128xf32>,
      %c0_173 = arith.constant 0 : index
      %c0_174 = arith.constant 0 : index
      %c0_175 = arith.constant 0 : index
      %443 = vector.load %arg3[%c0_173, %c0_174, %c0_175] : memref<8x8x128xf32, #tpu.memory_space<vmem>>, vector<8x8x128xf32>
      %444 = vector.shape_cast %443 : vector<8x8x128xf32> to vector<64x128xf32>
      %cst_176 = arith.constant dense<0.000000e+00> : vector<64x384xf32>
      %445 = tpu.matmul %444, %0, %cst_176 {dimension_numbers = #tpu.dot_dimension_numbers<[1], [0], [0], [1], [0, 0, 1, 1], [], []>} : vector<64x128xf32>, vector<128x384xf32>, vector<64x384xf32> -> vector<64x384xf32>
      %446 = vector.broadcast %1 : vector<1x384xf32> to vector<64x384xf32>
      %447 = arith.addf %445, %446 : vector<64x384xf32>
      %448 = vector.shape_cast %447 : vector<64x384xf32> to vector<8x8x384xf32>
      %c0_177 = arith.constant 0 : index
      %c0_178 = arith.constant 0 : index
      %c0_179 = arith.constant 0 : index
      %449 = vector.load %arg13[%c0_177, %c0_178, %c0_179] : memref<16x8x384xf32, #tpu.memory_space<vmem>>, vector<8x8x384xf32>
      tpu.vector_store %arg13[%c0_177, %c0_178, %c0_179], %448 {strides = array<i32>} : memref<16x8x384xf32, #tpu.memory_space<vmem>>, vector<8x8x384xf32>,
    } else {
    }
    %c2_i32 = arith.constant 2 : i32
    %c0_i32_4 = arith.constant 0 : i32
    %5 = arith.cmpi eq, %c2_i32, %c0_i32_4 : i32
    %c1_i32 = arith.constant 1 : i32
    %6 = arith.select %5, %c1_i32, %c2_i32 : i32
    %7 = arith.remsi %arg1, %6 : i32
    %c0_i32_5 = arith.constant 0 : i32
    %8 = arith.cmpi ne, %7, %c0_i32_5 : i32
    %c0_i32_6 = arith.constant 0 : i32
    %9 = arith.cmpi slt, %7, %c0_i32_6 : i32
    %c0_i32_7 = arith.constant 0 : i32
    %10 = arith.cmpi slt, %6, %c0_i32_7 : i32
    %11 = arith.xori %9, %10 : i1
    %12 = arith.andi %11, %8 : i1
    %13 = arith.addi %7, %6 : i32
    %14 = arith.select %12, %13, %7 : i32
    %c8_i32 = arith.constant 8 : i32
    %15 = arith.muli %14, %c8_i32 : i32
    %c8_i32_8 = arith.constant 8 : i32
    %16 = arith.subi %c8_i32_8, %15 : i32
    %c0_9 = arith.constant 0 : index
    %c0_10 = arith.constant 0 : index
    %17 = vector.load %arg5[%c0_9, %c0_10] : memref<128x384xf32, #tpu.memory_space<vmem>>, vector<128x384xf32>
    %c0_11 = arith.constant 0 : index
    %c0_12 = arith.constant 0 : index
    %18 = vector.load %arg7[%c0_11, %c0_12] : memref<1x128xf32, #tpu.memory_space<vmem>>, vector<1x128xf32>
    %19 = vector.shape_cast %18 : vector<1x128xf32> to vector<1x128xf32>
    %20 = vector.broadcast %19 : vector<1x128xf32> to vector<8x128xf32>
    %21 = vector.shape_cast %1 : vector<1x384xf32> to vector<1x384xf32>
    %22 = vector.broadcast %21 : vector<1x384xf32> to vector<8x384xf32>
    %c0_13 = arith.constant 0 : index
    %c0_14 = arith.constant 0 : index
    %23 = vector.load %arg12[%c0_13, %c0_14] : memref<8x128xf32, #tpu.memory_space<vmem>>, vector<8x128xf32>
    %c0_i32_15 = arith.constant 0 : i32
    %cst = arith.constant dense<0.000000e+00> : vector<8x384xf32>
    %24 = tpu.matmul %23, %17, %cst {dimension_numbers = #tpu.dot_dimension_numbers<[1], [0], [0], [1], [0, 0, 1, 1], [], []>} : vector<8x128xf32>, vector<128x384xf32>, vector<8x384xf32> -> vector<8x384xf32>
    %25 = arith.addi %15, %c0_i32_15 : i32
    %26 = arith.index_cast %25 : i32 to index
    %c0_16 = arith.constant 0 : index
    %c0_17 = arith.constant 0 : index
    %27 = vector.load %arg13[%26, %c0_16, %c0_17] : memref<16x8x384xf32, #tpu.memory_space<vmem>>, vector<1x8x384xf32>
    %28 = vector.shape_cast %27 : vector<1x8x384xf32> to vector<8x384xf32>
    %29 = vector.extract_strided_slice %28 {offsets = [0, 0], sizes = [8, 128], strides = [1, 1]} : vector<8x384xf32> to vector<8x128xf32>
    %30 = vector.extract_strided_slice %24 {offsets = [0, 0], sizes = [8, 128], strides = [1, 1]} : vector<8x384xf32> to vector<8x128xf32>
    %31 = arith.addf %29, %30 : vector<8x128xf32>
    %cst_18 = arith.constant 5.000000e-01 : f32
    %32 = vector.broadcast %cst_18 : f32 to vector<8x128xf32>
    %33 = arith.mulf %32, %31 : vector<8x128xf32>
    %34 = math.tanh %33 : vector<8x128xf32>
    %cst_19 = arith.constant 5.000000e-01 : f32
    %35 = vector.broadcast %cst_19 : f32 to vector<8x128xf32>
    %36 = arith.mulf %35, %34 : vector<8x128xf32>
    %cst_20 = arith.constant 5.000000e-01 : f32
    %37 = vector.broadcast %cst_20 : f32 to vector<8x128xf32>
    %38 = arith.addf %36, %37 : vector<8x128xf32>
    %39 = vector.extract_strided_slice %28 {offsets = [0, 128], sizes = [8, 128], strides = [1, 1]} : vector<8x384xf32> to vector<8x128xf32>
    %40 = vector.extract_strided_slice %24 {offsets = [0, 128], sizes = [8, 128], strides = [1, 1]} : vector<8x384xf32> to vector<8x128xf32>
    %41 = arith.addf %39, %40 : vector<8x128xf32>
    %cst_21 = arith.constant 5.000000e-01 : f32
    %42 = vector.broadcast %cst_21 : f32 to vector<8x128xf32>
    %43 = arith.mulf %42, %41 : vector<8x128xf32>
    %44 = math.tanh %43 : vector<8x128xf32>
    %cst_22 = arith.constant 5.000000e-01 : f32
    %45 = vector.broadcast %cst_22 : f32 to vector<8x128xf32>
    %46 = arith.mulf %45, %44 : vector<8x128xf32>
    %cst_23 = arith.constant 5.000000e-01 : f32
    %47 = vector.broadcast %cst_23 : f32 to vector<8x128xf32>
    %48 = arith.addf %46, %47 : vector<8x128xf32>
    %49 = vector.extract_strided_slice %28 {offsets = [0, 256], sizes = [8, 128], strides = [1, 1]} : vector<8x384xf32> to vector<8x128xf32>
    %50 = vector.extract_strided_slice %24 {offsets = [0, 256], sizes = [8, 128], strides = [1, 1]} : vector<8x384xf32> to vector<8x128xf32>
    %51 = arith.addf %50, %20 : vector<8x128xf32>
    %52 = arith.mulf %38, %51 : vector<8x128xf32>
    %53 = arith.addf %49, %52 : vector<8x128xf32>
    %54 = math.tanh %53 : vector<8x128xf32>
    %cst_24 = arith.constant 1.000000e+00 : f32
    %55 = vector.broadcast %cst_24 : f32 to vector<8x128xf32>
    %56 = arith.subf %55, %48 : vector<8x128xf32>
    %57 = arith.mulf %56, %54 : vector<8x128xf32>
    %58 = arith.mulf %48, %23 : vector<8x128xf32>
    %59 = arith.addf %57, %58 : vector<8x128xf32>
    %60 = arith.index_cast %c0_i32_15 : i32 to index
    %c0_25 = arith.constant 0 : index
    %c0_26 = arith.constant 0 : index
    %61 = vector.load %arg10[%60, %c0_25, %c0_26] : memref<8x8x128xf32, #tpu.memory_space<vmem>>, vector<1x8x128xf32>
    %62 = vector.shape_cast %61 : vector<1x8x128xf32> to vector<8x128xf32>
    %63 = vector.shape_cast %59 : vector<8x128xf32> to vector<1x8x128xf32>
    tpu.vector_store %arg10[%60, %c0_25, %c0_26], %63 {strides = array<i32>} : memref<8x8x128xf32, #tpu.memory_space<vmem>>, vector<1x8x128xf32>,
    %64 = arith.index_cast %c0_i32_15 : i32 to index
    %c0_27 = arith.constant 0 : index
    %c0_28 = arith.constant 0 : index
    %65 = vector.load %arg2[%64, %c0_27, %c0_28] : memref<8x8x128xf32, #tpu.memory_space<vmem>>, vector<1x8x128xf32>
    %66 = vector.shape_cast %65 : vector<1x8x128xf32> to vector<8x128xf32>
    %cst_29 = arith.constant dense<0.000000e+00> : vector<8x384xf32>
    %67 = tpu.matmul %66, %0, %cst_29 {dimension_numbers = #tpu.dot_dimension_numbers<[1], [0], [0], [1], [0, 0, 1, 1], [], []>} : vector<8x128xf32>, vector<128x384xf32>, vector<8x384xf32> -> vector<8x384xf32>
    %68 = arith.addf %67, %22 : vector<8x384xf32>
    %69 = arith.addi %16, %c0_i32_15 : i32
    %70 = arith.index_cast %69 : i32 to index
    %c0_30 = arith.constant 0 : index
    %c0_31 = arith.constant 0 : index
    %71 = vector.load %arg13[%70, %c0_30, %c0_31] : memref<16x8x384xf32, #tpu.memory_space<vmem>>, vector<1x8x384xf32>
    %72 = vector.shape_cast %71 : vector<1x8x384xf32> to vector<8x384xf32>
    %73 = vector.shape_cast %68 : vector<8x384xf32> to vector<1x8x384xf32>
    tpu.vector_store %arg13[%70, %c0_30, %c0_31], %73 {strides = array<i32>} : memref<16x8x384xf32, #tpu.memory_space<vmem>>, vector<1x8x384xf32>,
    %c1_i32_32 = arith.constant 1 : i32
    %cst_33 = arith.constant dense<0.000000e+00> : vector<8x384xf32>
    %74 = tpu.matmul %59, %17, %cst_33 {dimension_numbers = #tpu.dot_dimension_numbers<[1], [0], [0], [1], [0, 0, 1, 1], [], []>} : vector<8x128xf32>, vector<128x384xf32>, vector<8x384xf32> -> vector<8x384xf32>
    %75 = arith.addi %15, %c1_i32_32 : i32
    %76 = arith.index_cast %75 : i32 to index
    %c0_34 = arith.constant 0 : index
    %c0_35 = arith.constant 0 : index
    %77 = vector.load %arg13[%76, %c0_34, %c0_35] : memref<16x8x384xf32, #tpu.memory_space<vmem>>, vector<1x8x384xf32>
    %78 = vector.shape_cast %77 : vector<1x8x384xf32> to vector<8x384xf32>
    %79 = vector.extract_strided_slice %78 {offsets = [0, 0], sizes = [8, 128], strides = [1, 1]} : vector<8x384xf32> to vector<8x128xf32>
    %80 = vector.extract_strided_slice %74 {offsets = [0, 0], sizes = [8, 128], strides = [1, 1]} : vector<8x384xf32> to vector<8x128xf32>
    %81 = arith.addf %79, %80 : vector<8x128xf32>
    %cst_36 = arith.constant 5.000000e-01 : f32
    %82 = vector.broadcast %cst_36 : f32 to vector<8x128xf32>
    %83 = arith.mulf %82, %81 : vector<8x128xf32>
    %84 = math.tanh %83 : vector<8x128xf32>
    %cst_37 = arith.constant 5.000000e-01 : f32
    %85 = vector.broadcast %cst_37 : f32 to vector<8x128xf32>
    %86 = arith.mulf %85, %84 : vector<8x128xf32>
    %cst_38 = arith.constant 5.000000e-01 : f32
    %87 = vector.broadcast %cst_38 : f32 to vector<8x128xf32>
    %88 = arith.addf %86, %87 : vector<8x128xf32>
    %89 = vector.extract_strided_slice %78 {offsets = [0, 128], sizes = [8, 128], strides = [1, 1]} : vector<8x384xf32> to vector<8x128xf32>
    %90 = vector.extract_strided_slice %74 {offsets = [0, 128], sizes = [8, 128], strides = [1, 1]} : vector<8x384xf32> to vector<8x128xf32>
    %91 = arith.addf %89, %90 : vector<8x128xf32>
    %cst_39 = arith.constant 5.000000e-01 : f32
    %92 = vector.broadcast %cst_39 : f32 to vector<8x128xf32>
    %93 = arith.mulf %92, %91 : vector<8x128xf32>
    %94 = math.tanh %93 : vector<8x128xf32>
    %cst_40 = arith.constant 5.000000e-01 : f32
    %95 = vector.broadcast %cst_40 : f32 to vector<8x128xf32>
    %96 = arith.mulf %95, %94 : vector<8x128xf32>
    %cst_41 = arith.constant 5.000000e-01 : f32
    %97 = vector.broadcast %cst_41 : f32 to vector<8x128xf32>
    %98 = arith.addf %96, %97 : vector<8x128xf32>
    %99 = vector.extract_strided_slice %78 {offsets = [0, 256], sizes = [8, 128], strides = [1, 1]} : vector<8x384xf32> to vector<8x128xf32>
    %100 = vector.extract_strided_slice %74 {offsets = [0, 256], sizes = [8, 128], strides = [1, 1]} : vector<8x384xf32> to vector<8x128xf32>
    %101 = arith.addf %100, %20 : vector<8x128xf32>
    %102 = arith.mulf %88, %101 : vector<8x128xf32>
    %103 = arith.addf %99, %102 : vector<8x128xf32>
    %104 = math.tanh %103 : vector<8x128xf32>
    %cst_42 = arith.constant 1.000000e+00 : f32
    %105 = vector.broadcast %cst_42 : f32 to vector<8x128xf32>
    %106 = arith.subf %105, %98 : vector<8x128xf32>
    %107 = arith.mulf %106, %104 : vector<8x128xf32>
    %108 = arith.mulf %98, %59 : vector<8x128xf32>
    %109 = arith.addf %107, %108 : vector<8x128xf32>
    %110 = arith.index_cast %c1_i32_32 : i32 to index
    %c0_43 = arith.constant 0 : index
    %c0_44 = arith.constant 0 : index
    %111 = vector.load %arg10[%110, %c0_43, %c0_44] : memref<8x8x128xf32, #tpu.memory_space<vmem>>, vector<1x8x128xf32>
    %112 = vector.shape_cast %111 : vector<1x8x128xf32> to vector<8x128xf32>
    %113 = vector.shape_cast %109 : vector<8x128xf32> to vector<1x8x128xf32>
    tpu.vector_store %arg10[%110, %c0_43, %c0_44], %113 {strides = array<i32>} : memref<8x8x128xf32, #tpu.memory_space<vmem>>, vector<1x8x128xf32>,
    %114 = arith.index_cast %c1_i32_32 : i32 to index
    %c0_45 = arith.constant 0 : index
    %c0_46 = arith.constant 0 : index
    %115 = vector.load %arg2[%114, %c0_45, %c0_46] : memref<8x8x128xf32, #tpu.memory_space<vmem>>, vector<1x8x128xf32>
    %116 = vector.shape_cast %115 : vector<1x8x128xf32> to vector<8x128xf32>
    %cst_47 = arith.constant dense<0.000000e+00> : vector<8x384xf32>
    %117 = tpu.matmul %116, %0, %cst_47 {dimension_numbers = #tpu.dot_dimension_numbers<[1], [0], [0], [1], [0, 0, 1, 1], [], []>} : vector<8x128xf32>, vector<128x384xf32>, vector<8x384xf32> -> vector<8x384xf32>
    %118 = arith.addf %117, %22 : vector<8x384xf32>
    %119 = arith.addi %16, %c1_i32_32 : i32
    %120 = arith.index_cast %119 : i32 to index
    %c0_48 = arith.constant 0 : index
    %c0_49 = arith.constant 0 : index
    %121 = vector.load %arg13[%120, %c0_48, %c0_49] : memref<16x8x384xf32, #tpu.memory_space<vmem>>, vector<1x8x384xf32>
    %122 = vector.shape_cast %121 : vector<1x8x384xf32> to vector<8x384xf32>
    %123 = vector.shape_cast %118 : vector<8x384xf32> to vector<1x8x384xf32>
    tpu.vector_store %arg13[%120, %c0_48, %c0_49], %123 {strides = array<i32>} : memref<16x8x384xf32, #tpu.memory_space<vmem>>, vector<1x8x384xf32>,
    %c2_i32_50 = arith.constant 2 : i32
    %cst_51 = arith.constant dense<0.000000e+00> : vector<8x384xf32>
    %124 = tpu.matmul %109, %17, %cst_51 {dimension_numbers = #tpu.dot_dimension_numbers<[1], [0], [0], [1], [0, 0, 1, 1], [], []>} : vector<8x128xf32>, vector<128x384xf32>, vector<8x384xf32> -> vector<8x384xf32>
    %125 = arith.addi %15, %c2_i32_50 : i32
    %126 = arith.index_cast %125 : i32 to index
    %c0_52 = arith.constant 0 : index
    %c0_53 = arith.constant 0 : index
    %127 = vector.load %arg13[%126, %c0_52, %c0_53] : memref<16x8x384xf32, #tpu.memory_space<vmem>>, vector<1x8x384xf32>
    %128 = vector.shape_cast %127 : vector<1x8x384xf32> to vector<8x384xf32>
    %129 = vector.extract_strided_slice %128 {offsets = [0, 0], sizes = [8, 128], strides = [1, 1]} : vector<8x384xf32> to vector<8x128xf32>
    %130 = vector.extract_strided_slice %124 {offsets = [0, 0], sizes = [8, 128], strides = [1, 1]} : vector<8x384xf32> to vector<8x128xf32>
    %131 = arith.addf %129, %130 : vector<8x128xf32>
    %cst_54 = arith.constant 5.000000e-01 : f32
    %132 = vector.broadcast %cst_54 : f32 to vector<8x128xf32>
    %133 = arith.mulf %132, %131 : vector<8x128xf32>
    %134 = math.tanh %133 : vector<8x128xf32>
    %cst_55 = arith.constant 5.000000e-01 : f32
    %135 = vector.broadcast %cst_55 : f32 to vector<8x128xf32>
    %136 = arith.mulf %135, %134 : vector<8x128xf32>
    %cst_56 = arith.constant 5.000000e-01 : f32
    %137 = vector.broadcast %cst_56 : f32 to vector<8x128xf32>
    %138 = arith.addf %136, %137 : vector<8x128xf32>
    %139 = vector.extract_strided_slice %128 {offsets = [0, 128], sizes = [8, 128], strides = [1, 1]} : vector<8x384xf32> to vector<8x128xf32>
    %140 = vector.extract_strided_slice %124 {offsets = [0, 128], sizes = [8, 128], strides = [1, 1]} : vector<8x384xf32> to vector<8x128xf32>
    %141 = arith.addf %139, %140 : vector<8x128xf32>
    %cst_57 = arith.constant 5.000000e-01 : f32
    %142 = vector.broadcast %cst_57 : f32 to vector<8x128xf32>
    %143 = arith.mulf %142, %141 : vector<8x128xf32>
    %144 = math.tanh %143 : vector<8x128xf32>
    %cst_58 = arith.constant 5.000000e-01 : f32
    %145 = vector.broadcast %cst_58 : f32 to vector<8x128xf32>
    %146 = arith.mulf %145, %144 : vector<8x128xf32>
    %cst_59 = arith.constant 5.000000e-01 : f32
    %147 = vector.broadcast %cst_59 : f32 to vector<8x128xf32>
    %148 = arith.addf %146, %147 : vector<8x128xf32>
    %149 = vector.extract_strided_slice %128 {offsets = [0, 256], sizes = [8, 128], strides = [1, 1]} : vector<8x384xf32> to vector<8x128xf32>
    %150 = vector.extract_strided_slice %124 {offsets = [0, 256], sizes = [8, 128], strides = [1, 1]} : vector<8x384xf32> to vector<8x128xf32>
    %151 = arith.addf %150, %20 : vector<8x128xf32>
    %152 = arith.mulf %138, %151 : vector<8x128xf32>
    %153 = arith.addf %149, %152 : vector<8x128xf32>
    %154 = math.tanh %153 : vector<8x128xf32>
    %cst_60 = arith.constant 1.000000e+00 : f32
    %155 = vector.broadcast %cst_60 : f32 to vector<8x128xf32>
    %156 = arith.subf %155, %148 : vector<8x128xf32>
    %157 = arith.mulf %156, %154 : vector<8x128xf32>
    %158 = arith.mulf %148, %109 : vector<8x128xf32>
    %159 = arith.addf %157, %158 : vector<8x128xf32>
    %160 = arith.index_cast %c2_i32_50 : i32 to index
    %c0_61 = arith.constant 0 : index
    %c0_62 = arith.constant 0 : index
    %161 = vector.load %arg10[%160, %c0_61, %c0_62] : memref<8x8x128xf32, #tpu.memory_space<vmem>>, vector<1x8x128xf32>
    %162 = vector.shape_cast %161 : vector<1x8x128xf32> to vector<8x128xf32>
    %163 = vector.shape_cast %159 : vector<8x128xf32> to vector<1x8x128xf32>
    tpu.vector_store %arg10[%160, %c0_61, %c0_62], %163 {strides = array<i32>} : memref<8x8x128xf32, #tpu.memory_space<vmem>>, vector<1x8x128xf32>,
    %164 = arith.index_cast %c2_i32_50 : i32 to index
    %c0_63 = arith.constant 0 : index
    %c0_64 = arith.constant 0 : index
    %165 = vector.load %arg2[%164, %c0_63, %c0_64] : memref<8x8x128xf32, #tpu.memory_space<vmem>>, vector<1x8x128xf32>
    %166 = vector.shape_cast %165 : vector<1x8x128xf32> to vector<8x128xf32>
    %cst_65 = arith.constant dense<0.000000e+00> : vector<8x384xf32>
    %167 = tpu.matmul %166, %0, %cst_65 {dimension_numbers = #tpu.dot_dimension_numbers<[1], [0], [0], [1], [0, 0, 1, 1], [], []>} : vector<8x128xf32>, vector<128x384xf32>, vector<8x384xf32> -> vector<8x384xf32>
    %168 = arith.addf %167, %22 : vector<8x384xf32>
    %169 = arith.addi %16, %c2_i32_50 : i32
    %170 = arith.index_cast %169 : i32 to index
    %c0_66 = arith.constant 0 : index
    %c0_67 = arith.constant 0 : index
    %171 = vector.load %arg13[%170, %c0_66, %c0_67] : memref<16x8x384xf32, #tpu.memory_space<vmem>>, vector<1x8x384xf32>
    %172 = vector.shape_cast %171 : vector<1x8x384xf32> to vector<8x384xf32>
    %173 = vector.shape_cast %168 : vector<8x384xf32> to vector<1x8x384xf32>
    tpu.vector_store %arg13[%170, %c0_66, %c0_67], %173 {strides = array<i32>} : memref<16x8x384xf32, #tpu.memory_space<vmem>>, vector<1x8x384xf32>,
    %c3_i32 = arith.constant 3 : i32
    %cst_68 = arith.constant dense<0.000000e+00> : vector<8x384xf32>
    %174 = tpu.matmul %159, %17, %cst_68 {dimension_numbers = #tpu.dot_dimension_numbers<[1], [0], [0], [1], [0, 0, 1, 1], [], []>} : vector<8x128xf32>, vector<128x384xf32>, vector<8x384xf32> -> vector<8x384xf32>
    %175 = arith.addi %15, %c3_i32 : i32
    %176 = arith.index_cast %175 : i32 to index
    %c0_69 = arith.constant 0 : index
    %c0_70 = arith.constant 0 : index
    %177 = vector.load %arg13[%176, %c0_69, %c0_70] : memref<16x8x384xf32, #tpu.memory_space<vmem>>, vector<1x8x384xf32>
    %178 = vector.shape_cast %177 : vector<1x8x384xf32> to vector<8x384xf32>
    %179 = vector.extract_strided_slice %178 {offsets = [0, 0], sizes = [8, 128], strides = [1, 1]} : vector<8x384xf32> to vector<8x128xf32>
    %180 = vector.extract_strided_slice %174 {offsets = [0, 0], sizes = [8, 128], strides = [1, 1]} : vector<8x384xf32> to vector<8x128xf32>
    %181 = arith.addf %179, %180 : vector<8x128xf32>
    %cst_71 = arith.constant 5.000000e-01 : f32
    %182 = vector.broadcast %cst_71 : f32 to vector<8x128xf32>
    %183 = arith.mulf %182, %181 : vector<8x128xf32>
    %184 = math.tanh %183 : vector<8x128xf32>
    %cst_72 = arith.constant 5.000000e-01 : f32
    %185 = vector.broadcast %cst_72 : f32 to vector<8x128xf32>
    %186 = arith.mulf %185, %184 : vector<8x128xf32>
    %cst_73 = arith.constant 5.000000e-01 : f32
    %187 = vector.broadcast %cst_73 : f32 to vector<8x128xf32>
    %188 = arith.addf %186, %187 : vector<8x128xf32>
    %189 = vector.extract_strided_slice %178 {offsets = [0, 128], sizes = [8, 128], strides = [1, 1]} : vector<8x384xf32> to vector<8x128xf32>
    %190 = vector.extract_strided_slice %174 {offsets = [0, 128], sizes = [8, 128], strides = [1, 1]} : vector<8x384xf32> to vector<8x128xf32>
    %191 = arith.addf %189, %190 : vector<8x128xf32>
    %cst_74 = arith.constant 5.000000e-01 : f32
    %192 = vector.broadcast %cst_74 : f32 to vector<8x128xf32>
    %193 = arith.mulf %192, %191 : vector<8x128xf32>
    %194 = math.tanh %193 : vector<8x128xf32>
    %cst_75 = arith.constant 5.000000e-01 : f32
    %195 = vector.broadcast %cst_75 : f32 to vector<8x128xf32>
    %196 = arith.mulf %195, %194 : vector<8x128xf32>
    %cst_76 = arith.constant 5.000000e-01 : f32
    %197 = vector.broadcast %cst_76 : f32 to vector<8x128xf32>
    %198 = arith.addf %196, %197 : vector<8x128xf32>
    %199 = vector.extract_strided_slice %178 {offsets = [0, 256], sizes = [8, 128], strides = [1, 1]} : vector<8x384xf32> to vector<8x128xf32>
    %200 = vector.extract_strided_slice %174 {offsets = [0, 256], sizes = [8, 128], strides = [1, 1]} : vector<8x384xf32> to vector<8x128xf32>
    %201 = arith.addf %200, %20 : vector<8x128xf32>
    %202 = arith.mulf %188, %201 : vector<8x128xf32>
    %203 = arith.addf %199, %202 : vector<8x128xf32>
    %204 = math.tanh %203 : vector<8x128xf32>
    %cst_77 = arith.constant 1.000000e+00 : f32
    %205 = vector.broadcast %cst_77 : f32 to vector<8x128xf32>
    %206 = arith.subf %205, %198 : vector<8x128xf32>
    %207 = arith.mulf %206, %204 : vector<8x128xf32>
    %208 = arith.mulf %198, %159 : vector<8x128xf32>
    %209 = arith.addf %207, %208 : vector<8x128xf32>
    %210 = arith.index_cast %c3_i32 : i32 to index
    %c0_78 = arith.constant 0 : index
    %c0_79 = arith.constant 0 : index
    %211 = vector.load %arg10[%210, %c0_78, %c0_79] : memref<8x8x128xf32, #tpu.memory_space<vmem>>, vector<1x8x128xf32>
    %212 = vector.shape_cast %211 : vector<1x8x128xf32> to vector<8x128xf32>
    %213 = vector.shape_cast %209 : vector<8x128xf32> to vector<1x8x128xf32>
    tpu.vector_store %arg10[%210, %c0_78, %c0_79], %213 {strides = array<i32>} : memref<8x8x128xf32, #tpu.memory_space<vmem>>, vector<1x8x128xf32>,
    %214 = arith.index_cast %c3_i32 : i32 to index
    %c0_80 = arith.constant 0 : index
    %c0_81 = arith.constant 0 : index
    %215 = vector.load %arg2[%214, %c0_80, %c0_81] : memref<8x8x128xf32, #tpu.memory_space<vmem>>, vector<1x8x128xf32>
    %216 = vector.shape_cast %215 : vector<1x8x128xf32> to vector<8x128xf32>
    %cst_82 = arith.constant dense<0.000000e+00> : vector<8x384xf32>
    %217 = tpu.matmul %216, %0, %cst_82 {dimension_numbers = #tpu.dot_dimension_numbers<[1], [0], [0], [1], [0, 0, 1, 1], [], []>} : vector<8x128xf32>, vector<128x384xf32>, vector<8x384xf32> -> vector<8x384xf32>
    %218 = arith.addf %217, %22 : vector<8x384xf32>
    %219 = arith.addi %16, %c3_i32 : i32
    %220 = arith.index_cast %219 : i32 to index
    %c0_83 = arith.constant 0 : index
    %c0_84 = arith.constant 0 : index
    %221 = vector.load %arg13[%220, %c0_83, %c0_84] : memref<16x8x384xf32, #tpu.memory_space<vmem>>, vector<1x8x384xf32>
    %222 = vector.shape_cast %221 : vector<1x8x384xf32> to vector<8x384xf32>
    %223 = vector.shape_cast %218 : vector<8x384xf32> to vector<1x8x384xf32>
    tpu.vector_store %arg13[%220, %c0_83, %c0_84], %223 {strides = array<i32>} : memref<16x8x384xf32, #tpu.memory_space<vmem>>, vector<1x8x384xf32>,
    %c4_i32 = arith.constant 4 : i32
    %cst_85 = arith.constant dense<0.000000e+00> : vector<8x384xf32>
    %224 = tpu.matmul %209, %17, %cst_85 {dimension_numbers = #tpu.dot_dimension_numbers<[1], [0], [0], [1], [0, 0, 1, 1], [], []>} : vector<8x128xf32>, vector<128x384xf32>, vector<8x384xf32> -> vector<8x384xf32>
    %225 = arith.addi %15, %c4_i32 : i32
    %226 = arith.index_cast %225 : i32 to index
    %c0_86 = arith.constant 0 : index
    %c0_87 = arith.constant 0 : index
    %227 = vector.load %arg13[%226, %c0_86, %c0_87] : memref<16x8x384xf32, #tpu.memory_space<vmem>>, vector<1x8x384xf32>
    %228 = vector.shape_cast %227 : vector<1x8x384xf32> to vector<8x384xf32>
    %229 = vector.extract_strided_slice %228 {offsets = [0, 0], sizes = [8, 128], strides = [1, 1]} : vector<8x384xf32> to vector<8x128xf32>
    %230 = vector.extract_strided_slice %224 {offsets = [0, 0], sizes = [8, 128], strides = [1, 1]} : vector<8x384xf32> to vector<8x128xf32>
    %231 = arith.addf %229, %230 : vector<8x128xf32>
    %cst_88 = arith.constant 5.000000e-01 : f32
    %232 = vector.broadcast %cst_88 : f32 to vector<8x128xf32>
    %233 = arith.mulf %232, %231 : vector<8x128xf32>
    %234 = math.tanh %233 : vector<8x128xf32>
    %cst_89 = arith.constant 5.000000e-01 : f32
    %235 = vector.broadcast %cst_89 : f32 to vector<8x128xf32>
    %236 = arith.mulf %235, %234 : vector<8x128xf32>
    %cst_90 = arith.constant 5.000000e-01 : f32
    %237 = vector.broadcast %cst_90 : f32 to vector<8x128xf32>
    %238 = arith.addf %236, %237 : vector<8x128xf32>
    %239 = vector.extract_strided_slice %228 {offsets = [0, 128], sizes = [8, 128], strides = [1, 1]} : vector<8x384xf32> to vector<8x128xf32>
    %240 = vector.extract_strided_slice %224 {offsets = [0, 128], sizes = [8, 128], strides = [1, 1]} : vector<8x384xf32> to vector<8x128xf32>
    %241 = arith.addf %239, %240 : vector<8x128xf32>
    %cst_91 = arith.constant 5.000000e-01 : f32
    %242 = vector.broadcast %cst_91 : f32 to vector<8x128xf32>
    %243 = arith.mulf %242, %241 : vector<8x128xf32>
    %244 = math.tanh %243 : vector<8x128xf32>
    %cst_92 = arith.constant 5.000000e-01 : f32
    %245 = vector.broadcast %cst_92 : f32 to vector<8x128xf32>
    %246 = arith.mulf %245, %244 : vector<8x128xf32>
    %cst_93 = arith.constant 5.000000e-01 : f32
    %247 = vector.broadcast %cst_93 : f32 to vector<8x128xf32>
    %248 = arith.addf %246, %247 : vector<8x128xf32>
    %249 = vector.extract_strided_slice %228 {offsets = [0, 256], sizes = [8, 128], strides = [1, 1]} : vector<8x384xf32> to vector<8x128xf32>
    %250 = vector.extract_strided_slice %224 {offsets = [0, 256], sizes = [8, 128], strides = [1, 1]} : vector<8x384xf32> to vector<8x128xf32>
    %251 = arith.addf %250, %20 : vector<8x128xf32>
    %252 = arith.mulf %238, %251 : vector<8x128xf32>
    %253 = arith.addf %249, %252 : vector<8x128xf32>
    %254 = math.tanh %253 : vector<8x128xf32>
    %cst_94 = arith.constant 1.000000e+00 : f32
    %255 = vector.broadcast %cst_94 : f32 to vector<8x128xf32>
    %256 = arith.subf %255, %248 : vector<8x128xf32>
    %257 = arith.mulf %256, %254 : vector<8x128xf32>
    %258 = arith.mulf %248, %209 : vector<8x128xf32>
    %259 = arith.addf %257, %258 : vector<8x128xf32>
    %260 = arith.index_cast %c4_i32 : i32 to index
    %c0_95 = arith.constant 0 : index
    %c0_96 = arith.constant 0 : index
    %261 = vector.load %arg10[%260, %c0_95, %c0_96] : memref<8x8x128xf32, #tpu.memory_space<vmem>>, vector<1x8x128xf32>
    %262 = vector.shape_cast %261 : vector<1x8x128xf32> to vector<8x128xf32>
    %263 = vector.shape_cast %259 : vector<8x128xf32> to vector<1x8x128xf32>
    tpu.vector_store %arg10[%260, %c0_95, %c0_96], %263 {strides = array<i32>} : memref<8x8x128xf32, #tpu.memory_space<vmem>>, vector<1x8x128xf32>,
    %264 = arith.index_cast %c4_i32 : i32 to index
    %c0_97 = arith.constant 0 : index
    %c0_98 = arith.constant 0 : index
    %265 = vector.load %arg2[%264, %c0_97, %c0_98] : memref<8x8x128xf32, #tpu.memory_space<vmem>>, vector<1x8x128xf32>
    %266 = vector.shape_cast %265 : vector<1x8x128xf32> to vector<8x128xf32>
    %cst_99 = arith.constant dense<0.000000e+00> : vector<8x384xf32>
    %267 = tpu.matmul %266, %0, %cst_99 {dimension_numbers = #tpu.dot_dimension_numbers<[1], [0], [0], [1], [0, 0, 1, 1], [], []>} : vector<8x128xf32>, vector<128x384xf32>, vector<8x384xf32> -> vector<8x384xf32>
    %268 = arith.addf %267, %22 : vector<8x384xf32>
    %269 = arith.addi %16, %c4_i32 : i32
    %270 = arith.index_cast %269 : i32 to index
    %c0_100 = arith.constant 0 : index
    %c0_101 = arith.constant 0 : index
    %271 = vector.load %arg13[%270, %c0_100, %c0_101] : memref<16x8x384xf32, #tpu.memory_space<vmem>>, vector<1x8x384xf32>
    %272 = vector.shape_cast %271 : vector<1x8x384xf32> to vector<8x384xf32>
    %273 = vector.shape_cast %268 : vector<8x384xf32> to vector<1x8x384xf32>
    tpu.vector_store %arg13[%270, %c0_100, %c0_101], %273 {strides = array<i32>} : memref<16x8x384xf32, #tpu.memory_space<vmem>>, vector<1x8x384xf32>,
    %c5_i32 = arith.constant 5 : i32
    %cst_102 = arith.constant dense<0.000000e+00> : vector<8x384xf32>
    %274 = tpu.matmul %259, %17, %cst_102 {dimension_numbers = #tpu.dot_dimension_numbers<[1], [0], [0], [1], [0, 0, 1, 1], [], []>} : vector<8x128xf32>, vector<128x384xf32>, vector<8x384xf32> -> vector<8x384xf32>
    %275 = arith.addi %15, %c5_i32 : i32
    %276 = arith.index_cast %275 : i32 to index
    %c0_103 = arith.constant 0 : index
    %c0_104 = arith.constant 0 : index
    %277 = vector.load %arg13[%276, %c0_103, %c0_104] : memref<16x8x384xf32, #tpu.memory_space<vmem>>, vector<1x8x384xf32>
    %278 = vector.shape_cast %277 : vector<1x8x384xf32> to vector<8x384xf32>
    %279 = vector.extract_strided_slice %278 {offsets = [0, 0], sizes = [8, 128], strides = [1, 1]} : vector<8x384xf32> to vector<8x128xf32>
    %280 = vector.extract_strided_slice %274 {offsets = [0, 0], sizes = [8, 128], strides = [1, 1]} : vector<8x384xf32> to vector<8x128xf32>
    %281 = arith.addf %279, %280 : vector<8x128xf32>
    %cst_105 = arith.constant 5.000000e-01 : f32
    %282 = vector.broadcast %cst_105 : f32 to vector<8x128xf32>
    %283 = arith.mulf %282, %281 : vector<8x128xf32>
    %284 = math.tanh %283 : vector<8x128xf32>
    %cst_106 = arith.constant 5.000000e-01 : f32
    %285 = vector.broadcast %cst_106 : f32 to vector<8x128xf32>
    %286 = arith.mulf %285, %284 : vector<8x128xf32>
    %cst_107 = arith.constant 5.000000e-01 : f32
    %287 = vector.broadcast %cst_107 : f32 to vector<8x128xf32>
    %288 = arith.addf %286, %287 : vector<8x128xf32>
    %289 = vector.extract_strided_slice %278 {offsets = [0, 128], sizes = [8, 128], strides = [1, 1]} : vector<8x384xf32> to vector<8x128xf32>
    %290 = vector.extract_strided_slice %274 {offsets = [0, 128], sizes = [8, 128], strides = [1, 1]} : vector<8x384xf32> to vector<8x128xf32>
    %291 = arith.addf %289, %290 : vector<8x128xf32>
    %cst_108 = arith.constant 5.000000e-01 : f32
    %292 = vector.broadcast %cst_108 : f32 to vector<8x128xf32>
    %293 = arith.mulf %292, %291 : vector<8x128xf32>
    %294 = math.tanh %293 : vector<8x128xf32>
    %cst_109 = arith.constant 5.000000e-01 : f32
    %295 = vector.broadcast %cst_109 : f32 to vector<8x128xf32>
    %296 = arith.mulf %295, %294 : vector<8x128xf32>
    %cst_110 = arith.constant 5.000000e-01 : f32
    %297 = vector.broadcast %cst_110 : f32 to vector<8x128xf32>
    %298 = arith.addf %296, %297 : vector<8x128xf32>
    %299 = vector.extract_strided_slice %278 {offsets = [0, 256], sizes = [8, 128], strides = [1, 1]} : vector<8x384xf32> to vector<8x128xf32>
    %300 = vector.extract_strided_slice %274 {offsets = [0, 256], sizes = [8, 128], strides = [1, 1]} : vector<8x384xf32> to vector<8x128xf32>
    %301 = arith.addf %300, %20 : vector<8x128xf32>
    %302 = arith.mulf %288, %301 : vector<8x128xf32>
    %303 = arith.addf %299, %302 : vector<8x128xf32>
    %304 = math.tanh %303 : vector<8x128xf32>
    %cst_111 = arith.constant 1.000000e+00 : f32
    %305 = vector.broadcast %cst_111 : f32 to vector<8x128xf32>
    %306 = arith.subf %305, %298 : vector<8x128xf32>
    %307 = arith.mulf %306, %304 : vector<8x128xf32>
    %308 = arith.mulf %298, %259 : vector<8x128xf32>
    %309 = arith.addf %307, %308 : vector<8x128xf32>
    %310 = arith.index_cast %c5_i32 : i32 to index
    %c0_112 = arith.constant 0 : index
    %c0_113 = arith.constant 0 : index
    %311 = vector.load %arg10[%310, %c0_112, %c0_113] : memref<8x8x128xf32, #tpu.memory_space<vmem>>, vector<1x8x128xf32>
    %312 = vector.shape_cast %311 : vector<1x8x128xf32> to vector<8x128xf32>
    %313 = vector.shape_cast %309 : vector<8x128xf32> to vector<1x8x128xf32>
    tpu.vector_store %arg10[%310, %c0_112, %c0_113], %313 {strides = array<i32>} : memref<8x8x128xf32, #tpu.memory_space<vmem>>, vector<1x8x128xf32>,
    %314 = arith.index_cast %c5_i32 : i32 to index
    %c0_114 = arith.constant 0 : index
    %c0_115 = arith.constant 0 : index
    %315 = vector.load %arg2[%314, %c0_114, %c0_115] : memref<8x8x128xf32, #tpu.memory_space<vmem>>, vector<1x8x128xf32>
    %316 = vector.shape_cast %315 : vector<1x8x128xf32> to vector<8x128xf32>
    %cst_116 = arith.constant dense<0.000000e+00> : vector<8x384xf32>
    %317 = tpu.matmul %316, %0, %cst_116 {dimension_numbers = #tpu.dot_dimension_numbers<[1], [0], [0], [1], [0, 0, 1, 1], [], []>} : vector<8x128xf32>, vector<128x384xf32>, vector<8x384xf32> -> vector<8x384xf32>
    %318 = arith.addf %317, %22 : vector<8x384xf32>
    %319 = arith.addi %16, %c5_i32 : i32
    %320 = arith.index_cast %319 : i32 to index
    %c0_117 = arith.constant 0 : index
    %c0_118 = arith.constant 0 : index
    %321 = vector.load %arg13[%320, %c0_117, %c0_118] : memref<16x8x384xf32, #tpu.memory_space<vmem>>, vector<1x8x384xf32>
    %322 = vector.shape_cast %321 : vector<1x8x384xf32> to vector<8x384xf32>
    %323 = vector.shape_cast %318 : vector<8x384xf32> to vector<1x8x384xf32>
    tpu.vector_store %arg13[%320, %c0_117, %c0_118], %323 {strides = array<i32>} : memref<16x8x384xf32, #tpu.memory_space<vmem>>, vector<1x8x384xf32>,
    %c6_i32 = arith.constant 6 : i32
    %cst_119 = arith.constant dense<0.000000e+00> : vector<8x384xf32>
    %324 = tpu.matmul %309, %17, %cst_119 {dimension_numbers = #tpu.dot_dimension_numbers<[1], [0], [0], [1], [0, 0, 1, 1], [], []>} : vector<8x128xf32>, vector<128x384xf32>, vector<8x384xf32> -> vector<8x384xf32>
    %325 = arith.addi %15, %c6_i32 : i32
    %326 = arith.index_cast %325 : i32 to index
    %c0_120 = arith.constant 0 : index
    %c0_121 = arith.constant 0 : index
    %327 = vector.load %arg13[%326, %c0_120, %c0_121] : memref<16x8x384xf32, #tpu.memory_space<vmem>>, vector<1x8x384xf32>
    %328 = vector.shape_cast %327 : vector<1x8x384xf32> to vector<8x384xf32>
    %329 = vector.extract_strided_slice %328 {offsets = [0, 0], sizes = [8, 128], strides = [1, 1]} : vector<8x384xf32> to vector<8x128xf32>
    %330 = vector.extract_strided_slice %324 {offsets = [0, 0], sizes = [8, 128], strides = [1, 1]} : vector<8x384xf32> to vector<8x128xf32>
    %331 = arith.addf %329, %330 : vector<8x128xf32>
    %cst_122 = arith.constant 5.000000e-01 : f32
    %332 = vector.broadcast %cst_122 : f32 to vector<8x128xf32>
    %333 = arith.mulf %332, %331 : vector<8x128xf32>
    %334 = math.tanh %333 : vector<8x128xf32>
    %cst_123 = arith.constant 5.000000e-01 : f32
    %335 = vector.broadcast %cst_123 : f32 to vector<8x128xf32>
    %336 = arith.mulf %335, %334 : vector<8x128xf32>
    %cst_124 = arith.constant 5.000000e-01 : f32
    %337 = vector.broadcast %cst_124 : f32 to vector<8x128xf32>
    %338 = arith.addf %336, %337 : vector<8x128xf32>
    %339 = vector.extract_strided_slice %328 {offsets = [0, 128], sizes = [8, 128], strides = [1, 1]} : vector<8x384xf32> to vector<8x128xf32>
    %340 = vector.extract_strided_slice %324 {offsets = [0, 128], sizes = [8, 128], strides = [1, 1]} : vector<8x384xf32> to vector<8x128xf32>
    %341 = arith.addf %339, %340 : vector<8x128xf32>
    %cst_125 = arith.constant 5.000000e-01 : f32
    %342 = vector.broadcast %cst_125 : f32 to vector<8x128xf32>
    %343 = arith.mulf %342, %341 : vector<8x128xf32>
    %344 = math.tanh %343 : vector<8x128xf32>
    %cst_126 = arith.constant 5.000000e-01 : f32
    %345 = vector.broadcast %cst_126 : f32 to vector<8x128xf32>
    %346 = arith.mulf %345, %344 : vector<8x128xf32>
    %cst_127 = arith.constant 5.000000e-01 : f32
    %347 = vector.broadcast %cst_127 : f32 to vector<8x128xf32>
    %348 = arith.addf %346, %347 : vector<8x128xf32>
    %349 = vector.extract_strided_slice %328 {offsets = [0, 256], sizes = [8, 128], strides = [1, 1]} : vector<8x384xf32> to vector<8x128xf32>
    %350 = vector.extract_strided_slice %324 {offsets = [0, 256], sizes = [8, 128], strides = [1, 1]} : vector<8x384xf32> to vector<8x128xf32>
    %351 = arith.addf %350, %20 : vector<8x128xf32>
    %352 = arith.mulf %338, %351 : vector<8x128xf32>
    %353 = arith.addf %349, %352 : vector<8x128xf32>
    %354 = math.tanh %353 : vector<8x128xf32>
    %cst_128 = arith.constant 1.000000e+00 : f32
    %355 = vector.broadcast %cst_128 : f32 to vector<8x128xf32>
    %356 = arith.subf %355, %348 : vector<8x128xf32>
    %357 = arith.mulf %356, %354 : vector<8x128xf32>
    %358 = arith.mulf %348, %309 : vector<8x128xf32>
    %359 = arith.addf %357, %358 : vector<8x128xf32>
    %360 = arith.index_cast %c6_i32 : i32 to index
    %c0_129 = arith.constant 0 : index
    %c0_130 = arith.constant 0 : index
    %361 = vector.load %arg10[%360, %c0_129, %c0_130] : memref<8x8x128xf32, #tpu.memory_space<vmem>>, vector<1x8x128xf32>
    %362 = vector.shape_cast %361 : vector<1x8x128xf32> to vector<8x128xf32>
    %363 = vector.shape_cast %359 : vector<8x128xf32> to vector<1x8x128xf32>
    tpu.vector_store %arg10[%360, %c0_129, %c0_130], %363 {strides = array<i32>} : memref<8x8x128xf32, #tpu.memory_space<vmem>>, vector<1x8x128xf32>,
    %364 = arith.index_cast %c6_i32 : i32 to index
    %c0_131 = arith.constant 0 : index
    %c0_132 = arith.constant 0 : index
    %365 = vector.load %arg2[%364, %c0_131, %c0_132] : memref<8x8x128xf32, #tpu.memory_space<vmem>>, vector<1x8x128xf32>
    %366 = vector.shape_cast %365 : vector<1x8x128xf32> to vector<8x128xf32>
    %cst_133 = arith.constant dense<0.000000e+00> : vector<8x384xf32>
    %367 = tpu.matmul %366, %0, %cst_133 {dimension_numbers = #tpu.dot_dimension_numbers<[1], [0], [0], [1], [0, 0, 1, 1], [], []>} : vector<8x128xf32>, vector<128x384xf32>, vector<8x384xf32> -> vector<8x384xf32>
    %368 = arith.addf %367, %22 : vector<8x384xf32>
    %369 = arith.addi %16, %c6_i32 : i32
    %370 = arith.index_cast %369 : i32 to index
    %c0_134 = arith.constant 0 : index
    %c0_135 = arith.constant 0 : index
    %371 = vector.load %arg13[%370, %c0_134, %c0_135] : memref<16x8x384xf32, #tpu.memory_space<vmem>>, vector<1x8x384xf32>
    %372 = vector.shape_cast %371 : vector<1x8x384xf32> to vector<8x384xf32>
    %373 = vector.shape_cast %368 : vector<8x384xf32> to vector<1x8x384xf32>
    tpu.vector_store %arg13[%370, %c0_134, %c0_135], %373 {strides = array<i32>} : memref<16x8x384xf32, #tpu.memory_space<vmem>>, vector<1x8x384xf32>,
    %c7_i32 = arith.constant 7 : i32
    %cst_136 = arith.constant dense<0.000000e+00> : vector<8x384xf32>
    %374 = tpu.matmul %359, %17, %cst_136 {dimension_numbers = #tpu.dot_dimension_numbers<[1], [0], [0], [1], [0, 0, 1, 1], [], []>} : vector<8x128xf32>, vector<128x384xf32>, vector<8x384xf32> -> vector<8x384xf32>
    %375 = arith.addi %15, %c7_i32 : i32
    %376 = arith.index_cast %375 : i32 to index
    %c0_137 = arith.constant 0 : index
    %c0_138 = arith.constant 0 : index
    %377 = vector.load %arg13[%376, %c0_137, %c0_138] : memref<16x8x384xf32, #tpu.memory_space<vmem>>, vector<1x8x384xf32>
    %378 = vector.shape_cast %377 : vector<1x8x384xf32> to vector<8x384xf32>
    %379 = vector.extract_strided_slice %378 {offsets = [0, 0], sizes = [8, 128], strides = [1, 1]} : vector<8x384xf32> to vector<8x128xf32>
    %380 = vector.extract_strided_slice %374 {offsets = [0, 0], sizes = [8, 128], strides = [1, 1]} : vector<8x384xf32> to vector<8x128xf32>
    %381 = arith.addf %379, %380 : vector<8x128xf32>
    %cst_139 = arith.constant 5.000000e-01 : f32
    %382 = vector.broadcast %cst_139 : f32 to vector<8x128xf32>
    %383 = arith.mulf %382, %381 : vector<8x128xf32>
    %384 = math.tanh %383 : vector<8x128xf32>
    %cst_140 = arith.constant 5.000000e-01 : f32
    %385 = vector.broadcast %cst_140 : f32 to vector<8x128xf32>
    %386 = arith.mulf %385, %384 : vector<8x128xf32>
    %cst_141 = arith.constant 5.000000e-01 : f32
    %387 = vector.broadcast %cst_141 : f32 to vector<8x128xf32>
    %388 = arith.addf %386, %387 : vector<8x128xf32>
    %389 = vector.extract_strided_slice %378 {offsets = [0, 128], sizes = [8, 128], strides = [1, 1]} : vector<8x384xf32> to vector<8x128xf32>
    %390 = vector.extract_strided_slice %374 {offsets = [0, 128], sizes = [8, 128], strides = [1, 1]} : vector<8x384xf32> to vector<8x128xf32>
    %391 = arith.addf %389, %390 : vector<8x128xf32>
    %cst_142 = arith.constant 5.000000e-01 : f32
    %392 = vector.broadcast %cst_142 : f32 to vector<8x128xf32>
    %393 = arith.mulf %392, %391 : vector<8x128xf32>
    %394 = math.tanh %393 : vector<8x128xf32>
    %cst_143 = arith.constant 5.000000e-01 : f32
    %395 = vector.broadcast %cst_143 : f32 to vector<8x128xf32>
    %396 = arith.mulf %395, %394 : vector<8x128xf32>
    %cst_144 = arith.constant 5.000000e-01 : f32
    %397 = vector.broadcast %cst_144 : f32 to vector<8x128xf32>
    %398 = arith.addf %396, %397 : vector<8x128xf32>
    %399 = vector.extract_strided_slice %378 {offsets = [0, 256], sizes = [8, 128], strides = [1, 1]} : vector<8x384xf32> to vector<8x128xf32>
    %400 = vector.extract_strided_slice %374 {offsets = [0, 256], sizes = [8, 128], strides = [1, 1]} : vector<8x384xf32> to vector<8x128xf32>
    %401 = arith.addf %400, %20 : vector<8x128xf32>
    %402 = arith.mulf %388, %401 : vector<8x128xf32>
    %403 = arith.addf %399, %402 : vector<8x128xf32>
    %404 = math.tanh %403 : vector<8x128xf32>
    %cst_145 = arith.constant 1.000000e+00 : f32
    %405 = vector.broadcast %cst_145 : f32 to vector<8x128xf32>
    %406 = arith.subf %405, %398 : vector<8x128xf32>
    %407 = arith.mulf %406, %404 : vector<8x128xf32>
    %408 = arith.mulf %398, %359 : vector<8x128xf32>
    %409 = arith.addf %407, %408 : vector<8x128xf32>
    %410 = arith.index_cast %c7_i32 : i32 to index
    %c0_146 = arith.constant 0 : index
    %c0_147 = arith.constant 0 : index
    %411 = vector.load %arg10[%410, %c0_146, %c0_147] : memref<8x8x128xf32, #tpu.memory_space<vmem>>, vector<1x8x128xf32>
    %412 = vector.shape_cast %411 : vector<1x8x128xf32> to vector<8x128xf32>
    %413 = vector.shape_cast %409 : vector<8x128xf32> to vector<1x8x128xf32>
    tpu.vector_store %arg10[%410, %c0_146, %c0_147], %413 {strides = array<i32>} : memref<8x8x128xf32, #tpu.memory_space<vmem>>, vector<1x8x128xf32>,
    %414 = arith.index_cast %c7_i32 : i32 to index
    %c0_148 = arith.constant 0 : index
    %c0_149 = arith.constant 0 : index
    %415 = vector.load %arg2[%414, %c0_148, %c0_149] : memref<8x8x128xf32, #tpu.memory_space<vmem>>, vector<1x8x128xf32>
    %416 = vector.shape_cast %415 : vector<1x8x128xf32> to vector<8x128xf32>
    %cst_150 = arith.constant dense<0.000000e+00> : vector<8x384xf32>
    %417 = tpu.matmul %416, %0, %cst_150 {dimension_numbers = #tpu.dot_dimension_numbers<[1], [0], [0], [1], [0, 0, 1, 1], [], []>} : vector<8x128xf32>, vector<128x384xf32>, vector<8x384xf32> -> vector<8x384xf32>
    %418 = arith.addf %417, %22 : vector<8x384xf32>
    %419 = arith.addi %16, %c7_i32 : i32
    %420 = arith.index_cast %419 : i32 to index
    %c0_151 = arith.constant 0 : index
    %c0_152 = arith.constant 0 : index
    %421 = vector.load %arg13[%420, %c0_151, %c0_152] : memref<16x8x384xf32, #tpu.memory_space<vmem>>, vector<1x8x384xf32>
    %422 = vector.shape_cast %421 : vector<1x8x384xf32> to vector<8x384xf32>
    %423 = vector.shape_cast %418 : vector<8x384xf32> to vector<1x8x384xf32>
    tpu.vector_store %arg13[%420, %c0_151, %c0_152], %423 {strides = array<i32>} : memref<16x8x384xf32, #tpu.memory_space<vmem>>, vector<1x8x384xf32>,
    %c8_i32_153 = arith.constant 8 : i32
    %c0_154 = arith.constant 0 : index
    %c0_155 = arith.constant 0 : index
    %424 = vector.load %arg12[%c0_154, %c0_155] : memref<8x128xf32, #tpu.memory_space<vmem>>, vector<8x128xf32>
    tpu.vector_store %arg12[%c0_154, %c0_155], %409 {strides = array<i32>} : memref<8x128xf32, #tpu.memory_space<vmem>>, vector<8x128xf32>,
    %c0_156 = arith.constant 0 : index
    %c0_157 = arith.constant 0 : index
    %c0_158 = arith.constant 0 : index
    %425 = vector.load %arg10[%c0_156, %c0_157, %c0_158] : memref<8x8x128xf32, #tpu.memory_space<vmem>>, vector<8x8x128xf32>
    %426 = vector.shape_cast %425 : vector<8x8x128xf32> to vector<64x128xf32>
    %c0_159 = arith.constant 0 : index
    %c0_160 = arith.constant 0 : index
    %427 = vector.load %arg8[%c0_159, %c0_160] : memref<128x128xf32, #tpu.memory_space<vmem>>, vector<128x128xf32>
    %cst_161 = arith.constant dense<0.000000e+00> : vector<64x128xf32>
    %428 = tpu.matmul %426, %427, %cst_161 {dimension_numbers = #tpu.dot_dimension_numbers<[1], [0], [0], [1], [0, 0, 1, 1], [], []>} : vector<64x128xf32>, vector<128x128xf32>, vector<64x128xf32> -> vector<64x128xf32>
    %c0_162 = arith.constant 0 : index
    %c0_163 = arith.constant 0 : index
    %429 = vector.load %arg9[%c0_162, %c0_163] : memref<1x128xf32, #tpu.memory_space<vmem>>, vector<1x128xf32>
    %430 = vector.broadcast %429 : vector<1x128xf32> to vector<64x128xf32>
    %431 = arith.addf %428, %430 : vector<64x128xf32>
    %cst_164 = arith.constant 5.000000e-01 : f32
    %432 = vector.broadcast %cst_164 : f32 to vector<64x128xf32>
    %433 = arith.mulf %432, %431 : vector<64x128xf32>
    %434 = math.tanh %433 : vector<64x128xf32>
    %cst_165 = arith.constant 5.000000e-01 : f32
    %435 = vector.broadcast %cst_165 : f32 to vector<64x128xf32>
    %436 = arith.mulf %435, %434 : vector<64x128xf32>
    %cst_166 = arith.constant 5.000000e-01 : f32
    %437 = vector.broadcast %cst_166 : f32 to vector<64x128xf32>
    %438 = arith.addf %436, %437 : vector<64x128xf32>
    %439 = vector.shape_cast %438 : vector<64x128xf32> to vector<8x8x128xf32>
    %c0_167 = arith.constant 0 : index
    %c0_168 = arith.constant 0 : index
    %c0_169 = arith.constant 0 : index
    %440 = vector.load %arg11[%c0_167, %c0_168, %c0_169] : memref<8x8x128xf32, #tpu.memory_space<vmem>>, vector<8x8x128xf32>
    tpu.vector_store %arg11[%c0_167, %c0_168, %c0_169], %439 {strides = array<i32>} : memref<8x8x128xf32, #tpu.memory_space<vmem>>, vector<8x8x128xf32>,
    return
  }
  func.func @transform_0(%arg0: i32, %arg1: i32) -> (i32, i32, i32) {
    %c1_i32 = arith.constant 1 : i32
    %0 = arith.addi %arg1, %c1_i32 : i32
    %c0_i32 = arith.constant 0 : i32
    %c0_i32_0 = arith.constant 0 : i32
    return %0, %arg0, %c0_i32 : i32, i32, i32
  }
  func.func @transform_1(%arg0: i32, %arg1: i32) -> (i32, i32, i32) {
    %c0_i32 = arith.constant 0 : i32
    %c0_i32_0 = arith.constant 0 : i32
    %c0_i32_1 = arith.constant 0 : i32
    return %c0_i32, %arg0, %c0_i32_0 : i32, i32, i32
  }
  func.func @transform_2(%arg0: i32, %arg1: i32) -> (i32, i32) {
    %c0_i32 = arith.constant 0 : i32
    %c0_i32_0 = arith.constant 0 : i32
    %c0_i32_1 = arith.constant 0 : i32
    return %c0_i32, %c0_i32_0 : i32, i32
  }
  func.func @transform_3(%arg0: i32, %arg1: i32) -> (i32, i32) {
    %c0_i32 = arith.constant 0 : i32
    %c0_i32_0 = arith.constant 0 : i32
    %c0_i32_1 = arith.constant 0 : i32
    return %c0_i32, %c0_i32_0 : i32, i32
  }
  func.func @transform_4(%arg0: i32, %arg1: i32) -> (i32, i32) {
    %c0_i32 = arith.constant 0 : i32
    %c0_i32_0 = arith.constant 0 : i32
    %c0_i32_1 = arith.constant 0 : i32
    return %c0_i32, %c0_i32_0 : i32, i32
  }
  func.func @transform_5(%arg0: i32, %arg1: i32) -> (i32, i32) {
    %c0_i32 = arith.constant 0 : i32
    %c0_i32_0 = arith.constant 0 : i32
    %c0_i32_1 = arith.constant 0 : i32
    return %c0_i32, %c0_i32_0 : i32, i32
  }
  func.func @transform_6(%arg0: i32, %arg1: i32) -> (i32, i32) {
    %c0_i32 = arith.constant 0 : i32
    %c0_i32_0 = arith.constant 0 : i32
    %c0_i32_1 = arith.constant 0 : i32
    return %c0_i32, %c0_i32_0 : i32, i32
  }
  func.func @transform_7(%arg0: i32, %arg1: i32) -> (i32, i32) {
    %c0_i32 = arith.constant 0 : i32
    %c0_i32_0 = arith.constant 0 : i32
    %c0_i32_1 = arith.constant 0 : i32
    return %c0_i32, %c0_i32_0 : i32, i32
  }
  func.func @transform_8(%arg0: i32, %arg1: i32) -> (i32, i32, i32) {
    %c0_i32 = arith.constant 0 : i32
    %c0_i32_0 = arith.constant 0 : i32
    return %arg1, %arg0, %c0_i32 : i32, i32, i32
  }
  func.func @transform_9(%arg0: i32, %arg1: i32) -> (i32, i32, i32) {
    %c0_i32 = arith.constant 0 : i32
    %c0_i32_0 = arith.constant 0 : i32
    return %arg1, %arg0, %c0_i32 : i32, i32, i32
  }
}

</mosaic_0001>

<bundles_post_ra>
// kernel: sst_ad_prop_forward.1
= control target key start
LH: loop header
LB: loop body
LE: loop exit
PB: predicated region body
PF: predicated region fallthrough
CT: control target
= control target key end

     0   :  { %v6661_v3 = vmov 0.0   ;;  %vm5318_vm0 = vmmov 0   ;;  %s6651_s2 = inlined_call_operand.vmem [shape: f32[128,384], index: 2, kind: input, shape index: {}]   ;;  %s6652_s3 = inlined_call_operand.vmem [shape: f32[128,384], index: 3, kind: input, shape index: {}]   ;;  %s6653_s1 = inlined_call_operand.vmem [shape: f32[16,8,128], index: 1, kind: input, shape index: {}, may-alias: {0,1}]   ;;  %s6654_s0 = inlined_call_operand.vmem [shape: f32[16,8,128], index: 0, kind: input, shape index: {}, may-alias: {0,1}]   ;;  %s6655_s4 = inlined_call_operand.vmem [shape: f32[1,384], index: 4, kind: input, shape index: {}]   ;;  %s6656_s5 = inlined_call_operand.vmem [shape: f32[1,128], index: 5, kind: input, shape index: {}]   ;;  %s6657_s8 = inlined_call_operand.vmem [shape: f32[8,8,128], index: 8, kind: output, shape index: {0}]   ;;  %s6658_s6 = inlined_call_operand.vmem [shape: f32[128,128], index: 6, kind: input, shape index: {}]   ;;  %s6659_s7 = inlined_call_operand.vmem [shape: f32[1,128], index: 7, kind: input, shape index: {}]   ;;  %s6660_s9 = inlined_call_operand.vmem [shape: f32[8,8,128], index: 9, kind: output, shape index: {1}]  }
   0x1   :  { %v54_v0 = vld [vmem:[%s6651_s2 + $0x8] sm:$0xff]  ;;  %v57_v1 = vld [vmem:[%s6651_s2 + $0x20] sm:$0xff]  ;;  %195 = vmatprep.mubr.f32.mxu1 %v6661_v3  ;;  %519 = vmatprep.mubr.f32.mxu0 %v6661_v3  ;;  %v56_v5 = vld [vmem:[%s6651_s2 + $0x18] sm:$0xff] }
   0x2   :  { %v53_v2 = vld [vmem:[%s6651_s2] sm:$0xff]  ;;  %v5380_v4 = vpack.c.bf16 %v57_v1, %v54_v0  ;;  %v384_v6 = vld [vmem:[%s6652_s3 + $0x8] sm:$0xff]  ;;  %v386_v11 = vld [vmem:[%s6652_s3 + $0x18] sm:$0xff] }
   0x3   :  { %v387_v7 = vld [vmem:[%s6652_s3 + $0x20] sm:$0xff]  ;;  %v5391_v8 = vpack.c.bf16 %v56_v5, %v53_v2  ;;  %v60_v12 = vld [vmem:[%s6651_s2 + $0x38] sm:$0xff]  ;;  %v63_v14 = vld [vmem:[%s6651_s2 + $0x50] sm:$0xff] }
   0x4   :  { %6683 = vst [vmem:[#allocation4_spill] sm:$0xff] %v5380_v4  ;;  %v5393_v9 = vpack.c.bf16 %v387_v7, %v384_v6  ;;  %v383_v10 = vld [vmem:[%s6652_s3] sm:$0xff]  ;;  %4225 = vmatprep.subr.bf16.mxu1 %v5380_v4  ;;  %v59_v15 = vld [vmem:[%s6651_s2 + $0x30] sm:$0xff]  ;;  %v62_v16 = vld [vmem:[%s6651_s2 + $0x48] sm:$0xff]  ;;  %v5418_v17 = vpack.c.bf16 %v63_v14, %v60_v12 }
   0x5   :  { %v5405_v13 = vpack.c.bf16 %v386_v11, %v383_v10  ;;  %4227 = vmatpush1.bf16.msra.mxu1 %v5391_v8  ;;  %v5420_v18 = vpack.c.bf16 %v62_v16, %v59_v15  ;;  %v390_v19 = vld [vmem:[%s6652_s3 + $0x38] sm:$0xff]  ;;  %v393_v20 = vld [vmem:[%s6652_s3 + $0x50] sm:$0xff]  ;;  %v392_v23 = vld [vmem:[%s6652_s3 + $0x48] sm:$0xff] }
   0x6   :  { %4289 = vmatprep.subr.bf16.mxu0 %v5393_v9  ;;  %v389_v21 = vld [vmem:[%s6652_s3 + $0x30] sm:$0xff]  ;;  %v5432_v22 = vpack.c.bf16 %v393_v20, %v390_v19  ;;  %v66_v24 = vld [vmem:[%s6651_s2 + $0x68] sm:$0xff]  ;;  %v69_v25 = vld [vmem:[%s6651_s2 + $0x80] sm:$0xff]  ;;  %4229 = vmatprep.subr.bf16.mxu1 %v5418_v17 }
   0x7   :  { %4291 = vmatpush1.bf16.msra.mxu0 %v5405_v13  ;;  %v5444_v26 = vpack.c.bf16 %v392_v23, %v389_v21  ;;  %v5446_v27 = vpack.c.bf16 %v69_v25, %v66_v24  ;;  %v65_v28 = vld [vmem:[%s6651_s2 + $0x60] sm:$0xff]  ;;  %v68_v29 = vld [vmem:[%s6651_s2 + $0x78] sm:$0xff]  ;;  %v396_v30 = vld [vmem:[%s6652_s3 + $0x68] sm:$0xff] }
   0x8   :  { %4293 = vmatprep.subr.bf16.mxu0 %v5432_v22  ;;  %v399_v31 = vld [vmem:[%s6652_s3 + $0x80] sm:$0xff]  ;;  %v398_v33 = vld [vmem:[%s6652_s3 + $0x78] sm:$0xff]  ;;  %v5468_v34 = vpack.c.bf16 %v68_v29, %v65_v28  ;;  %v75_v37 = vld [vmem:[%s6651_s2 + $0xb0] sm:$0xff] }
   0x9   :  { %v395_v32 = vld [vmem:[%s6652_s3 + $0x60] sm:$0xff]  ;;  %4231 = vmatpush1.bf16.msra.mxu1 %v5420_v18  ;;  %v5470_v35 = vpack.c.bf16 %v399_v31, %v396_v30  ;;  %v72_v36 = vld [vmem:[%s6651_s2 + $0x98] sm:$0xff]  ;;  %v71_v38 = vld [vmem:[%s6651_s2 + $0x90] sm:$0xff] }
   0xa   :  { %4233 = vmatprep.subr.bf16.mxu1 %v5446_v27  ;;  %v5483_v39 = vpack.c.bf16 %v398_v33, %v395_v32  ;;  %v5485_v40 = vpack.c.bf16 %v75_v37, %v72_v36  ;;  %v74_v41 = vld [vmem:[%s6651_s2 + $0xa8] sm:$0xff]  ;;  %v402_v42 = vld [vmem:[%s6652_s3 + $0x98] sm:$0xff]  ;;  %v405_v43 = vld [vmem:[%s6652_s3 + $0xb0] sm:$0xff] }
   0xb   :  { %4295 = vmatpush1.bf16.msra.mxu0 %v5444_v26  ;;  %v5497_v44 = vpack.c.bf16 %v405_v43, %v402_v42  ;;  %v401_v45 = vld [vmem:[%s6652_s3 + $0x90] sm:$0xff]  ;;  %v404_v46 = vld [vmem:[%s6652_s3 + $0xa8] sm:$0xff]  ;;  %v81_v48 = vld [vmem:[%s6651_s2 + $0xe0] sm:$0xff]  ;;  %v5512_v49 = vpack.c.bf16 %v74_v41, %v71_v38 }
   0xc   :  { %4297 = vmatprep.subr.bf16.mxu0 %v5470_v35  ;;  %v78_v47 = vld [vmem:[%s6651_s2 + $0xc8] sm:$0xff]  ;;  %v411_v51 = vld [vmem:[%s6652_s3 + $0xe0] sm:$0xff]  ;;  %v5522_v52 = vpack.c.bf16 %v404_v46, %v401_v45  ;;  %v80_v55 = vld [vmem:[%s6651_s2 + $0xd8] sm:$0xff] }
   0xd   :  { %4235 = vmatpush1.bf16.msra.mxu1 %v5468_v34  ;;  %v408_v50 = vld [vmem:[%s6652_s3 + $0xc8] sm:$0xff]  ;;  %v5524_v53 = vpack.c.bf16 %v81_v48, %v78_v47  ;;  %v77_v54 = vld [vmem:[%s6651_s2 + $0xc0] sm:$0xff]  ;;  %v410_v58 = vld [vmem:[%s6652_s3 + $0xd8] sm:$0xff] }
   0xe   :  { %4237 = vmatprep.subr.bf16.mxu1 %v5485_v40  ;;  %v407_v56 = vld [vmem:[%s6652_s3 + $0xc0] sm:$0xff]  ;;  %v5536_v57 = vpack.c.bf16 %v411_v51, %v408_v50  ;;  %v84_v59 = vld [vmem:[%s6651_s2 + $0xf8] sm:$0xff]  ;;  %v87_v60 = vld [vmem:[%s6651_s2 + $0x110] sm:$0xff]  ;;  %v5554_v63 = vpack.c.bf16 %v80_v55, %v77_v54 }
   0xf   :  { %4299 = vmatpush1.bf16.msra.mxu0 %v5483_v39  ;;  %v414_v61 = vld [vmem:[%s6652_s3 + $0xf8] sm:$0xff]  ;;  %v417_v62 = vld [vmem:[%s6652_s3 + $0x110] sm:$0xff]  ;;  %v5558_v0 = vpack.c.bf16 %v410_v58, %v407_v56  ;;  %v5560_v1 = vpack.c.bf16 %v87_v60, %v84_v59  ;;  %v86_v5 = vld [vmem:[%s6651_s2 + $0x108] sm:$0xff] }
  0x10   :  { %4301 = vmatprep.subr.bf16.mxu0 %v5497_v44  ;;  %v83_v2 = vld [vmem:[%s6651_s2 + $0xf0] sm:$0xff]  ;;  %v5572_v7 = vpack.c.bf16 %v417_v62, %v414_v61  ;;  %v416_v10 = vld [vmem:[%s6652_s3 + $0x108] sm:$0xff]  ;;  %v93_v12 = vld [vmem:[%s6651_s2 + $0x140] sm:$0xff] }
  0x11   :  { %4239 = vmatpush1.bf16.msra.mxu1 %v5512_v49  ;;  %v413_v6 = vld [vmem:[%s6652_s3 + $0xf0] sm:$0xff]  ;;  %v90_v11 = vld [vmem:[%s6651_s2 + $0x128] sm:$0xff]  ;;  %v423_v15 = vld [vmem:[%s6652_s3 + $0x140] sm:$0xff]  ;;  %v5590_v16 = vpack.c.bf16 %v86_v5, %v83_v2 }
  0x12   :  { %4241 = vmatprep.subr.bf16.mxu1 %v5524_v53  ;;  %v420_v14 = vld [vmem:[%s6652_s3 + $0x128] sm:$0xff]  ;;  %v5594_v19 = vpack.c.bf16 %v416_v10, %v413_v6  ;;  %v5596_v20 = vpack.c.bf16 %v93_v12, %v90_v11  ;;  %v89_v21 = vld [vmem:[%s6651_s2 + $0x120] sm:$0xff]  ;;  %v92_v23 = vld [vmem:[%s6651_s2 + $0x138] sm:$0xff] }
  0x13   :  { %4303 = vmatpush1.bf16.msra.mxu0 %v5522_v52  ;;  %v419_v24 = vld [vmem:[%s6652_s3 + $0x120] sm:$0xff]  ;;  %v5608_v25 = vpack.c.bf16 %v423_v15, %v420_v14  ;;  %v422_v28 = vld [vmem:[%s6652_s3 + $0x138] sm:$0xff]  ;;  %v99_v30 = vld [vmem:[%s6651_s2 + $0x170] sm:$0xff]  ;;  %v5626_v33 = vpack.c.bf16 %v92_v23, %v89_v21 }
  0x14   :  { %4305 = vmatprep.subr.bf16.mxu0 %v5536_v57  ;;  %v96_v29 = vld [vmem:[%s6651_s2 + $0x158] sm:$0xff]  ;;  %v429_v32 = vld [vmem:[%s6652_s3 + $0x170] sm:$0xff]  ;;  %v5630_v36 = vpack.c.bf16 %v422_v28, %v419_v24  ;;  %v98_v41 = vld [vmem:[%s6651_s2 + $0x168] sm:$0xff] }
  0x15   :  { %4243 = vmatpush1.bf16.msra.mxu1 %v5554_v63  ;;  %6684 = vst [vmem:[#allocation5_spill] sm:$0xff] %v5608_v25  ;;  %v426_v31 = vld [vmem:[%s6652_s3 + $0x158] sm:$0xff]  ;;  %v5632_v37 = vpack.c.bf16 %v99_v30, %v96_v29  ;;  %v95_v38 = vld [vmem:[%s6651_s2 + $0x150] sm:$0xff]  ;;  %v428_v45 = vld [vmem:[%s6652_s3 + $0x168] sm:$0xff] }
  0x16   :  { %4245 = vmatprep.subr.bf16.mxu1 %v5560_v1  ;;  %6685 = vst [vmem:[#allocation6_spill] sm:$0xff] %v5630_v36  ;;  %v425_v42 = vld [vmem:[%s6652_s3 + $0x150] sm:$0xff]  ;;  %v5644_v43 = vpack.c.bf16 %v429_v32, %v426_v31  ;;  %v58_v47 = vld [vmem:[%s6651_s2 + $0x28] sm:$0xff]  ;;  %v5656_v48 = vpack.c.bf16 %v98_v41, %v95_v38  ;;  %v61_v54 = vld [vmem:[%s6651_s2 + $0x40] sm:$0xff] }
  0x17   :  { %4307 = vmatpush1.bf16.msra.mxu0 %v5558_v0  ;;  %v55_v46 = vld [vmem:[%s6651_s2 + $0x10] sm:$0xff]  ;;  %v5660_v50 = vpack.c.bf16 %v428_v45, %v425_v42  ;;  %v64_v55 = vld [vmem:[%s6651_s2 + $0x58] sm:$0xff]  ;;  %v5675_v56 = vld [vmem:[%s6653_s1] sm:$0xff] }
  0x18   :  { %4309 = vmatprep.subr.bf16.mxu0 %v5572_v7  ;;  %6686 = vst [vmem:[#allocation7_spill] sm:$0xff] %v5644_v43  ;;  %v5662_v51 = vpack.c.bf16 %v58_v47, %v55_v46  ;;  %v5679_v58 = vpack.c.bf16 %v64_v55, %v61_v54  ;;  %v67_v59 = vld [vmem:[%s6651_s2 + $0x70] sm:$0xff]  ;;  %v70_v60 = vld [vmem:[%s6651_s2 + $0x88] sm:$0xff]  ;;  %v73_v2 = vld [vmem:[%s6651_s2 + $0xa0] sm:$0xff] }
  0x19   :  { %4247 = vmatpush1.bf16.msra.mxu1 %v5590_v16  ;;  %6687 = vst [vmem:[#allocation8_spill] sm:$0xff] %v5660_v50  ;;  %v5694_v61 = vld [vmem:[%s6653_s1 + $0x8] sm:$0xff]  ;;  %v5698_v62 = vpack.c.bf16 %v70_v60, %v67_v59  ;;  %v76_v5 = vld [vmem:[%s6651_s2 + $0xb8] sm:$0xff]  ;;  %v5715_v6 = vld [vmem:[%s6653_s1 + $0x10] sm:$0xff]  ;;  %v6665_v59 = vmov 0.0|0.0  }
  0x1a   :  { %4249 = vmatprep.subr.bf16.mxu1 %v5596_v20  ;;  %v5718_v10 = vpack.c.bf16 %v76_v5, %v73_v2  ;;  %v79_v11 = vld [vmem:[%s6651_s2 + $0xd0] sm:$0xff]  ;;  %v82_v12 = vld [vmem:[%s6651_s2 + $0xe8] sm:$0xff]  ;;  %v110_v14 = vld [vmem:[%s6653_s1 + $0x18] sm:$0xff] }
  0x1b   :  { %4311 = vmatpush1.bf16.msra.mxu0 %v5594_v19  ;;  %v5735_v15 = vpack.c.bf16 %v82_v12, %v79_v11  ;;  %v85_v21 = vld [vmem:[%s6651_s2 + $0x100] sm:$0xff]  ;;  %v88_v23 = vld [vmem:[%s6651_s2 + $0x118] sm:$0xff]  ;;  %v91_v29 = vld [vmem:[%s6651_s2 + $0x130] sm:$0xff] }
  0x1c   :  { %4313 = vmatprep.subr.bf16.mxu0 %v5608_v25  ;;  %v111_v24 = vld [vmem:[%s6653_s1 + $0x20] sm:$0xff]  ;;  %v5751_v28 = vpack.c.bf16 %v88_v23, %v85_v21  ;;  %v94_v30 = vld [vmem:[%s6651_s2 + $0x148] sm:$0xff]  ;;  %v100_v41 = vld [vmem:[%s6651_s2 + $0x178] sm:$0xff] }
  0x1d   :  { %4251 = vmatpush1.bf16.msra.mxu1 %v5626_v33  ;;  %v112_v31 = vld [vmem:[%s6653_s1 + $0x28] sm:$0xff]  ;;  %v5767_v32 = vpack.c.bf16 %v94_v30, %v91_v29  ;;  %v97_v38 = vld [vmem:[%s6651_s2 + $0x160] sm:$0xff]  ;;  %v113_v42 = vld [vmem:[%s6653_s1 + $0x30] sm:$0xff] }
  0x1e   :  { %4253 = vmatprep.subr.bf16.mxu1 %v5632_v37  ;;  %v5783_v45 = vpack.c.bf16 %v100_v41, %v97_v38  ;;  %v114_v46 = vld [vmem:[%s6653_s1 + $0x38] sm:$0xff]  ;;  %v385_v47 = vld [vmem:[%s6652_s3 + $0x10] sm:$0xff]  ;;  %v388_v54 = vld [vmem:[%s6652_s3 + $0x28] sm:$0xff] }
  0x1f   :  { %4315 = vmatpush1.bf16.msra.mxu0 %v5630_v36  ;;  %v5803_v55 = vpack.c.bf16 %v388_v54, %v385_v47  ;;  %v391_v60 = vld [vmem:[%s6652_s3 + $0x40] sm:$0xff]  ;;  %v394_v2 = vld [vmem:[%s6652_s3 + $0x58] sm:$0xff]  ;;  %v397_v5 = vld [vmem:[%s6652_s3 + $0x70] sm:$0xff] }
  0x20   :  { %4317 = vmatprep.subr.bf16.mxu0 %v5644_v43  ;;  %v400_v11 = vld [vmem:[%s6652_s3 + $0x88] sm:$0xff]  ;;  %v406_v12 = vld [vmem:[%s6652_s3 + $0xb8] sm:$0xff]  ;;  %v415_v29 = vld [vmem:[%s6652_s3 + $0x100] sm:$0xff] }
  0x21   :  { %4255 = vmatpush1.bf16.msra.mxu1 %v5656_v48  ;;  %v412_v23 = vld [vmem:[%s6652_s3 + $0xe8] sm:$0xff]  ;;  %v418_v30 = vld [vmem:[%s6652_s3 + $0x118] sm:$0xff]  ;;  %v421_v38 = vld [vmem:[%s6652_s3 + $0x130] sm:$0xff] }
  0x22   :  { %4257 = vmatprep.subr.bf16.mxu1 %v5662_v51  ;;  %v424_v41 = vld [vmem:[%s6652_s3 + $0x148] sm:$0xff]  ;;  %v430_v47 = vld [vmem:[%s6652_s3 + $0x178] sm:$0xff] }
  0x23   :  { %4319 = vmatpush1.bf16.msra.mxu0 %v5660_v50 }
  0x24   :  { %4345 = vmatprep.subr.bf16.mxu0 %v5380_v4  ;;  %196 = vmatmul.mubr.f32.vlgmr.msra.gmra.mrb[0].mxu1 %v5675_v56 }
  0x25   :  { %4259 = vmatpush3.bf16.msra.mxu1 %v5662_v51  ;;  %201 = vmatprep.mubr.f32.mxu1 %v6661_v3 }
  0x26   :  { %520 = vmatmul.mubr.f32.vlgmr.msra.gmra.mrb[0].mxu0 %v6661_v3  ;;  %4261 = vmatprep.subr.bf16.mxu1 %v5679_v58 }
  0x27   :  { %4347 = vmatpush1.bf16.msra.mxu0 %v5391_v8  ;;  %686 = vmatprep.mubr.f32.mxu0 %v6661_v3 }
  0x28   :  { %202 = vmatmul.mubr.f32.gmra.mrb[2].mxu1 %v5694_v61  ;;  %4349 = vmatprep.subr.bf16.mxu0 %v5418_v17 }
  0x29   :  { %4263 = vmatpush3.bf16.msra.mxu1 %v5679_v58  ;;  %207 = vmatprep.mubr.f32.mxu1 %v6661_v3 }
  0x2a   :  { %4265 = vmatprep.subr.bf16.mxu1 %v5698_v62 }
  0x2b   :  { %4351 = vmatpush1.bf16.msra.mxu0 %v5420_v18 }
  0x2c   :  { %208 = vmatmul.mubr.f32.gmra.mrb[4].mxu1 %v5715_v6  ;;  %4353 = vmatprep.subr.bf16.mxu0 %v5446_v27 }
  0x2d   :  { %4267 = vmatpush3.bf16.msra.mxu1 %v5698_v62  ;;  %213 = vmatprep.mubr.f32.mxu1 %v6661_v3 }
  0x2e   :  { %4269 = vmatprep.subr.bf16.mxu1 %v5718_v10 }
  0x2f   :  { %4355 = vmatpush1.bf16.msra.mxu0 %v5468_v34 }
  0x30   :  { %214 = vmatmul.mubr.f32.gmra.mrb[6].mxu1 %v110_v14  ;;  %4357 = vmatprep.subr.bf16.mxu0 %v5485_v40 }
  0x31   :  { %4271 = vmatpush3.bf16.msra.mxu1 %v5718_v10  ;;  %219 = vmatprep.mubr.f32.mxu1 %v6661_v3 }
  0x32   :  { %4273 = vmatprep.subr.bf16.mxu1 %v5735_v15 }
  0x33   :  { %4359 = vmatpush1.bf16.msra.mxu0 %v5512_v49 }
  0x34   :  { %220 = vmatmul.mubr.f32.gmra.mrb[8].mxu1 %v111_v24  ;;  %4361 = vmatprep.subr.bf16.mxu0 %v5524_v53 }
  0x35   :  { %4275 = vmatpush3.bf16.msra.mxu1 %v5735_v15  ;;  %225 = vmatprep.mubr.f32.mxu1 %v6661_v3 }
  0x36   :  { %4277 = vmatprep.subr.bf16.mxu1 %v5751_v28 }
  0x37   :  { %4363 = vmatpush1.bf16.msra.mxu0 %v5554_v63 }
  0x38   :  { %226 = vmatmul.mubr.f32.gmra.mrb[10].mxu1 %v112_v31  ;;  %4365 = vmatprep.subr.bf16.mxu0 %v5560_v1 }
  0x39   :  { %4279 = vmatpush3.bf16.msra.mxu1 %v5751_v28  ;;  %231 = vmatprep.mubr.f32.mxu1 %v6661_v3 }
  0x3a   :  { %4281 = vmatprep.subr.bf16.mxu1 %v5767_v32 }
  0x3b   :  { %4367 = vmatpush1.bf16.msra.mxu0 %v5590_v16 }
  0x3c   :  { %232 = vmatmul.mubr.f32.gmra.mrb[12].mxu1 %v113_v42  ;;  %4369 = vmatprep.subr.bf16.mxu0 %v5596_v20 }
  0x3d   :  { %4283 = vmatpush3.bf16.msra.mxu1 %v5767_v32  ;;  %237 = vmatprep.mubr.f32.mxu1 %v6661_v3 }
  0x3e   :  { %4285 = vmatprep.subr.bf16.mxu1 %v5783_v45 }
  0x3f   :  { %4371 = vmatpush1.bf16.msra.mxu0 %v5626_v33 }
  0x40   :  { %238 = vmatmul.mubr.f32.gmra.mrb[14].mxu1 %v114_v46  ;;  %4373 = vmatprep.subr.bf16.mxu0 %v5632_v37 }
  0x41   :  { %4287 = vmatpush3.bf16.msra.mxu1 %v5783_v45  ;;  %3608 = vmatprep.mubr.f32.mxu1 %v5675_v56  ;;  %v5816_v56 = vpack.c.bf16 %v394_v2, %v391_v60  ;;  %v3233_v60 = vld [vmem:[%s6654_s0 + $0x40] sm:$0xff]  ;;  %v116_v2 = vlaneseq }
  0x42   :  { %4320 = vmatprep.subr.bf16.mxu1 %v6665_v59 }
  0x43   :  { %4375 = vmatpush1.bf16.msra.mxu0 %v5656_v48 }
  0x44   :  { %3609 = vmatmul.mubr.f32.vlgmr.msra.gmra.mrb[16].mxu1 %v5694_v61  ;;  %4401 = vmatprep.subr.bf16.mxu0 %v5393_v9  ;;  %v5827_v61 = vpack.c.bf16 %v400_v11, %v397_v5  ;;  %v117_v5 = vshrl.u32 %v116_v2, 7 }
  0x45   :  { %4322 = vmatpush3.bf16.msra.mxu1 %v5803_v55  ;;  %3611 = vmatprep.mubr.f32.mxu1 %v5715_v6  ;;  %v403_v6 = vld [vmem:[%s6652_s3 + $0xa0] sm:$0xff] }
  0x46   :  { %4323 = vmatprep.subr.bf16.mxu1 %v6665_v59  ;;  %v5837_v21 = vpack.c.bf16 %v406_v12, %v403_v6  ;;  %687 = vmatmul.mubr.f32.vlgmr.msra.gmra.mrb[2].mxu0 %v3233_v60  ;;  %v118_v11 = vsub.s32 0, %v117_v5  ;;  %v101_v6 = vld [vmem:[%s6655_s4] sm:$0x7]  ;;  %v122_v12 = vsub.s32 1, %v117_v5 }
  0x47   :  { %4403 = vmatpush1.bf16.msra.mxu0 %v5405_v13  ;;  %833 = vmatprep.mubr.f32.mxu0 %v6661_v3 }
  0x48   :  { %3612 = vmatmul.mubr.f32.gmra.mrb[18].mxu1 %v110_v14  ;;  %v409_v14 = vld [vmem:[%s6652_s3 + $0xd0] sm:$0xff]  ;;  %4405 = vmatprep.subr.bf16.mxu0 %v5432_v22 }
  0x49   :  { %4325 = vmatpush3.bf16.msra.mxu1 %v5816_v56  ;;  %3614 = vmatprep.mubr.f32.mxu1 %v111_v24  ;;  %v5847_v24 = vpack.c.bf16 %v412_v23, %v409_v14  ;;  %v119_v14 = vrot.slane %v101_v6, %v118_v11  ;;  %v123_v23 = vrot.slane %v101_v6, %v122_v12 }
  0x4a   :  { %4326 = vmatprep.subr.bf16.mxu1 %v6665_v59 }
  0x4b   :  { %4407 = vmatpush1.bf16.msra.mxu0 %v5444_v26 }
  0x4c   :  { %3615 = vmatmul.mubr.f32.gmra.mrb[20].mxu1 %v112_v31  ;;  %v5859_v31 = vpack.c.bf16 %v418_v30, %v415_v29  ;;  %4409 = vmatprep.subr.bf16.mxu0 %v5470_v35 }
  0x4d   :  { %4328 = vmatpush3.bf16.msra.mxu1 %v5827_v61  ;;  %3617 = vmatprep.mubr.f32.mxu1 %v113_v42  ;;  %v5869_v42 = vpack.c.bf16 %v424_v41, %v421_v38 }
  0x4e   :  { %4329 = vmatprep.subr.bf16.mxu1 %v6665_v59  ;;  %6688 = vst [vmem:[#allocation9_spill] sm:$0xff] %v5859_v31 }
  0x4f   :  { %6689 = vst [vmem:[#allocation10_spill] sm:$0xff] %v5869_v42  ;;  %4411 = vmatpush1.bf16.msra.mxu0 %v5483_v39 }
  0x50   :  { %3618 = vmatmul.mubr.f32.gmra.mrb[22].mxu1 %v114_v46  ;;  %v427_v46 = vld [vmem:[%s6652_s3 + $0x160] sm:$0xff]  ;;  %4413 = vmatprep.subr.bf16.mxu0 %v5497_v44 }
  0x51   :  { %4331 = vmatpush3.bf16.msra.mxu1 %v5837_v21  ;;  %3652 = vmatprep.mubr.msk.f32.mxu1 %vm5318_vm0, %v6661_v3  ;;  %v5879_v54 = vpack.c.bf16 %v430_v47, %v427_v46 }
  0x52   :  { %4332 = vmatprep.subr.bf16.mxu1 %v6665_v59 }
  0x53   :  { %6690 = vst [vmem:[#allocation11_spill] sm:$0xff] %v5879_v54  ;;  %4415 = vmatpush1.bf16.msra.mxu0 %v5522_v52 }
  0x54   :  { %4417 = vmatprep.subr.bf16.mxu0 %v5536_v57 }
  0x55   :  { %4334 = vmatpush3.bf16.msra.mxu1 %v5847_v24 }
  0x56   :  { %4335 = vmatprep.subr.bf16.mxu1 %v6665_v59 }
  0x57   :  { %4419 = vmatpush1.bf16.msra.mxu0 %v5558_v0 }
  0x58   :  { %4421 = vmatprep.subr.bf16.mxu0 %v5572_v7 }
  0x59   :  { %4337 = vmatpush3.bf16.msra.mxu1 %v5859_v31 }
  0x5a   :  { %4338 = vmatprep.subr.bf16.mxu1 %v6665_v59 }
  0x5b   :  { %4423 = vmatpush1.bf16.msra.mxu0 %v5594_v19 }
  0x5c   :  { %4425 = vmatprep.subr.bf16.mxu0 %v5608_v25 }
  0x5d   :  { %4340 = vmatpush3.bf16.msra.mxu1 %v5869_v42 }
  0x5e   :  { %4341 = vmatprep.subr.bf16.mxu1 %v6665_v59 }
  0x5f   :  { %4427 = vmatpush1.bf16.msra.mxu0 %v5630_v36 }
  0x60   :  { %4429 = vmatprep.subr.bf16.mxu0 %v5644_v43 }
  0x61   :  { %4343 = vmatpush3.bf16.msra.mxu1 %v5879_v54 }
  0x62   :  { %4376 = vmatprep.subr.bf16.mxu1 %v6665_v59 }
  0x63   :  { %4431 = vmatpush1.bf16.msra.mxu0 %v5660_v50 }
  0x64   :  { %3653 = vmatmul.mubr.f32.vlgmr.msra.gmra.mrb[24].mxu1 %v6661_v3  ;;  %4457 = vmatprep.subr.bf16.mxu0 %v5380_v4 }
  0x65   :  { %4378 = vmatpush3.bf16.msra.mxu1 %v5662_v51  ;;  %3687 = vmatprep.mubr.msk.f32.mxu1 %vm5318_vm0, %v6661_v3 }
  0x66   :  { %4379 = vmatprep.subr.bf16.mxu1 %v6665_v59 }
  0x69   :  { %4381 = vmatpush3.bf16.msra.mxu1 %v5679_v58 }
  0x6a   :  { %4382 = vmatprep.subr.bf16.mxu1 %v6665_v59 }
  0x6d   :  { %4384 = vmatpush3.bf16.msra.mxu1 %v5698_v62 }
  0x6e   :  { %4385 = vmatprep.subr.bf16.mxu1 %v6665_v59 }
  0x71   :  { %4387 = vmatpush3.bf16.msra.mxu1 %v5718_v10 }
  0x72   :  { %4388 = vmatprep.subr.bf16.mxu1 %v6665_v59 }
  0x75   :  { %4390 = vmatpush3.bf16.msra.mxu1 %v5735_v15 }
  0x76   :  { %4391 = vmatprep.subr.bf16.mxu1 %v6665_v59 }
  0x79   :  { %4393 = vmatpush3.bf16.msra.mxu1 %v5751_v28 }
  0x7a   :  { %4394 = vmatprep.subr.bf16.mxu1 %v6665_v59 }
  0x7d   :  { %4396 = vmatpush3.bf16.msra.mxu1 %v5767_v32 }
  0x7e   :  { %4397 = vmatprep.subr.bf16.mxu1 %v6665_v59 }
  0x81   :  { %4399 = vmatpush3.bf16.msra.mxu1 %v5783_v45 }
  0x82   :  { %4432 = vmatprep.subr.bf16.mxu1 %v6665_v59 }
  0x84   :  { %3688 = vmatmul.mubr.f32.vlgmr.msra.gmra.mrb[26].mxu1 %v3233_v60 }
  0x85   :  { %4434 = vmatpush3.bf16.msra.mxu1 %v5803_v55  ;;  %3722 = vmatprep.mubr.msk.f32.mxu1 %vm5318_vm0, %v6661_v3 }
  0x86   :  { %4435 = vmatprep.subr.bf16.mxu1 %v6665_v59 }
  0x89   :  { %4437 = vmatpush3.bf16.msra.mxu1 %v5816_v56 }
  0x8a   :  { %4438 = vmatprep.subr.bf16.mxu1 %v6665_v59 }
  0x8d   :  { %4440 = vmatpush3.bf16.msra.mxu1 %v5827_v61 }
  0x8e   :  { %4441 = vmatprep.subr.bf16.mxu1 %v6665_v59 }
  0x91   :  { %4443 = vmatpush3.bf16.msra.mxu1 %v5837_v21 }
  0x92   :  { %4444 = vmatprep.subr.bf16.mxu1 %v6665_v59 }
  0x95   :  { %4446 = vmatpush3.bf16.msra.mxu1 %v5847_v24 }
  0x96   :  { %4447 = vmatprep.subr.bf16.mxu1 %v6665_v59 }
  0x99   :  { %4449 = vmatpush3.bf16.msra.mxu1 %v5859_v31 }
  0x9a   :  { %4450 = vmatprep.subr.bf16.mxu1 %v6665_v59 }
  0x9d   :  { %4452 = vmatpush3.bf16.msra.mxu1 %v5869_v42 }
  0x9e   :  { %4453 = vmatprep.subr.bf16.mxu1 %v6665_v59 }
  0xa1   :  { %4455 = vmatpush3.bf16.msra.mxu1 %v5879_v54 }
  0xa2   :  { %4488 = vmatprep.subr.bf16.mxu1 %v6665_v59 }
  0xf7   :  { %v197_v29 = vpop.f32.mrb[0].mxu1 }
  0xf8   :  { %v198_v30 = vadd.f32 %v197_v29, %v119_v14  ;;  %v199_v38 = vpop.f32.mrb[1].mxu1 }
  0xf9   :  { %v521_v41 = vpop.f32.mrb[0].mxu0  ;;  %v200_v46 = vadd.f32 %v199_v38, %v123_v23 }
  0xfa   :  { %v523_v47 = vpop.f32.mrb[1].mxu0  ;;  %v602_v60 = vadd.f32 %v521_v41, %v198_v30 }
  0xfb   :  { %v607_v3 = vadd.f32 %v523_v47, %v200_v46  ;;  %v203_v4 = vpop.f32.mrb[2].mxu1 }
  0xfc   :  { %v5944_v59 = vadd.f32 %v203_v4, %v119_v14  ;;  %v205_v2 = vpop.f32.mrb[3].mxu1 }
  0xfd   :  { %v5946_v54 = vadd.f32 %v205_v2, %v123_v23 }
  0xff   :  { %6691 = vst [vmem:[#allocation12_spill] sm:$0xff] %v5946_v54  ;;  %v209_v50 = vpop.f32.mrb[4].mxu1 }
 0x100   :  { %v5948_v43 = vadd.f32 %v209_v50, %v119_v14  ;;  %v211_v42 = vpop.f32.mrb[5].mxu1 }
 0x101   :  { %v5950_v11 = vadd.f32 %v211_v42, %v123_v23 }
 0x102   :  { %6692 = vst [vmem:[#allocation13_spill] sm:$0xff] %v5948_v43 }
 0x103   :  { %6693 = vst [vmem:[#allocation14_spill] sm:$0xff] %v5950_v11  ;;  %v215_v12 = vpop.f32.mrb[6].mxu1 }
 0x104   :  { %v5952_v29 = vadd.f32 %v215_v12, %v119_v14  ;;  %v217_v36 = vpop.f32.mrb[7].mxu1 }
 0x105   :  { %v5954_v38 = vadd.f32 %v217_v36, %v123_v23 }
 0x106   :  { %6694 = vst [vmem:[#allocation15_spill] sm:$0xff] %v5952_v29  ;;  %v126_v29 = vsub.s32 2, %v117_v5 }
 0x107   :  { %6695 = vst [vmem:[#allocation16_spill] sm:$0xff] %v5954_v38  ;;  %v221_v30 = vpop.f32.mrb[8].mxu1 }
 0x108   :  { %v5956_v41 = vadd.f32 %v221_v30, %v119_v14  ;;  %v223_v4 = vpop.f32.mrb[9].mxu1 }
 0x109   :  { %v5958_v46 = vadd.f32 %v223_v4, %v123_v23 }
 0x10a   :  { %6696 = vst [vmem:[#allocation17_spill] sm:$0xff] %v5956_v41  ;;  %v127_v41 = vrot.slane %v101_v6, %v126_v29 }
 0x10b   :  { %6697 = vst [vmem:[#allocation18_spill] sm:$0xff] %v5958_v46  ;;  %v227_v47 = vpop.f32.mrb[10].mxu1 }
 0x10c   :  { %v5960_v2 = vadd.f32 %v227_v47, %v119_v14  ;;  %v229_v50 = vpop.f32.mrb[11].mxu1 }
 0x10d   :  { %v5962_v43 = vadd.f32 %v229_v50, %v123_v23 }
 0x10e   :  { %6698 = vst [vmem:[#allocation19_spill] sm:$0xff] %v5960_v2 }
 0x10f   :  { %6699 = vst [vmem:[#allocation20_spill] sm:$0xff] %v5962_v43  ;;  %v233_v42 = vpop.f32.mrb[12].mxu1 }
 0x110   :  { %v5964_v11 = vadd.f32 %v233_v42, %v119_v14  ;;  %v235_v12 = vpop.f32.mrb[13].mxu1 }
 0x111   :  { %v5966_v54 = vadd.f32 %v235_v12, %v123_v23 }
 0x112   :  { %6700 = vst [vmem:[#allocation21_spill] sm:$0xff] %v5964_v11 }
 0x113   :  { %6701 = vst [vmem:[#allocation22_spill] sm:$0xff] %v5966_v54  ;;  %v239_v36 = vpop.f32.mrb[14].mxu1 }
 0x114   :  { %v5968_v38 = vadd.f32 %v239_v36, %v119_v14  ;;  %v241_v30 = vpop.f32.mrb[15].mxu1  ;;  %v603_v36 = vmul.f32 0.5, %v602_v60 }
 0x115   :  { %v5970_v4 = vadd.f32 %v241_v30, %v123_v23  ;;  %v608_v30 = vmul.f32 0.5, %v607_v3 }
 0x116   :  { %6702 = vst [vmem:[#allocation23_spill] sm:$0xff] %v5968_v38  ;;  %5251 = vtanh.f32 %v603_v36 }
 0x117   :  { %6703 = vst [vmem:[#allocation24_spill] sm:$0xff] %v5970_v4  ;;  %v3610_v46 = vpop.f32.mrb[16].mxu1  ;;  %5253 = vtanh.f32 %v608_v30 }
 0x118   :  { %v5972_v47 = vadd.f32 %v3610_v46, %v127_v41  ;;  %v310_v2 = vpop.f32.mrb[17].mxu1 }
 0x11b   :  { %v3613_v50 = vpop.f32.mrb[18].mxu1 }
 0x11c   :  { %v5974_v43 = vadd.f32 %v3613_v50, %v127_v41  ;;  %v320_v42 = vpop.f32.mrb[19].mxu1 }
 0x11d   :  { %v5976_v11 = vadd.f32 %v320_v42, %v127_v41  ;;  %v5989_v42 = vld [vmem:[%s6656_s5] ss:$0 sm:$0xff] }
 0x11e   :  { %6704 = vst [vmem:[#allocation25_spill] sm:$0xff] %v5974_v43 }
 0x11f   :  { %6705 = vst [vmem:[#allocation26_spill] sm:$0xff] %v5976_v11  ;;  %v3616_v5 = vpop.f32.mrb[20].mxu1 }
 0x120   :  { %v5978_v12 = vadd.f32 %v3616_v5, %v127_v41  ;;  %v330_v54 = vpop.f32.mrb[21].mxu1  ;;  %v5252_v50 = vpop.eup %5251 }
 0x121   :  { %v5980_v14 = vadd.f32 %v330_v54, %v127_v41  ;;  %v605_v4 = vmul.f32 0.5, %v5252_v50 }
 0x122   :  { %6706 = vst [vmem:[#allocation27_spill] sm:$0xff] %v5978_v12  ;;  %v5254_v12 = vpop.eup %5253 }
 0x123   :  { %6707 = vst [vmem:[#allocation28_spill] sm:$0xff] %v5980_v14  ;;  %v3619_v6 = vpop.f32.mrb[22].mxu1  ;;  %v606_v54 = vadd.f32 0.5, %v605_v4  ;;  %v610_v36 = vmul.f32 0.5, %v5254_v12 }
 0x124   :  { %v5982_v23 = vadd.f32 %v3619_v6, %v127_v41  ;;  %v340_v29 = vpop.f32.mrb[23].mxu1  ;;  %v311_v6 = vadd.f32 %v310_v2, %v127_v41  ;;  %v688_v2 = vpop.f32.mrb[2].mxu0 }
 0x125   :  { %v5984_v46 = vadd.f32 %v340_v29, %v127_v41  ;;  %v611_v3 = vadd.f32 0.5, %v610_v36  ;;  %v6711_v41 = vmov 0.0   ;;  %v690_v12 = vpop.f32.mrb[3].mxu0 }
 0x126   :  { %6708 = vst [vmem:[#allocation29_spill] sm:$0xff] %v5982_v23 }
 0x127   :  { %6709 = vst [vmem:[#allocation30_spill] sm:$0xff] %v5984_v46  ;;  %v616_v46 = vsub.f32 1.0, %v611_v3  ;;  %v618_v50 = vmul.f32 0.0, %v611_v3 }
 0x137   :  { %v592_v5 = vpop.f32.mrb[24].mxu1 }
 0x138   :  { %v612_v60 = vadd.f32 %v5989_v42, %v592_v5  ;;  %v3654_v38 = vpop.f32.mrb[25].mxu1  ;;  %v6713_v5 = vld [vmem:[#allocation10_spill] sm:$0xff] }
 0x139   :  { %v6710_v38 = vmov 0.0|0.0  }
 0x13a   :  { %v613_v23 = vmul.f32 %v612_v60, %v606_v54  ;;  %v6714_v54 = vld [vmem:[#allocation7_spill] sm:$0xff]  ;;  %v6715_v60 = vld [vmem:[#allocation8_spill] sm:$0xff] }
 0x13c   :  { %v614_v29 = vadd.f32 %v613_v23, %v311_v6  ;;  %v3236_v23 = vld [vmem:[%s6654_s0 + $0x48] sm:$0xff]  ;;  %v6716_v6 = vld [vmem:[#allocation11_spill] sm:$0xff] }
 0x13e   :  { %5255 = vtanh.f32 %v614_v29  ;;  %v6717_v29 = vld [vmem:[#allocation4_spill] sm:$0xff] }
 0x148   :  { %v5256_v30 = vpop.eup %5255 }
 0x149   :  { %v617_v14 = vmul.f32 %v5256_v30, %v616_v46  ;;  %v6712_v46 = vld [vmem:[#allocation6_spill] sm:$0xff] }
 0x14b   :  { %v5992_v43 = vadd.f32 %v618_v50, %v617_v14 }
 0x14d   :  { %620 = vst [vmem:[%s6657_s8] sm:$0xff] %v5992_v43  ;;  %834 = vmatmul.mubr.f32.vlgmr.msra.gmra.mrb[4].mxu0 %v5992_v43  ;;  %3723 = vmatmul.mubr.f32.vlgmr.msra.gmra.mrb[28].mxu1 %v5992_v43 }
 0x14e   :  { %4459 = vmatpush1.bf16.msra.mxu0 %v5391_v8  ;;  %4490 = vmatpush3.bf16.msra.mxu1 %v5662_v51 }
 0x14f   :  { %4461 = vmatprep.subr.bf16.mxu0 %v5418_v17  ;;  %4491 = vmatprep.subr.bf16.mxu1 %v6710_v38 }
 0x150   :  { %1003 = vmatprep.mubr.f32.mxu0 %v6711_v41  ;;  %3757 = vmatprep.mubr.msk.f32.mxu1 %vm5318_vm0, %v6711_v41 }
 0x152   :  { %4463 = vmatpush1.bf16.msra.mxu0 %v5420_v18  ;;  %4493 = vmatpush3.bf16.msra.mxu1 %v5679_v58 }
 0x153   :  { %4465 = vmatprep.subr.bf16.mxu0 %v5446_v27  ;;  %4494 = vmatprep.subr.bf16.mxu1 %v6710_v38 }
 0x156   :  { %4467 = vmatpush1.bf16.msra.mxu0 %v5468_v34  ;;  %4496 = vmatpush3.bf16.msra.mxu1 %v5698_v62 }
 0x157   :  { %4469 = vmatprep.subr.bf16.mxu0 %v5485_v40  ;;  %4497 = vmatprep.subr.bf16.mxu1 %v6710_v38  ;;  %v759_v4 = vpop.f32.mrb[26].mxu1 }
 0x158   :  { %v3689_v14 = vpop.f32.mrb[27].mxu1  ;;  %v6718_v4 = vld [vmem:[#allocation12_spill] sm:$0xff] }
 0x15a   :  { %4471 = vmatpush1.bf16.msra.mxu0 %v5512_v49  ;;  %4499 = vmatpush3.bf16.msra.mxu1 %v5718_v10 }
 0x15b   :  { %4473 = vmatprep.subr.bf16.mxu0 %v5524_v53  ;;  %4500 = vmatprep.subr.bf16.mxu1 %v6710_v38 }
 0x15e   :  { %4475 = vmatpush1.bf16.msra.mxu0 %v5554_v63  ;;  %4502 = vmatpush3.bf16.msra.mxu1 %v5735_v15 }
 0x15f   :  { %4477 = vmatprep.subr.bf16.mxu0 %v5560_v1  ;;  %4503 = vmatprep.subr.bf16.mxu1 %v6710_v38 }
 0x162   :  { %4479 = vmatpush1.bf16.msra.mxu0 %v5590_v16  ;;  %4505 = vmatpush3.bf16.msra.mxu1 %v5751_v28 }
 0x163   :  { %4481 = vmatprep.subr.bf16.mxu0 %v5596_v20  ;;  %4506 = vmatprep.subr.bf16.mxu1 %v6710_v38 }
 0x166   :  { %4483 = vmatpush1.bf16.msra.mxu0 %v5626_v33  ;;  %4508 = vmatpush3.bf16.msra.mxu1 %v5767_v32 }
 0x167   :  { %4485 = vmatprep.subr.bf16.mxu0 %v5632_v37  ;;  %4509 = vmatprep.subr.bf16.mxu1 %v6710_v38 }
 0x16a   :  { %4487 = vmatpush1.bf16.msra.mxu0 %v5656_v48  ;;  %4511 = vmatpush3.bf16.msra.mxu1 %v5783_v45 }
 0x16b   :  { %4513 = vmatprep.subr.bf16.mxu0 %v5393_v9  ;;  %4544 = vmatprep.subr.bf16.mxu1 %v6710_v38 }
 0x16d   :  { %1004 = vmatmul.mubr.f32.vlgmr.msra.gmra.mrb[6].mxu0 %v3236_v23  ;;  %3758 = vmatmul.mubr.f32.vlgmr.msra.gmra.mrb[30].mxu1 %v3236_v23 }
 0x16e   :  { %4515 = vmatpush1.bf16.msra.mxu0 %v5405_v13  ;;  %4546 = vmatpush3.bf16.msra.mxu1 %v5803_v55 }
 0x16f   :  { %4517 = vmatprep.subr.bf16.mxu0 %v5432_v22  ;;  %4547 = vmatprep.subr.bf16.mxu1 %v6710_v38 }
 0x170   :  { %1151 = vmatprep.mubr.f32.mxu0 %v6711_v41  ;;  %3792 = vmatprep.mubr.msk.f32.mxu1 %vm5318_vm0, %v6711_v41 }
 0x172   :  { %4519 = vmatpush1.bf16.msra.mxu0 %v5444_v26  ;;  %4549 = vmatpush3.bf16.msra.mxu1 %v5816_v56 }
 0x173   :  { %4521 = vmatprep.subr.bf16.mxu0 %v5470_v35  ;;  %4550 = vmatprep.subr.bf16.mxu1 %v6710_v38 }
 0x176   :  { %4523 = vmatpush1.bf16.msra.mxu0 %v5483_v39  ;;  %4552 = vmatpush3.bf16.msra.mxu1 %v5827_v61 }
 0x177   :  { %4525 = vmatprep.subr.bf16.mxu0 %v5497_v44  ;;  %4553 = vmatprep.subr.bf16.mxu1 %v6710_v38 }
 0x17a   :  { %4527 = vmatpush1.bf16.msra.mxu0 %v5522_v52  ;;  %4555 = vmatpush3.bf16.msra.mxu1 %v5837_v21 }
 0x17b   :  { %4529 = vmatprep.subr.bf16.mxu0 %v5536_v57  ;;  %4556 = vmatprep.subr.bf16.mxu1 %v6710_v38 }
 0x17e   :  { %4531 = vmatpush1.bf16.msra.mxu0 %v5558_v0  ;;  %4558 = vmatpush3.bf16.msra.mxu1 %v5847_v24 }
 0x17f   :  { %4533 = vmatprep.subr.bf16.mxu0 %v5572_v7  ;;  %4559 = vmatprep.subr.bf16.mxu1 %v6710_v38 }
 0x182   :  { %4535 = vmatpush1.bf16.msra.mxu0 %v5594_v19  ;;  %4561 = vmatpush3.bf16.msra.mxu1 %v5859_v31 }
 0x183   :  { %4537 = vmatprep.subr.bf16.mxu0 %v5608_v25  ;;  %4562 = vmatprep.subr.bf16.mxu1 %v6710_v38 }
 0x186   :  { %4539 = vmatpush1.bf16.msra.mxu0 %v6712_v46  ;;  %4564 = vmatpush3.bf16.msra.mxu1 %v6713_v5 }
 0x187   :  { %4541 = vmatprep.subr.bf16.mxu0 %v6714_v54  ;;  %4565 = vmatprep.subr.bf16.mxu1 %v6710_v38 }
 0x18a   :  { %4543 = vmatpush1.bf16.msra.mxu0 %v6715_v60  ;;  %4567 = vmatpush3.bf16.msra.mxu1 %v6716_v6 }
 0x18b   :  { %4569 = vmatprep.subr.bf16.mxu0 %v6717_v29  ;;  %4600 = vmatprep.subr.bf16.mxu1 %v6710_v38 }
 0x220   :  { %v835_v36 = vpop.f32.mrb[4].mxu0  ;;  %v906_v3 = vpop.f32.mrb[28].mxu1 }
 0x221   :  { %v917_v30 = vadd.f32 %v835_v36, %v5944_v59  ;;  %v837_v50 = vpop.f32.mrb[5].mxu0  ;;  %v3724_v2 = vpop.f32.mrb[29].mxu1  ;;  %v927_v6 = vadd.f32 %v5989_v42, %v906_v3  ;;  %v6725_v3 = vld [vmem:[#allocation11_spill] sm:$0xff] }
 0x222   :  { %v922_v12 = vadd.f32 %v837_v50, %v6718_v4  ;;  %v6726_v4 = vld [vmem:[#allocation4_spill] sm:$0xff] }
 0x223   :  { %v918_v14 = vmul.f32 0.5, %v917_v30 }
 0x224   :  { %v923_v23 = vmul.f32 0.5, %v922_v12 }
 0x225   :  { %5257 = vtanh.f32 %v918_v14 }
 0x226   :  { %5259 = vtanh.f32 %v923_v23  ;;  %v6727_v23 = vld [vmem:[#allocation13_spill] sm:$0xff] }
 0x22f   :  { %v5258_v11 = vpop.eup %5257 }
 0x230   :  { %v920_v60 = vmul.f32 0.5, %v5258_v11  ;;  %v5260_v5 = vpop.eup %5259 }
 0x231   :  { %v925_v25 = vmul.f32 0.5, %v5260_v5  ;;  %v6720_v5 = vld [vmem:[#allocation5_spill] sm:$0xff] }
 0x232   :  { %v921_v54 = vadd.f32 0.5, %v920_v60  ;;  %v6722_v60 = vld [vmem:[#allocation10_spill] sm:$0xff] }
 0x233   :  { %v926_v59 = vadd.f32 0.5, %v925_v25 }
 0x234   :  { %v928_v29 = vmul.f32 %v927_v6, %v921_v54  ;;  %v6721_v54 = vld [vmem:[#allocation6_spill] sm:$0xff]  ;;  %v6723_v6 = vld [vmem:[#allocation7_spill] sm:$0xff] }
 0x235   :  { %v931_v36 = vsub.f32 1.0, %v926_v59  ;;  %v933_v30 = vmul.f32 %v926_v59, %v5992_v43 }
 0x236   :  { %v929_v46 = vadd.f32 %v928_v29, %v5972_v47  ;;  %v3239_v47 = vld [vmem:[%s6654_s0 + $0x50] sm:$0xff]  ;;  %v6724_v29 = vld [vmem:[#allocation8_spill] sm:$0xff] }
 0x238   :  { %5261 = vtanh.f32 %v929_v46  ;;  %v6719_v46 = vld [vmem:[#allocation9_spill] sm:$0xff] }
 0x240   :  { %v1005_v25 = vpop.f32.mrb[6].mxu0  ;;  %v1076_v43 = vpop.f32.mrb[30].mxu1 }
 0x241   :  { %v3759_v11 = vpop.f32.mrb[31].mxu1 }
 0x242   :  { %v5262_v2 = vpop.eup %5261 }
 0x243   :  { %v932_v31 = vmul.f32 %v5262_v2, %v931_v36 }
 0x245   :  { %v6078_v50 = vadd.f32 %v933_v30, %v932_v31  ;;  %v1007_v31 = vpop.f32.mrb[7].mxu0  ;;  %v6728_v30 = vld [vmem:[#allocation14_spill] sm:$0xff] }
 0x247   :  { %3234 = vst [vmem:[%s6657_s8 + $0x8] sm:$0xff] %v6078_v50  ;;  %1152 = vmatmul.mubr.f32.vlgmr.msra.gmra.mrb[8].mxu0 %v6078_v50  ;;  %3793 = vmatmul.mubr.f32.vlgmr.msra.gmra.mrb[32].mxu1 %v6078_v50 }
 0x248   :  { %4571 = vmatpush1.bf16.msra.mxu0 %v5391_v8  ;;  %4602 = vmatpush3.bf16.msra.mxu1 %v5662_v51 }
 0x249   :  { %4573 = vmatprep.subr.bf16.mxu0 %v5418_v17  ;;  %4603 = vmatprep.subr.bf16.mxu1 %v6710_v38 }
 0x24a   :  { %1321 = vmatprep.mubr.f32.mxu0 %v6711_v41  ;;  %3827 = vmatprep.mubr.msk.f32.mxu1 %vm5318_vm0, %v6711_v41 }
 0x24c   :  { %4575 = vmatpush1.bf16.msra.mxu0 %v5420_v18  ;;  %4605 = vmatpush3.bf16.msra.mxu1 %v5679_v58 }
 0x24d   :  { %4577 = vmatprep.subr.bf16.mxu0 %v5446_v27  ;;  %4606 = vmatprep.subr.bf16.mxu1 %v6710_v38 }
 0x250   :  { %4579 = vmatpush1.bf16.msra.mxu0 %v5468_v34  ;;  %4608 = vmatpush3.bf16.msra.mxu1 %v5698_v62 }
 0x251   :  { %4581 = vmatprep.subr.bf16.mxu0 %v5485_v40  ;;  %4609 = vmatprep.subr.bf16.mxu1 %v6710_v38 }
 0x254   :  { %4583 = vmatpush1.bf16.msra.mxu0 %v5512_v49  ;;  %4611 = vmatpush3.bf16.msra.mxu1 %v5718_v10 }
 0x255   :  { %4585 = vmatprep.subr.bf16.mxu0 %v5524_v53  ;;  %4612 = vmatprep.subr.bf16.mxu1 %v6710_v38 }
 0x258   :  { %4587 = vmatpush1.bf16.msra.mxu0 %v5554_v63  ;;  %4614 = vmatpush3.bf16.msra.mxu1 %v5735_v15 }
 0x259   :  { %4589 = vmatprep.subr.bf16.mxu0 %v5560_v1  ;;  %4615 = vmatprep.subr.bf16.mxu1 %v6710_v38 }
 0x25c   :  { %4591 = vmatpush1.bf16.msra.mxu0 %v5590_v16  ;;  %4617 = vmatpush3.bf16.msra.mxu1 %v5751_v28 }
 0x25d   :  { %4593 = vmatprep.subr.bf16.mxu0 %v5596_v20  ;;  %4618 = vmatprep.subr.bf16.mxu1 %v6710_v38 }
 0x260   :  { %4595 = vmatpush1.bf16.msra.mxu0 %v5626_v33  ;;  %4620 = vmatpush3.bf16.msra.mxu1 %v5767_v32 }
 0x261   :  { %4597 = vmatprep.subr.bf16.mxu0 %v5632_v37  ;;  %4621 = vmatprep.subr.bf16.mxu1 %v6710_v38 }
 0x264   :  { %4599 = vmatpush1.bf16.msra.mxu0 %v5656_v48  ;;  %4623 = vmatpush3.bf16.msra.mxu1 %v5783_v45 }
 0x265   :  { %4625 = vmatprep.subr.bf16.mxu0 %v5393_v9  ;;  %4656 = vmatprep.subr.bf16.mxu1 %v6710_v38 }
 0x267   :  { %1322 = vmatmul.mubr.f32.vlgmr.msra.gmra.mrb[10].mxu0 %v3239_v47  ;;  %3828 = vmatmul.mubr.f32.vlgmr.msra.gmra.mrb[34].mxu1 %v3239_v47 }
 0x268   :  { %4627 = vmatpush1.bf16.msra.mxu0 %v5405_v13  ;;  %4658 = vmatpush3.bf16.msra.mxu1 %v5803_v55 }
 0x269   :  { %4629 = vmatprep.subr.bf16.mxu0 %v5432_v22  ;;  %4659 = vmatprep.subr.bf16.mxu1 %v6710_v38 }
 0x26a   :  { %1469 = vmatprep.mubr.f32.mxu0 %v6711_v41  ;;  %3862 = vmatprep.mubr.msk.f32.mxu1 %vm5318_vm0, %v6711_v41 }
 0x26c   :  { %4631 = vmatpush1.bf16.msra.mxu0 %v5444_v26  ;;  %4661 = vmatpush3.bf16.msra.mxu1 %v5816_v56 }
 0x26d   :  { %4633 = vmatprep.subr.bf16.mxu0 %v5470_v35  ;;  %4662 = vmatprep.subr.bf16.mxu1 %v6710_v38 }
 0x270   :  { %4635 = vmatpush1.bf16.msra.mxu0 %v5483_v39  ;;  %4664 = vmatpush3.bf16.msra.mxu1 %v5827_v61 }
 0x271   :  { %4637 = vmatprep.subr.bf16.mxu0 %v5497_v44  ;;  %4665 = vmatprep.subr.bf16.mxu1 %v6710_v38 }
 0x274   :  { %4639 = vmatpush1.bf16.msra.mxu0 %v5522_v52  ;;  %4667 = vmatpush3.bf16.msra.mxu1 %v5837_v21 }
 0x275   :  { %4641 = vmatprep.subr.bf16.mxu0 %v5536_v57  ;;  %4668 = vmatprep.subr.bf16.mxu1 %v6710_v38 }
 0x278   :  { %4643 = vmatpush1.bf16.msra.mxu0 %v5558_v0  ;;  %4670 = vmatpush3.bf16.msra.mxu1 %v5847_v24 }
 0x279   :  { %4645 = vmatprep.subr.bf16.mxu0 %v5572_v7  ;;  %4671 = vmatprep.subr.bf16.mxu1 %v6710_v38 }
 0x27c   :  { %4647 = vmatpush1.bf16.msra.mxu0 %v5594_v19  ;;  %4673 = vmatpush3.bf16.msra.mxu1 %v6719_v46 }
 0x27d   :  { %4649 = vmatprep.subr.bf16.mxu0 %v6720_v5  ;;  %4674 = vmatprep.subr.bf16.mxu1 %v6710_v38 }
 0x280   :  { %4651 = vmatpush1.bf16.msra.mxu0 %v6721_v54  ;;  %4676 = vmatpush3.bf16.msra.mxu1 %v6722_v60  ;;  %v6729_v60 = vld [vmem:[#allocation26_spill] sm:$0xff] }
 0x281   :  { %4653 = vmatprep.subr.bf16.mxu0 %v6723_v6  ;;  %4677 = vmatprep.subr.bf16.mxu1 %v6710_v38 }
 0x284   :  { %4655 = vmatpush1.bf16.msra.mxu0 %v6724_v29  ;;  %4679 = vmatpush3.bf16.msra.mxu1 %v6725_v3 }
 0x285   :  { %4681 = vmatprep.subr.bf16.mxu0 %v6726_v4  ;;  %4712 = vmatprep.subr.bf16.mxu1 %v6710_v38 }
 0x31a   :  { %v1153_v12 = vpop.f32.mrb[8].mxu0  ;;  %v1224_v14 = vpop.f32.mrb[32].mxu1 }
 0x31b   :  { %v1235_v59 = vadd.f32 %v1153_v12, %v6727_v23  ;;  %v1155_v36 = vpop.f32.mrb[9].mxu0  ;;  %v3794_v2 = vpop.f32.mrb[33].mxu1  ;;  %v1245_v3 = vadd.f32 %v5989_v42, %v1224_v14  ;;  %v6735_v14 = vld [vmem:[#allocation7_spill] sm:$0xff] }
 0x31c   :  { %v1240_v25 = vadd.f32 %v1155_v36, %v6728_v30  ;;  %v6736_v30 = vld [vmem:[#allocation8_spill] sm:$0xff] }
 0x31d   :  { %v1236_v43 = vmul.f32 0.5, %v1235_v59 }
 0x31e   :  { %v1241_v31 = vmul.f32 0.5, %v1240_v25  ;;  %v6737_v25 = vld [vmem:[#allocation11_spill] sm:$0xff] }
 0x31f   :  { %5263 = vtanh.f32 %v1236_v43  ;;  %v6738_v43 = vld [vmem:[#allocation4_spill] sm:$0xff] }
 0x320   :  { %5265 = vtanh.f32 %v1241_v31 }
 0x329   :  { %v5264_v11 = vpop.eup %5263 }
 0x32a   :  { %v1238_v47 = vmul.f32 0.5, %v5264_v11  ;;  %v5266_v6 = vpop.eup %5265 }
 0x32b   :  { %v1243_v5 = vmul.f32 0.5, %v5266_v6  ;;  %v6731_v6 = vld [vmem:[#allocation9_spill] sm:$0xff] }
 0x32c   :  { %v1239_v29 = vadd.f32 0.5, %v1238_v47  ;;  %v6739_v47 = vld [vmem:[#allocation15_spill] sm:$0xff] }
 0x32d   :  { %v1244_v12 = vadd.f32 0.5, %v1243_v5 }
 0x32e   :  { %v1246_v4 = vmul.f32 %v1245_v3, %v1239_v29  ;;  %v6732_v29 = vld [vmem:[#allocation5_spill] sm:$0xff]  ;;  %v6733_v3 = vld [vmem:[#allocation6_spill] sm:$0xff] }
 0x32f   :  { %v1249_v23 = vsub.f32 1.0, %v1244_v12  ;;  %v1251_v59 = vmul.f32 %v1244_v12, %v6078_v50 }
 0x330   :  { %v1247_v54 = vadd.f32 %v1246_v4, %v6729_v60  ;;  %v3242_v60 = vld [vmem:[%s6654_s0 + $0x58] sm:$0xff]  ;;  %v6734_v4 = vld [vmem:[#allocation10_spill] sm:$0xff] }
 0x332   :  { %5267 = vtanh.f32 %v1247_v54 }
 0x33a   :  { %v1323_v50 = vpop.f32.mrb[10].mxu0 }
 0x33b   :  { %v1325_v5 = vpop.f32.mrb[11].mxu0 }
 0x33c   :  { %v5268_v2 = vpop.eup %5267 }
 0x33d   :  { %v1250_v46 = vmul.f32 %v5268_v2, %v1249_v23 }
 0x33f   :  { %v6164_v36 = vadd.f32 %v1251_v59, %v1250_v46  ;;  %v1394_v46 = vpop.f32.mrb[34].mxu1  ;;  %v6740_v59 = vld [vmem:[#allocation16_spill] sm:$0xff] }
 0x340   :  { %v3829_v54 = vpop.f32.mrb[35].mxu1 }
 0x341   :  { %6730 = vst [vmem:[#allocation12_spill] sm:$0xff] %v6164_v36  ;;  %3237 = vst [vmem:[%s6657_s8 + $0x10] sm:$0xff] %v6164_v36  ;;  %1470 = vmatmul.mubr.f32.vlgmr.msra.gmra.mrb[12].mxu0 %v6164_v36  ;;  %3863 = vmatmul.mubr.f32.vlgmr.msra.gmra.mrb[36].mxu1 %v6164_v36 }
 0x342   :  { %4683 = vmatpush1.bf16.msra.mxu0 %v5391_v8  ;;  %4714 = vmatpush3.bf16.msra.mxu1 %v5662_v51 }
 0x343   :  { %4685 = vmatprep.subr.bf16.mxu0 %v5418_v17  ;;  %4715 = vmatprep.subr.bf16.mxu1 %v6710_v38 }
 0x344   :  { %1639 = vmatprep.mubr.f32.mxu0 %v6711_v41  ;;  %3897 = vmatprep.mubr.msk.f32.mxu1 %vm5318_vm0, %v6711_v41 }
 0x346   :  { %4687 = vmatpush1.bf16.msra.mxu0 %v5420_v18  ;;  %4717 = vmatpush3.bf16.msra.mxu1 %v5679_v58 }
 0x347   :  { %4689 = vmatprep.subr.bf16.mxu0 %v5446_v27  ;;  %4718 = vmatprep.subr.bf16.mxu1 %v6710_v38 }
 0x34a   :  { %4691 = vmatpush1.bf16.msra.mxu0 %v5468_v34  ;;  %4720 = vmatpush3.bf16.msra.mxu1 %v5698_v62 }
 0x34b   :  { %4693 = vmatprep.subr.bf16.mxu0 %v5485_v40  ;;  %4721 = vmatprep.subr.bf16.mxu1 %v6710_v38 }
 0x34e   :  { %4695 = vmatpush1.bf16.msra.mxu0 %v5512_v49  ;;  %4723 = vmatpush3.bf16.msra.mxu1 %v5718_v10 }
 0x34f   :  { %4697 = vmatprep.subr.bf16.mxu0 %v5524_v53  ;;  %4724 = vmatprep.subr.bf16.mxu1 %v6710_v38 }
 0x352   :  { %4699 = vmatpush1.bf16.msra.mxu0 %v5554_v63  ;;  %4726 = vmatpush3.bf16.msra.mxu1 %v5735_v15 }
 0x353   :  { %4701 = vmatprep.subr.bf16.mxu0 %v5560_v1  ;;  %4727 = vmatprep.subr.bf16.mxu1 %v6710_v38 }
 0x356   :  { %4703 = vmatpush1.bf16.msra.mxu0 %v5590_v16  ;;  %4729 = vmatpush3.bf16.msra.mxu1 %v5751_v28 }
 0x357   :  { %4705 = vmatprep.subr.bf16.mxu0 %v5596_v20  ;;  %4730 = vmatprep.subr.bf16.mxu1 %v6710_v38 }
 0x35a   :  { %4707 = vmatpush1.bf16.msra.mxu0 %v5626_v33  ;;  %4732 = vmatpush3.bf16.msra.mxu1 %v5767_v32 }
 0x35b   :  { %4709 = vmatprep.subr.bf16.mxu0 %v5632_v37  ;;  %4733 = vmatprep.subr.bf16.mxu1 %v6710_v38 }
 0x35e   :  { %4711 = vmatpush1.bf16.msra.mxu0 %v5656_v48  ;;  %4735 = vmatpush3.bf16.msra.mxu1 %v5783_v45 }
 0x35f   :  { %4737 = vmatprep.subr.bf16.mxu0 %v5393_v9  ;;  %4768 = vmatprep.subr.bf16.mxu1 %v6710_v38 }
 0x361   :  { %1640 = vmatmul.mubr.f32.vlgmr.msra.gmra.mrb[14].mxu0 %v3242_v60  ;;  %3898 = vmatmul.mubr.f32.vlgmr.msra.gmra.mrb[38].mxu1 %v3242_v60 }
 0x362   :  { %4739 = vmatpush1.bf16.msra.mxu0 %v5405_v13  ;;  %4770 = vmatpush3.bf16.msra.mxu1 %v5803_v55 }
 0x363   :  { %4741 = vmatprep.subr.bf16.mxu0 %v5432_v22  ;;  %4771 = vmatprep.subr.bf16.mxu1 %v6710_v38 }
 0x364   :  { %1787 = vmatprep.mubr.f32.mxu0 %v6711_v41  ;;  %3932 = vmatprep.mubr.msk.f32.mxu1 %vm5318_vm0, %v6711_v41 }
 0x366   :  { %4743 = vmatpush1.bf16.msra.mxu0 %v5444_v26  ;;  %4773 = vmatpush3.bf16.msra.mxu1 %v5816_v56 }
 0x367   :  { %4745 = vmatprep.subr.bf16.mxu0 %v5470_v35  ;;  %4774 = vmatprep.subr.bf16.mxu1 %v6710_v38 }
 0x36a   :  { %4747 = vmatpush1.bf16.msra.mxu0 %v5483_v39  ;;  %4776 = vmatpush3.bf16.msra.mxu1 %v5827_v61 }
 0x36b   :  { %4749 = vmatprep.subr.bf16.mxu0 %v5497_v44  ;;  %4777 = vmatprep.subr.bf16.mxu1 %v6710_v38 }
 0x36e   :  { %4751 = vmatpush1.bf16.msra.mxu0 %v5522_v52  ;;  %4779 = vmatpush3.bf16.msra.mxu1 %v5837_v21 }
 0x36f   :  { %4753 = vmatprep.subr.bf16.mxu0 %v5536_v57  ;;  %4780 = vmatprep.subr.bf16.mxu1 %v6710_v38 }
 0x372   :  { %4755 = vmatpush1.bf16.msra.mxu0 %v5558_v0  ;;  %4782 = vmatpush3.bf16.msra.mxu1 %v5847_v24 }
 0x373   :  { %4757 = vmatprep.subr.bf16.mxu0 %v5572_v7  ;;  %4783 = vmatprep.subr.bf16.mxu1 %v6710_v38 }
 0x376   :  { %4759 = vmatpush1.bf16.msra.mxu0 %v5594_v19  ;;  %4785 = vmatpush3.bf16.msra.mxu1 %v6731_v6 }
 0x377   :  { %4761 = vmatprep.subr.bf16.mxu0 %v6732_v29  ;;  %4786 = vmatprep.subr.bf16.mxu1 %v6710_v38 }
 0x37a   :  { %4763 = vmatpush1.bf16.msra.mxu0 %v6733_v3  ;;  %4788 = vmatpush3.bf16.msra.mxu1 %v6734_v4  ;;  %v6741_v4 = vld [vmem:[#allocation25_spill] sm:$0xff] }
 0x37b   :  { %4765 = vmatprep.subr.bf16.mxu0 %v6735_v14  ;;  %4789 = vmatprep.subr.bf16.mxu1 %v6710_v38 }
 0x37e   :  { %4767 = vmatpush1.bf16.msra.mxu0 %v6736_v30  ;;  %4791 = vmatpush3.bf16.msra.mxu1 %v6737_v25 }
 0x37f   :  { %4793 = vmatprep.subr.bf16.mxu0 %v6738_v43  ;;  %4824 = vmatprep.subr.bf16.mxu1 %v6710_v38 }
 0x414   :  { %v1471_v31 = vpop.f32.mrb[12].mxu0  ;;  %v1542_v11 = vpop.f32.mrb[36].mxu1 }
 0x415   :  { %v1553_v12 = vadd.f32 %v1471_v31, %v6739_v47  ;;  %v1473_v23 = vpop.f32.mrb[13].mxu0  ;;  %v3864_v2 = vpop.f32.mrb[37].mxu1  ;;  %v1563_v25 = vadd.f32 %v5989_v42, %v1542_v11  ;;  %v6746_v11 = vld [vmem:[#allocation10_spill] sm:$0xff] }
 0x416   :  { %v1558_v50 = vadd.f32 %v1473_v23, %v6740_v59  ;;  %v6747_v59 = vld [vmem:[#allocation7_spill] sm:$0xff] }
 0x417   :  { %v1554_v46 = vmul.f32 0.5, %v1553_v12 }
 0x418   :  { %v1559_v5 = vmul.f32 0.5, %v1558_v50  ;;  %v6748_v50 = vld [vmem:[#allocation8_spill] sm:$0xff] }
 0x419   :  { %5269 = vtanh.f32 %v1554_v46  ;;  %v6749_v46 = vld [vmem:[#allocation11_spill] sm:$0xff] }
 0x41a   :  { %5271 = vtanh.f32 %v1559_v5  ;;  %v6750_v5 = vld [vmem:[#allocation4_spill] sm:$0xff] }
 0x423   :  { %v5270_v54 = vpop.eup %5269 }
 0x424   :  { %v1556_v60 = vmul.f32 0.5, %v5270_v54  ;;  %v5272_v14 = vpop.eup %5271 }
 0x425   :  { %v1561_v29 = vmul.f32 0.5, %v5272_v14  ;;  %v3245_v14 = vld [vmem:[%s6654_s0 + $0x60] sm:$0xff] }
 0x426   :  { %v1557_v30 = vadd.f32 0.5, %v1556_v60 }
 0x427   :  { %v1562_v31 = vadd.f32 0.5, %v1561_v29 }
 0x428   :  { %v1564_v43 = vmul.f32 %v1563_v25, %v1557_v30  ;;  %v6743_v30 = vld [vmem:[#allocation9_spill] sm:$0xff] }
 0x429   :  { %v1567_v47 = vsub.f32 1.0, %v1562_v31  ;;  %v1569_v12 = vmul.f32 %v1562_v31, %v6164_v36  ;;  %v6744_v25 = vld [vmem:[#allocation5_spill] sm:$0xff] }
 0x42a   :  { %v1565_v3 = vadd.f32 %v1564_v43, %v6741_v4  ;;  %v6745_v43 = vld [vmem:[#allocation6_spill] sm:$0xff]  ;;  %v6751_v31 = vld [vmem:[#allocation17_spill] sm:$0xff] }
 0x42c   :  { %5273 = vtanh.f32 %v1565_v3 }
 0x434   :  { %v1712_v29 = vpop.f32.mrb[38].mxu1 }
 0x435   :  { %v3899_v4 = vpop.f32.mrb[39].mxu1 }
 0x436   :  { %v5274_v2 = vpop.eup %5273 }
 0x437   :  { %v1568_v6 = vmul.f32 %v5274_v2, %v1567_v47 }
 0x439   :  { %v6250_v23 = vadd.f32 %v1569_v12, %v1568_v6  ;;  %v1641_v6 = vpop.f32.mrb[14].mxu0 }
 0x43a   :  { %v1643_v3 = vpop.f32.mrb[15].mxu0  ;;  %v6752_v6 = vld [vmem:[#allocation18_spill] sm:$0xff] }
 0x43b   :  { %6742 = vst [vmem:[#allocation13_spill] sm:$0xff] %v6250_v23  ;;  %3240 = vst [vmem:[%s6657_s8 + $0x18] sm:$0xff] %v6250_v23  ;;  %1788 = vmatmul.mubr.f32.vlgmr.msra.gmra.mrb[16].mxu0 %v6250_v23  ;;  %3933 = vmatmul.mubr.f32.vlgmr.msra.gmra.mrb[40].mxu1 %v6250_v23 }
 0x43c   :  { %4795 = vmatpush1.bf16.msra.mxu0 %v5391_v8  ;;  %4826 = vmatpush3.bf16.msra.mxu1 %v5662_v51 }
 0x43d   :  { %4797 = vmatprep.subr.bf16.mxu0 %v5418_v17  ;;  %4827 = vmatprep.subr.bf16.mxu1 %v6710_v38 }
 0x43e   :  { %1957 = vmatprep.mubr.f32.mxu0 %v6711_v41  ;;  %3967 = vmatprep.mubr.msk.f32.mxu1 %vm5318_vm0, %v6711_v41 }
 0x440   :  { %4799 = vmatpush1.bf16.msra.mxu0 %v5420_v18  ;;  %4829 = vmatpush3.bf16.msra.mxu1 %v5679_v58 }
 0x441   :  { %4801 = vmatprep.subr.bf16.mxu0 %v5446_v27  ;;  %4830 = vmatprep.subr.bf16.mxu1 %v6710_v38 }
 0x444   :  { %4803 = vmatpush1.bf16.msra.mxu0 %v5468_v34  ;;  %4832 = vmatpush3.bf16.msra.mxu1 %v5698_v62 }
 0x445   :  { %4805 = vmatprep.subr.bf16.mxu0 %v5485_v40  ;;  %4833 = vmatprep.subr.bf16.mxu1 %v6710_v38 }
 0x448   :  { %4807 = vmatpush1.bf16.msra.mxu0 %v5512_v49  ;;  %4835 = vmatpush3.bf16.msra.mxu1 %v5718_v10 }
 0x449   :  { %4809 = vmatprep.subr.bf16.mxu0 %v5524_v53  ;;  %4836 = vmatprep.subr.bf16.mxu1 %v6710_v38 }
 0x44c   :  { %4811 = vmatpush1.bf16.msra.mxu0 %v5554_v63  ;;  %4838 = vmatpush3.bf16.msra.mxu1 %v5735_v15 }
 0x44d   :  { %4813 = vmatprep.subr.bf16.mxu0 %v5560_v1  ;;  %4839 = vmatprep.subr.bf16.mxu1 %v6710_v38 }
 0x450   :  { %4815 = vmatpush1.bf16.msra.mxu0 %v5590_v16  ;;  %4841 = vmatpush3.bf16.msra.mxu1 %v5751_v28 }
 0x451   :  { %4817 = vmatprep.subr.bf16.mxu0 %v5596_v20  ;;  %4842 = vmatprep.subr.bf16.mxu1 %v6710_v38 }
 0x454   :  { %4819 = vmatpush1.bf16.msra.mxu0 %v5626_v33  ;;  %4844 = vmatpush3.bf16.msra.mxu1 %v5767_v32 }
 0x455   :  { %4821 = vmatprep.subr.bf16.mxu0 %v5632_v37  ;;  %4845 = vmatprep.subr.bf16.mxu1 %v6710_v38 }
 0x458   :  { %4823 = vmatpush1.bf16.msra.mxu0 %v5656_v48  ;;  %4847 = vmatpush3.bf16.msra.mxu1 %v5783_v45 }
 0x459   :  { %4849 = vmatprep.subr.bf16.mxu0 %v5393_v9  ;;  %4880 = vmatprep.subr.bf16.mxu1 %v6710_v38 }
 0x45b   :  { %1958 = vmatmul.mubr.f32.vlgmr.msra.gmra.mrb[18].mxu0 %v3245_v14  ;;  %3968 = vmatmul.mubr.f32.vlgmr.msra.gmra.mrb[42].mxu1 %v3245_v14 }
 0x45c   :  { %4851 = vmatpush1.bf16.msra.mxu0 %v5405_v13  ;;  %4882 = vmatpush3.bf16.msra.mxu1 %v5803_v55 }
 0x45d   :  { %4853 = vmatprep.subr.bf16.mxu0 %v5432_v22  ;;  %4883 = vmatprep.subr.bf16.mxu1 %v6710_v38 }
 0x45e   :  { %2105 = vmatprep.mubr.f32.mxu0 %v6711_v41  ;;  %4002 = vmatprep.mubr.msk.f32.mxu1 %vm5318_vm0, %v6711_v41 }
 0x460   :  { %4855 = vmatpush1.bf16.msra.mxu0 %v5444_v26  ;;  %4885 = vmatpush3.bf16.msra.mxu1 %v5816_v56 }
 0x461   :  { %4857 = vmatprep.subr.bf16.mxu0 %v5470_v35  ;;  %4886 = vmatprep.subr.bf16.mxu1 %v6710_v38 }
 0x464   :  { %4859 = vmatpush1.bf16.msra.mxu0 %v5483_v39  ;;  %4888 = vmatpush3.bf16.msra.mxu1 %v5827_v61 }
 0x465   :  { %4861 = vmatprep.subr.bf16.mxu0 %v5497_v44  ;;  %4889 = vmatprep.subr.bf16.mxu1 %v6710_v38 }
 0x468   :  { %4863 = vmatpush1.bf16.msra.mxu0 %v5522_v52  ;;  %4891 = vmatpush3.bf16.msra.mxu1 %v5837_v21 }
 0x469   :  { %4865 = vmatprep.subr.bf16.mxu0 %v5536_v57  ;;  %4892 = vmatprep.subr.bf16.mxu1 %v6710_v38 }
 0x46c   :  { %4867 = vmatpush1.bf16.msra.mxu0 %v5558_v0  ;;  %4894 = vmatpush3.bf16.msra.mxu1 %v5847_v24 }
 0x46d   :  { %4869 = vmatprep.subr.bf16.mxu0 %v5572_v7  ;;  %4895 = vmatprep.subr.bf16.mxu1 %v6710_v38 }
 0x470   :  { %4871 = vmatpush1.bf16.msra.mxu0 %v5594_v19  ;;  %4897 = vmatpush3.bf16.msra.mxu1 %v6743_v30 }
 0x471   :  { %4873 = vmatprep.subr.bf16.mxu0 %v6744_v25  ;;  %4898 = vmatprep.subr.bf16.mxu1 %v6710_v38 }
 0x474   :  { %4875 = vmatpush1.bf16.msra.mxu0 %v6745_v43  ;;  %4900 = vmatpush3.bf16.msra.mxu1 %v6746_v11  ;;  %v6753_v11 = vld [vmem:[#allocation28_spill] sm:$0xff] }
 0x475   :  { %4877 = vmatprep.subr.bf16.mxu0 %v6747_v59  ;;  %4901 = vmatprep.subr.bf16.mxu1 %v6710_v38 }
 0x478   :  { %4879 = vmatpush1.bf16.msra.mxu0 %v6748_v50  ;;  %4903 = vmatpush3.bf16.msra.mxu1 %v6749_v46 }
 0x479   :  { %4905 = vmatprep.subr.bf16.mxu0 %v6750_v5  ;;  %4936 = vmatprep.subr.bf16.mxu1 %v6710_v38 }
 0x50e   :  { %v1789_v54 = vpop.f32.mrb[16].mxu0  ;;  %v1860_v60 = vpop.f32.mrb[40].mxu1 }
 0x50f   :  { %v1871_v47 = vadd.f32 %v1789_v54, %v6751_v31  ;;  %v1791_v2 = vpop.f32.mrb[17].mxu0  ;;  %v3934_v12 = vpop.f32.mrb[41].mxu1  ;;  %v1881_v46 = vadd.f32 %v5989_v42, %v1860_v60  ;;  %v6759_v60 = vld [vmem:[#allocation8_spill] sm:$0xff] }
 0x510   :  { %v1876_v29 = vadd.f32 %v1791_v2, %v6752_v6  ;;  %v6760_v6 = vld [vmem:[#allocation11_spill] sm:$0xff] }
 0x511   :  { %v1872_v3 = vmul.f32 0.5, %v1871_v47 }
 0x512   :  { %v1877_v4 = vmul.f32 0.5, %v1876_v29  ;;  %v6761_v29 = vld [vmem:[#allocation4_spill] sm:$0xff] }
 0x513   :  { %5275 = vtanh.f32 %v1872_v3 }
 0x514   :  { %5277 = vtanh.f32 %v1877_v4 }
 0x51d   :  { %v5276_v14 = vpop.eup %5275 }
 0x51e   :  { %v1874_v36 = vmul.f32 0.5, %v5276_v14  ;;  %v5278_v59 = vpop.eup %5277  ;;  %v6762_v14 = vld [vmem:[#allocation19_spill] sm:$0xff] }
 0x51f   :  { %v1879_v25 = vmul.f32 0.5, %v5278_v59  ;;  %v6755_v59 = vld [vmem:[#allocation5_spill] sm:$0xff] }
 0x520   :  { %v1875_v50 = vadd.f32 0.5, %v1874_v36 }
 0x521   :  { %v1880_v54 = vadd.f32 0.5, %v1879_v25 }
 0x522   :  { %v1882_v5 = vmul.f32 %v1881_v46, %v1875_v50  ;;  %v6756_v50 = vld [vmem:[#allocation6_spill] sm:$0xff] }
 0x523   :  { %v1885_v31 = vsub.f32 1.0, %v1880_v54  ;;  %v1887_v47 = vmul.f32 %v1880_v54, %v6250_v23  ;;  %v6757_v46 = vld [vmem:[#allocation10_spill] sm:$0xff] }
 0x524   :  { %v1883_v43 = vadd.f32 %v1882_v5, %v6753_v11  ;;  %v6754_v11 = vld [vmem:[#allocation9_spill] sm:$0xff]  ;;  %v6758_v5 = vld [vmem:[#allocation7_spill] sm:$0xff] }
 0x526   :  { %5279 = vtanh.f32 %v1883_v43  ;;  %v3248_v43 = vld [vmem:[%s6654_s0 + $0x68] sm:$0xff] }
 0x52e   :  { %v1959_v42 = vpop.f32.mrb[18].mxu0  ;;  %v2030_v36 = vpop.f32.mrb[42].mxu1 }
 0x52f   :  { %v3969_v25 = vpop.f32.mrb[43].mxu1 }
 0x530   :  { %v5280_v12 = vpop.eup %5279 }
 0x531   :  { %v1886_v30 = vmul.f32 %v5280_v12, %v1885_v31 }
 0x533   :  { %v6336_v2 = vadd.f32 %v1887_v47, %v1886_v30  ;;  %v1961_v30 = vpop.f32.mrb[19].mxu0  ;;  %v6763_v47 = vld [vmem:[#allocation20_spill] sm:$0xff] }
 0x535   :  { %3243 = vst [vmem:[%s6657_s8 + $0x20] sm:$0xff] %v6336_v2  ;;  %2106 = vmatmul.mubr.f32.vlgmr.msra.gmra.mrb[20].mxu0 %v6336_v2  ;;  %4003 = vmatmul.mubr.f32.vlgmr.msra.gmra.mrb[44].mxu1 %v6336_v2 }
 0x536   :  { %4907 = vmatpush1.bf16.msra.mxu0 %v5391_v8  ;;  %4938 = vmatpush3.bf16.msra.mxu1 %v5662_v51 }
 0x537   :  { %4909 = vmatprep.subr.bf16.mxu0 %v5418_v17  ;;  %4939 = vmatprep.subr.bf16.mxu1 %v6710_v38 }
 0x538   :  { %2275 = vmatprep.mubr.f32.mxu0 %v6711_v41  ;;  %4037 = vmatprep.mubr.msk.f32.mxu1 %vm5318_vm0, %v6711_v41 }
 0x53a   :  { %4911 = vmatpush1.bf16.msra.mxu0 %v5420_v18  ;;  %4941 = vmatpush3.bf16.msra.mxu1 %v5679_v58 }
 0x53b   :  { %4913 = vmatprep.subr.bf16.mxu0 %v5446_v27  ;;  %4942 = vmatprep.subr.bf16.mxu1 %v6710_v38 }
 0x53e   :  { %4915 = vmatpush1.bf16.msra.mxu0 %v5468_v34  ;;  %4944 = vmatpush3.bf16.msra.mxu1 %v5698_v62 }
 0x53f   :  { %4917 = vmatprep.subr.bf16.mxu0 %v5485_v40  ;;  %4945 = vmatprep.subr.bf16.mxu1 %v6710_v38 }
 0x542   :  { %4919 = vmatpush1.bf16.msra.mxu0 %v5512_v49  ;;  %4947 = vmatpush3.bf16.msra.mxu1 %v5718_v10 }
 0x543   :  { %4921 = vmatprep.subr.bf16.mxu0 %v5524_v53  ;;  %4948 = vmatprep.subr.bf16.mxu1 %v6710_v38 }
 0x546   :  { %4923 = vmatpush1.bf16.msra.mxu0 %v5554_v63  ;;  %4950 = vmatpush3.bf16.msra.mxu1 %v5735_v15 }
 0x547   :  { %4925 = vmatprep.subr.bf16.mxu0 %v5560_v1  ;;  %4951 = vmatprep.subr.bf16.mxu1 %v6710_v38 }
 0x54a   :  { %4927 = vmatpush1.bf16.msra.mxu0 %v5590_v16  ;;  %4953 = vmatpush3.bf16.msra.mxu1 %v5751_v28 }
 0x54b   :  { %4929 = vmatprep.subr.bf16.mxu0 %v5596_v20  ;;  %4954 = vmatprep.subr.bf16.mxu1 %v6710_v38 }
 0x54e   :  { %4931 = vmatpush1.bf16.msra.mxu0 %v5626_v33  ;;  %4956 = vmatpush3.bf16.msra.mxu1 %v5767_v32 }
 0x54f   :  { %4933 = vmatprep.subr.bf16.mxu0 %v5632_v37  ;;  %4957 = vmatprep.subr.bf16.mxu1 %v6710_v38 }
 0x552   :  { %4935 = vmatpush1.bf16.msra.mxu0 %v5656_v48  ;;  %4959 = vmatpush3.bf16.msra.mxu1 %v5783_v45 }
 0x553   :  { %4961 = vmatprep.subr.bf16.mxu0 %v5393_v9  ;;  %4992 = vmatprep.subr.bf16.mxu1 %v6710_v38 }
 0x555   :  { %2276 = vmatmul.mubr.f32.vlgmr.msra.gmra.mrb[22].mxu0 %v3248_v43  ;;  %4038 = vmatmul.mubr.f32.vlgmr.msra.gmra.mrb[46].mxu1 %v3248_v43 }
 0x556   :  { %4963 = vmatpush1.bf16.msra.mxu0 %v5405_v13  ;;  %4994 = vmatpush3.bf16.msra.mxu1 %v5803_v55 }
 0x557   :  { %4965 = vmatprep.subr.bf16.mxu0 %v5432_v22  ;;  %4995 = vmatprep.subr.bf16.mxu1 %v6710_v38 }
 0x558   :  { %2423 = vmatprep.mubr.f32.mxu0 %v6711_v41  ;;  %4072 = vmatprep.mubr.msk.f32.mxu1 %vm5318_vm0, %v6711_v41 }
 0x55a   :  { %4967 = vmatpush1.bf16.msra.mxu0 %v5444_v26  ;;  %4997 = vmatpush3.bf16.msra.mxu1 %v5816_v56 }
 0x55b   :  { %4969 = vmatprep.subr.bf16.mxu0 %v5470_v35  ;;  %4998 = vmatprep.subr.bf16.mxu1 %v6710_v38 }
 0x55e   :  { %4971 = vmatpush1.bf16.msra.mxu0 %v5483_v39  ;;  %5000 = vmatpush3.bf16.msra.mxu1 %v5827_v61 }
 0x55f   :  { %4973 = vmatprep.subr.bf16.mxu0 %v5497_v44  ;;  %5001 = vmatprep.subr.bf16.mxu1 %v6710_v38 }
 0x562   :  { %4975 = vmatpush1.bf16.msra.mxu0 %v5522_v52  ;;  %5003 = vmatpush3.bf16.msra.mxu1 %v5837_v21 }
 0x563   :  { %4977 = vmatprep.subr.bf16.mxu0 %v5536_v57  ;;  %5004 = vmatprep.subr.bf16.mxu1 %v6710_v38 }
 0x566   :  { %4979 = vmatpush1.bf16.msra.mxu0 %v5558_v0  ;;  %5006 = vmatpush3.bf16.msra.mxu1 %v5847_v24 }
 0x567   :  { %4981 = vmatprep.subr.bf16.mxu0 %v5572_v7  ;;  %5007 = vmatprep.subr.bf16.mxu1 %v6710_v38 }
 0x56a   :  { %4983 = vmatpush1.bf16.msra.mxu0 %v5594_v19  ;;  %5009 = vmatpush3.bf16.msra.mxu1 %v6754_v11 }
 0x56b   :  { %4985 = vmatprep.subr.bf16.mxu0 %v6755_v59  ;;  %5010 = vmatprep.subr.bf16.mxu1 %v6710_v38 }
 0x56e   :  { %4987 = vmatpush1.bf16.msra.mxu0 %v6756_v50  ;;  %5012 = vmatpush3.bf16.msra.mxu1 %v6757_v46 }
 0x56f   :  { %4989 = vmatprep.subr.bf16.mxu0 %v6758_v5  ;;  %5013 = vmatprep.subr.bf16.mxu1 %v6710_v38 }
 0x572   :  { %4991 = vmatpush1.bf16.msra.mxu0 %v6759_v60  ;;  %5015 = vmatpush3.bf16.msra.mxu1 %v6760_v6 }
 0x573   :  { %5017 = vmatprep.subr.bf16.mxu0 %v6761_v29  ;;  %5048 = vmatprep.subr.bf16.mxu1 %v6710_v38  ;;  %v6422_v29 = vld [vmem:[%s6656_s5] ss:$0 sm:$0xff] }
 0x608   :  { %v2107_v3 = vpop.f32.mrb[20].mxu0  ;;  %v2178_v4 = vpop.f32.mrb[44].mxu1 }
 0x609   :  { %v2189_v54 = vadd.f32 %v2107_v3, %v6762_v14  ;;  %v2109_v31 = vpop.f32.mrb[21].mxu0  ;;  %v4004_v12 = vpop.f32.mrb[45].mxu1  ;;  %v2199_v6 = vadd.f32 %v6422_v29, %v2178_v4  ;;  %v6764_v14 = vld [vmem:[#allocation27_spill] sm:$0xff] }
 0x60a   :  { %v2194_v42 = vadd.f32 %v2109_v31, %v6763_v47 }
 0x60b   :  { %v2190_v36 = vmul.f32 0.5, %v2189_v54 }
 0x60c   :  { %v2195_v30 = vmul.f32 0.5, %v2194_v42 }
 0x60d   :  { %5281 = vtanh.f32 %v2190_v36 }
 0x60e   :  { %5283 = vtanh.f32 %v2195_v30 }
 0x617   :  { %v5282_v25 = vpop.eup %5281 }
 0x618   :  { %v2192_v43 = vmul.f32 0.5, %v5282_v25  ;;  %v5284_v3 = vpop.eup %5283 }
 0x619   :  { %v2197_v31 = vmul.f32 0.5, %v5284_v3 }
 0x61a   :  { %v2193_v23 = vadd.f32 0.5, %v2192_v43  ;;  %v3251_v43 = vld [vmem:[%s6654_s0 + $0x70] sm:$0xff] }
 0x61b   :  { %v2198_v54 = vadd.f32 0.5, %v2197_v31 }
 0x61c   :  { %v2200_v60 = vmul.f32 %v2199_v6, %v2193_v23 }
 0x61d   :  { %v2203_v47 = vsub.f32 1.0, %v2198_v54  ;;  %v2205_v30 = vmul.f32 %v2198_v54, %v6336_v2 }
 0x61e   :  { %v2201_v12 = vadd.f32 %v2200_v60, %v6764_v14 }
 0x620   :  { %5285 = vtanh.f32 %v2201_v12 }
 0x628   :  { %v2277_v23 = vpop.f32.mrb[22].mxu0  ;;  %v2348_v60 = vpop.f32.mrb[46].mxu1 }
 0x629   :  { %v2279_v6 = vpop.f32.mrb[23].mxu0  ;;  %v4039_v4 = vpop.f32.mrb[47].mxu1 }
 0x62a   :  { %v5286_v42 = vpop.eup %5285  ;;  %v2997_v6 = vld [vmem:[%s6657_s8 + $0x8] sm:$0xff]  ;;  %v6771_v4 = vld [vmem:[#allocation12_spill] sm:$0xff] }
 0x62b   :  { %v2204_v36 = vmul.f32 %v5286_v42, %v2203_v47 }
 0x62d   :  { %v6427_v25 = vadd.f32 %v2205_v30, %v2204_v36 }
 0x62f   :  { %3246 = vst [vmem:[%s6657_s8 + $0x28] sm:$0xff] %v6427_v25  ;;  %2424 = vmatmul.mubr.f32.vlgmr.msra.gmra.mrb[24].mxu0 %v6427_v25  ;;  %4073 = vmatmul.mubr.f32.vlgmr.msra.gmra.mrb[48].mxu1 %v6427_v25 }
 0x630   :  { %5019 = vmatpush1.bf16.msra.mxu0 %v5391_v8  ;;  %5050 = vmatpush3.bf16.msra.mxu1 %v5662_v51 }
 0x631   :  { %5021 = vmatprep.subr.bf16.mxu0 %v5418_v17  ;;  %5051 = vmatprep.subr.bf16.mxu1 %v6710_v38 }
 0x632   :  { %2593 = vmatprep.mubr.f32.mxu0 %v6711_v41  ;;  %4107 = vmatprep.mubr.msk.f32.mxu1 %vm5318_vm0, %v6711_v41 }
 0x634   :  { %5023 = vmatpush1.bf16.msra.mxu0 %v5420_v18  ;;  %5053 = vmatpush3.bf16.msra.mxu1 %v5679_v58 }
 0x635   :  { %5025 = vmatprep.subr.bf16.mxu0 %v5446_v27  ;;  %5054 = vmatprep.subr.bf16.mxu1 %v6710_v38 }
 0x638   :  { %5027 = vmatpush1.bf16.msra.mxu0 %v5468_v34  ;;  %5056 = vmatpush3.bf16.msra.mxu1 %v5698_v62 }
 0x639   :  { %5029 = vmatprep.subr.bf16.mxu0 %v5485_v40  ;;  %5057 = vmatprep.subr.bf16.mxu1 %v6710_v38 }
 0x63c   :  { %5031 = vmatpush1.bf16.msra.mxu0 %v5512_v49  ;;  %5059 = vmatpush3.bf16.msra.mxu1 %v5718_v10 }
 0x63d   :  { %5033 = vmatprep.subr.bf16.mxu0 %v5524_v53  ;;  %5060 = vmatprep.subr.bf16.mxu1 %v6710_v38 }
 0x640   :  { %5035 = vmatpush1.bf16.msra.mxu0 %v5554_v63  ;;  %5062 = vmatpush3.bf16.msra.mxu1 %v5735_v15 }
 0x641   :  { %5037 = vmatprep.subr.bf16.mxu0 %v5560_v1  ;;  %5063 = vmatprep.subr.bf16.mxu1 %v6710_v38 }
 0x644   :  { %5039 = vmatpush1.bf16.msra.mxu0 %v5590_v16  ;;  %5065 = vmatpush3.bf16.msra.mxu1 %v5751_v28 }
 0x645   :  { %5041 = vmatprep.subr.bf16.mxu0 %v5596_v20  ;;  %5066 = vmatprep.subr.bf16.mxu1 %v6710_v38 }
 0x648   :  { %5043 = vmatpush1.bf16.msra.mxu0 %v5626_v33  ;;  %5068 = vmatpush3.bf16.msra.mxu1 %v5767_v32 }
 0x649   :  { %5045 = vmatprep.subr.bf16.mxu0 %v5632_v37  ;;  %5069 = vmatprep.subr.bf16.mxu1 %v6710_v38 }
 0x64c   :  { %5047 = vmatpush1.bf16.msra.mxu0 %v5656_v48  ;;  %5071 = vmatpush3.bf16.msra.mxu1 %v5783_v45 }
 0x64d   :  { %5073 = vmatprep.subr.bf16.mxu0 %v5393_v9  ;;  %5104 = vmatprep.subr.bf16.mxu1 %v6710_v38  ;;  %v6765_v9 = vld [vmem:[#allocation8_spill] sm:$0xff] }
 0x64f   :  { %2594 = vmatmul.mubr.f32.vlgmr.msra.gmra.mrb[26].mxu0 %v3251_v43  ;;  %4108 = vmatmul.mubr.f32.vlgmr.msra.gmra.mrb[50].mxu1 %v3251_v43  ;;  %v6772_v43 = vld [vmem:[#allocation13_spill] sm:$0xff] }
 0x650   :  { %5075 = vmatpush1.bf16.msra.mxu0 %v5405_v13  ;;  %5106 = vmatpush3.bf16.msra.mxu1 %v5803_v55  ;;  %v6766_v13 = vld [vmem:[#allocation11_spill] sm:$0xff] }
 0x651   :  { %5077 = vmatprep.subr.bf16.mxu0 %v5432_v22  ;;  %5107 = vmatprep.subr.bf16.mxu1 %v6710_v38  ;;  %v6767_v22 = vld [vmem:[#allocation4_spill] sm:$0xff] }
 0x652   :  { %2741 = vmatprep.mubr.f32.mxu0 %v6711_v41  ;;  %4142 = vmatprep.mubr.msk.f32.mxu1 %vm5318_vm0, %v6711_v41 }
 0x654   :  { %5079 = vmatpush1.bf16.msra.mxu0 %v5444_v26  ;;  %5109 = vmatpush3.bf16.msra.mxu1 %v5816_v56 }
 0x655   :  { %5081 = vmatprep.subr.bf16.mxu0 %v5470_v35  ;;  %5110 = vmatprep.subr.bf16.mxu1 %v6710_v38 }
 0x658   :  { %5083 = vmatpush1.bf16.msra.mxu0 %v5483_v39  ;;  %5112 = vmatpush3.bf16.msra.mxu1 %v5827_v61  ;;  %v6768_v39 = vld [vmem:[#allocation21_spill] sm:$0xff] }
 0x659   :  { %5085 = vmatprep.subr.bf16.mxu0 %v5497_v44  ;;  %5113 = vmatprep.subr.bf16.mxu1 %v6710_v38 }
 0x65c   :  { %5087 = vmatpush1.bf16.msra.mxu0 %v5522_v52  ;;  %5115 = vmatpush3.bf16.msra.mxu1 %v5837_v21 }
 0x65d   :  { %5089 = vmatprep.subr.bf16.mxu0 %v5536_v57  ;;  %5116 = vmatprep.subr.bf16.mxu1 %v6710_v38 }
 0x660   :  { %5091 = vmatpush1.bf16.msra.mxu0 %v5558_v0  ;;  %5118 = vmatpush3.bf16.msra.mxu1 %v5847_v24  ;;  %v6769_v0 = vld [vmem:[#allocation22_spill] sm:$0xff] }
 0x661   :  { %5093 = vmatprep.subr.bf16.mxu0 %v5572_v7  ;;  %5119 = vmatprep.subr.bf16.mxu1 %v6710_v38 }
 0x664   :  { %5095 = vmatpush1.bf16.msra.mxu0 %v5594_v19  ;;  %5121 = vmatpush3.bf16.msra.mxu1 %v6754_v11 }
 0x665   :  { %5097 = vmatprep.subr.bf16.mxu0 %v6755_v59  ;;  %5122 = vmatprep.subr.bf16.mxu1 %v6710_v38 }
 0x668   :  { %5099 = vmatpush1.bf16.msra.mxu0 %v6756_v50  ;;  %5124 = vmatpush3.bf16.msra.mxu1 %v6757_v46  ;;  %v6770_v50 = vld [vmem:[#allocation30_spill] sm:$0xff] }
 0x669   :  { %5101 = vmatprep.subr.bf16.mxu0 %v6758_v5  ;;  %5125 = vmatprep.subr.bf16.mxu1 %v6710_v38 }
 0x66c   :  { %5103 = vmatpush1.bf16.msra.mxu0 %v6765_v9  ;;  %5127 = vmatpush3.bf16.msra.mxu1 %v6766_v13 }
 0x66d   :  { %5129 = vmatprep.subr.bf16.mxu0 %v6767_v22  ;;  %5160 = vmatprep.subr.bf16.mxu1 %v6710_v38  ;;  %v6773_v22 = vld [vmem:[#allocation23_spill] sm:$0xff] }
 0x702   :  { %v2425_v26 = vpop.f32.mrb[24].mxu0  ;;  %v2496_v35 = vpop.f32.mrb[48].mxu1 }
 0x703   :  { %v2507_v44 = vadd.f32 %v2425_v26, %v6768_v39  ;;  %v2427_v52 = vpop.f32.mrb[25].mxu0  ;;  %v4074_v57 = vpop.f32.mrb[49].mxu1  ;;  %v2517_v24 = vadd.f32 %v6422_v29, %v2496_v35 }
 0x704   :  { %v2512_v7 = vadd.f32 %v2427_v52, %v6769_v0 }
 0x705   :  { %v2508_v19 = vmul.f32 0.5, %v2507_v44  ;;  %v6774_v44 = vld [vmem:[#allocation24_spill] sm:$0xff] }
 0x706   :  { %v2513_v55 = vmul.f32 0.5, %v2512_v7 }
 0x707   :  { %5287 = vtanh.f32 %v2508_v19 }
 0x708   :  { %5289 = vtanh.f32 %v2513_v55 }
 0x711   :  { %v5288_v56 = vpop.eup %5287 }
 0x712   :  { %v2510_v61 = vmul.f32 0.5, %v5288_v56  ;;  %v5290_v59 = vpop.eup %5289 }
 0x713   :  { %v2515_v5 = vmul.f32 0.5, %v5290_v59 }
 0x714   :  { %v2511_v21 = vadd.f32 0.5, %v2510_v61  ;;  %v6775_v61 = vld [vmem:[#allocation29_spill] sm:$0xff] }
 0x715   :  { %v2516_v3 = vadd.f32 0.5, %v2515_v5 }
 0x716   :  { %v2518_v11 = vmul.f32 %v2517_v24, %v2511_v21 }
 0x717   :  { %v2521_v14 = vsub.f32 1.0, %v2516_v3  ;;  %v2523_v54 = vmul.f32 %v2516_v3, %v6427_v25 }
 0x718   :  { %v2519_v46 = vadd.f32 %v2518_v11, %v6770_v50 }
 0x71a   :  { %5291 = vtanh.f32 %v2519_v46 }
 0x722   :  { %v2595_v42 = vpop.f32.mrb[26].mxu0  ;;  %v2666_v36 = vpop.f32.mrb[50].mxu1 }
 0x723   :  { %v2597_v30 = vpop.f32.mrb[27].mxu0  ;;  %v4109_v23 = vpop.f32.mrb[51].mxu1 }
 0x724   :  { %v5292_v12 = vpop.eup %5291 }
 0x725   :  { %v2522_v31 = vmul.f32 %v5292_v12, %v2521_v14 }
 0x727   :  { %v6513_v47 = vadd.f32 %v2523_v54, %v2522_v31 }
 0x729   :  { %3249 = vst [vmem:[%s6657_s8 + $0x30] sm:$0xff] %v6513_v47  ;;  %2742 = vmatmul.mubr.f32.vlgmr.msra.gmra.mrb[28].mxu0 %v6513_v47  ;;  %4143 = vmatmul.mubr.f32.vlgmr.msra.gmra.mrb[52].mxu1 %v6513_v47 }
 0x72a   :  { %5131 = vmatpush1.bf16.msra.mxu0 %v5391_v8  ;;  %2911 = vmatprep.mubr.f32.mxu0 %v6711_v41  ;;  %v3004_v8 = vld [vmem:[%s6658_s6] sm:$0xff] }
 0x72b   :  { %5133 = vmatprep.subr.bf16.mxu0 %v5418_v17  ;;  %5162 = vmatpush3.bf16.msra.mxu1 %v5662_v51  ;;  %v3005_v17 = vld [vmem:[%s6658_s6 + $0x8] sm:$0xff] }
 0x72c   :  { %5163 = vmatprep.subr.bf16.mxu1 %v6710_v38  ;;  %4177 = vmatprep.mubr.msk.f32.mxu1 %vm5318_vm0, %v6711_v41  ;;  %v3013_v51 = vld [vmem:[%s6658_s6 + $0x48] sm:$0xff]  ;;  %v3019_v41 = vld [vmem:[%s6658_s6 + $0x78] sm:$0xff] }
 0x72e   :  { %5135 = vmatpush1.bf16.msra.mxu0 %v5420_v18  ;;  %v5184_v18 = vpack.c.bf16 %v3005_v17, %v3004_v8 }
 0x72f   :  { %5137 = vmatprep.subr.bf16.mxu0 %v5446_v27  ;;  %5165 = vmatpush3.bf16.msra.mxu1 %v5679_v58  ;;  %v3006_v27 = vld [vmem:[%s6658_s6 + $0x10] sm:$0xff] }
 0x730   :  { %5166 = vmatprep.subr.bf16.mxu1 %v6710_v38 }
 0x732   :  { %5139 = vmatpush1.bf16.msra.mxu0 %v5468_v34  ;;  %v3007_v34 = vld [vmem:[%s6658_s6 + $0x18] sm:$0xff] }
 0x733   :  { %5141 = vmatprep.subr.bf16.mxu0 %v5485_v40  ;;  %5168 = vmatpush3.bf16.msra.mxu1 %v5698_v62  ;;  %v3254_v40 = vld [vmem:[%s6654_s0 + $0x78] sm:$0xff]  ;;  %v3014_v62 = vld [vmem:[%s6658_s6 + $0x50] sm:$0xff] }
 0x734   :  { %5169 = vmatprep.subr.bf16.mxu1 %v6710_v38 }
 0x736   :  { %5143 = vmatpush1.bf16.msra.mxu0 %v5512_v49  ;;  %v5188_v49 = vpack.c.bf16 %v3007_v34, %v3006_v27 }
 0x737   :  { %5145 = vmatprep.subr.bf16.mxu0 %v5524_v53  ;;  %5171 = vmatpush3.bf16.msra.mxu1 %v5718_v10  ;;  %v3008_v53 = vld [vmem:[%s6658_s6 + $0x20] sm:$0xff]  ;;  %v3015_v10 = vld [vmem:[%s6658_s6 + $0x58] sm:$0xff] }
 0x738   :  { %5172 = vmatprep.subr.bf16.mxu1 %v6710_v38 }
 0x73a   :  { %5147 = vmatpush1.bf16.msra.mxu0 %v5554_v63  ;;  %v3009_v63 = vld [vmem:[%s6658_s6 + $0x28] sm:$0xff] }
 0x73b   :  { %5149 = vmatprep.subr.bf16.mxu0 %v5560_v1  ;;  %5174 = vmatpush3.bf16.msra.mxu1 %v5735_v15  ;;  %v2996_v1 = vld [vmem:[%s6657_s8] sm:$0xff]  ;;  %v5204_v15 = vpack.c.bf16 %v3015_v10, %v3014_v62 }
 0x73c   :  { %5175 = vmatprep.subr.bf16.mxu1 %v6710_v38 }
 0x73e   :  { %5151 = vmatpush1.bf16.msra.mxu0 %v5590_v16  ;;  %v5192_v16 = vpack.c.bf16 %v3009_v63, %v3008_v53 }
 0x73f   :  { %5153 = vmatprep.subr.bf16.mxu0 %v5596_v20  ;;  %5177 = vmatpush3.bf16.msra.mxu1 %v5751_v28  ;;  %v3010_v20 = vld [vmem:[%s6658_s6 + $0x30] sm:$0xff]  ;;  %v3016_v28 = vld [vmem:[%s6658_s6 + $0x60] sm:$0xff] }
 0x740   :  { %5178 = vmatprep.subr.bf16.mxu1 %v6710_v38 }
 0x742   :  { %5155 = vmatpush1.bf16.msra.mxu0 %v5626_v33  ;;  %v3011_v33 = vld [vmem:[%s6658_s6 + $0x38] sm:$0xff] }
 0x743   :  { %5157 = vmatprep.subr.bf16.mxu0 %v5632_v37  ;;  %5180 = vmatpush3.bf16.msra.mxu1 %v5767_v32  ;;  %v5196_v37 = vpack.c.bf16 %v3011_v33, %v3010_v20  ;;  %v3017_v32 = vld [vmem:[%s6658_s6 + $0x68] sm:$0xff] }
 0x744   :  { %5181 = vmatprep.subr.bf16.mxu1 %v6710_v38  ;;  %v3018_v38 = vld [vmem:[%s6658_s6 + $0x70] sm:$0xff] }
 0x745   :  { %v5212_v60 = vpack.c.bf16 %v3019_v41, %v3018_v38 }
 0x746   :  { %5159 = vmatpush1.bf16.msra.mxu0 %v5656_v48  ;;  %v3012_v48 = vld [vmem:[%s6658_s6 + $0x40] sm:$0xff] }
 0x747   :  { %5185 = vmatprep.subr.bf16.mxu0 %v5184_v18  ;;  %5183 = vmatpush3.bf16.msra.mxu1 %v5783_v45  ;;  %v5200_v58 = vpack.c.bf16 %v3013_v51, %v3012_v48  ;;  %v5208_v45 = vpack.c.bf16 %v3017_v32, %v3016_v28 }
 0x749   :  { %2912 = vmatmul.mubr.f32.vlgmr.msra.gmra.mrb[30].mxu0 %v3254_v40 }
 0x74a   :  { %5187 = vmatpush3.bf16.msra.mxu0 %v5184_v18  ;;  %4212 = vmatprep.mubr.f32.mxu0 %v2996_v1 }
 0x74b   :  { %5189 = vmatprep.subr.bf16.mxu0 %v5188_v49  ;;  %4178 = vmatmul.mubr.f32.vlgmr.msra.gmra.mrb[54].mxu1 %v3254_v40 }
 0x74e   :  { %5191 = vmatpush3.bf16.msra.mxu0 %v5188_v49 }
 0x74f   :  { %5193 = vmatprep.subr.bf16.mxu0 %v5192_v16 }
 0x752   :  { %5195 = vmatpush3.bf16.msra.mxu0 %v5192_v16 }
 0x753   :  { %5197 = vmatprep.subr.bf16.mxu0 %v5196_v37 }
 0x756   :  { %5199 = vmatpush3.bf16.msra.mxu0 %v5196_v37 }
 0x757   :  { %5201 = vmatprep.subr.bf16.mxu0 %v5200_v58 }
 0x75a   :  { %5203 = vmatpush3.bf16.msra.mxu0 %v5200_v58 }
 0x75b   :  { %5205 = vmatprep.subr.bf16.mxu0 %v5204_v15 }
 0x75e   :  { %5207 = vmatpush3.bf16.msra.mxu0 %v5204_v15 }
 0x75f   :  { %5209 = vmatprep.subr.bf16.mxu0 %v5208_v45 }
 0x762   :  { %5211 = vmatpush3.bf16.msra.mxu0 %v5208_v45 }
 0x763   :  { %5213 = vmatprep.subr.bf16.mxu0 %v5212_v60 }
 0x766   :  { %5215 = vmatpush3.bf16.msra.mxu0 %v5212_v60 }
 0x769   :  { %4213 = vmatmul.mubr.f32.vlgmr.msra.gmra.mrb[32].mxu0 %v2997_v6 }
 0x76a   :  { %4215 = vmatprep.mubr.f32.mxu0 %v6771_v4 }
 0x76d   :  { %4216 = vmatmul.mubr.f32.gmra.mrb[34].mxu0 %v6772_v43 }
 0x76e   :  { %4218 = vmatprep.mubr.f32.mxu0 %v6336_v2 }
 0x771   :  { %4219 = vmatmul.mubr.f32.gmra.mrb[36].mxu0 %v6427_v25 }
 0x772   :  { %4221 = vmatprep.mubr.f32.mxu0 %v6513_v47 }
 0x7fc   :  { %v2743_v9 = vpop.f32.mrb[28].mxu0  ;;  %v2814_v13 = vpop.f32.mrb[52].mxu1 }
 0x7fd   :  { %v2825_v26 = vadd.f32 %v2743_v9, %v6773_v22  ;;  %v2745_v35 = vpop.f32.mrb[29].mxu0  ;;  %v4144_v39 = vpop.f32.mrb[53].mxu1  ;;  %v2835_v2 = vadd.f32 %v6422_v29, %v2814_v13  ;;  %v3255_v29 = vld [vmem:[%s6659_s7] ss:$0 sm:$0xff] }
 0x7fe   :  { %v2830_v52 = vadd.f32 %v2745_v35, %v6774_v44 }
 0x7ff   :  { %v2826_v57 = vmul.f32 0.5, %v2825_v26 }
 0x800   :  { %v2831_v0 = vmul.f32 0.5, %v2830_v52 }
 0x801   :  { %5293 = vtanh.f32 %v2826_v57 }
 0x802   :  { %5295 = vtanh.f32 %v2831_v0 }
 0x80b   :  { %v5294_v7 = vpop.eup %5293 }
 0x80c   :  { %v2828_v19 = vmul.f32 0.5, %v5294_v7  ;;  %v5296_v56 = vpop.eup %5295 }
 0x80d   :  { %v2833_v24 = vmul.f32 0.5, %v5296_v56 }
 0x80e   :  { %v2829_v55 = vadd.f32 0.5, %v2828_v19 }
 0x80f   :  { %v2834_v11 = vadd.f32 0.5, %v2833_v24 }
 0x810   :  { %v2836_v25 = vmul.f32 %v2835_v2, %v2829_v55 }
 0x811   :  { %v2839_v50 = vsub.f32 1.0, %v2834_v11  ;;  %v2841_v12 = vmul.f32 %v2834_v11, %v6513_v47 }
 0x812   :  { %v2837_v21 = vadd.f32 %v2836_v25, %v6775_v61 }
 0x814   :  { %5297 = vtanh.f32 %v2837_v21 }
 0x81c   :  { %v2913_v59 = vpop.f32.mrb[30].mxu0 }
 0x81d   :  { %v2915_v46 = vpop.f32.mrb[31].mxu0 }
 0x81e   :  { %v5298_v5 = vpop.eup %5297  ;;  %v2984_v3 = vpop.f32.mrb[54].mxu1 }
 0x81f   :  { %v2840_v14 = vmul.f32 %v5298_v5, %v2839_v50  ;;  %v4179_v31 = vpop.f32.mrb[55].mxu1 }
 0x821   :  { %v2842_v54 = vadd.f32 %v2841_v12, %v2840_v14 }
 0x823   :  { %3252 = vst [vmem:[%s6657_s8 + $0x38] sm:$0xff] %v2842_v54  ;;  %4222 = vmatmul.mubr.f32.gmra.mrb[38].mxu0 %v2842_v54 }
 0x83c   :  { %v4214_v8 = vpop.f32.mrb[32].mxu0 }
 0x83d   :  { %v3099_v17 = vadd.f32 %v4214_v8, %v3255_v29  ;;  %v3093_v18 = vpop.f32.mrb[33].mxu0 }
 0x83e   :  { %v3094_v27 = vadd.f32 %v3255_v29, %v3093_v18 }
 0x83f   :  { %v3133_v34 = vmul.f32 0.5, %v3099_v17 }
 0x840   :  { %v3132_v40 = vmul.f32 0.5, %v3094_v27  ;;  %v4217_v49 = vpop.f32.mrb[34].mxu0 }
 0x841   :  { %5299 = vtanh.f32 %v3133_v34  ;;  %v3109_v47 = vadd.f32 %v4217_v49, %v3255_v29  ;;  %v3103_v53 = vpop.f32.mrb[35].mxu0 }
 0x842   :  { %5301 = vtanh.f32 %v3132_v40  ;;  %v3104_v63 = vadd.f32 %v3255_v29, %v3103_v53 }
 0x843   :  { %v3135_v1 = vmul.f32 0.5, %v3109_v47 }
 0x844   :  { %v3134_v16 = vmul.f32 0.5, %v3104_v63  ;;  %v4220_v20 = vpop.f32.mrb[36].mxu0 }
 0x845   :  { %5303 = vtanh.f32 %v3135_v1  ;;  %v3119_v33 = vadd.f32 %v4220_v20, %v3255_v29  ;;  %v3113_v37 = vpop.f32.mrb[37].mxu0 }
 0x846   :  { %5305 = vtanh.f32 %v3134_v16  ;;  %v3114_v48 = vadd.f32 %v3255_v29, %v3113_v37 }
 0x847   :  { %v3137_v51 = vmul.f32 0.5, %v3119_v33 }
 0x848   :  { %v3136_v58 = vmul.f32 0.5, %v3114_v48 }
 0x849   :  { %5307 = vtanh.f32 %v3137_v51 }
 0x84a   :  { %5309 = vtanh.f32 %v3136_v58 }
 0x84b   :  { %v5300_v62 = vpop.eup %5299 }
 0x84c   :  { %v5302_v10 = vpop.eup %5301  ;;  %v3149_v15 = vmul.f32 0.5, %v5300_v62 }
 0x84d   :  { %v3148_v28 = vmul.f32 0.5, %v5302_v10 }
 0x84e   :  { %v3157_v32 = vadd.f32 0.5, %v3149_v15 }
 0x84f   :  { %v5304_v45 = vpop.eup %5303  ;;  %v3156_v38 = vadd.f32 0.5, %v3148_v28 }
 0x850   :  { %v5306_v41 = vpop.eup %5305  ;;  %3165 = vst [vmem:[%s6660_s9 + $0x8] sm:$0xff] %v3157_v32  ;;  %v3151_v42 = vmul.f32 0.5, %v5304_v45 }
 0x851   :  { %3164 = vst [vmem:[%s6660_s9] sm:$0xff] %v3156_v38  ;;  %v3150_v36 = vmul.f32 0.5, %v5306_v41 }
 0x852   :  { %v3159_v30 = vadd.f32 0.5, %v3151_v42 }
 0x853   :  { %v5308_v23 = vpop.eup %5307  ;;  %v3158_v60 = vadd.f32 0.5, %v3150_v36 }
 0x854   :  { %v5310_v6 = vpop.eup %5309  ;;  %3167 = vst [vmem:[%s6660_s9 + $0x18] sm:$0xff] %v3159_v30  ;;  %v3153_v4 = vmul.f32 0.5, %v5308_v23 }
 0x855   :  { %3166 = vst [vmem:[%s6660_s9 + $0x10] sm:$0xff] %v3158_v60  ;;  %v3152_v43 = vmul.f32 0.5, %v5310_v6 }
 0x856   :  { %v3161_v9 = vadd.f32 0.5, %v3153_v4 }
 0x857   :  { %v3160_v13 = vadd.f32 0.5, %v3152_v43 }
 0x858   :  { %3169 = vst [vmem:[%s6660_s9 + $0x28] sm:$0xff] %v3161_v9 }
 0x859   :  { %3168 = vst [vmem:[%s6660_s9 + $0x20] sm:$0xff] %v3160_v13 }
 0x8f6   :  { %v4223_v22 = vpop.f32.mrb[38].mxu0 }
 0x8f7   :  { %v3129_v26 = vadd.f32 %v4223_v22, %v3255_v29  ;;  %v3123_v35 = vpop.f32.mrb[39].mxu0 }
 0x8f8   :  { %v3124_v39 = vadd.f32 %v3255_v29, %v3123_v35 }
 0x8f9   :  { %v3139_v44 = vmul.f32 0.5, %v3129_v26 }
 0x8fa   :  { %v3138_v52 = vmul.f32 0.5, %v3124_v39 }
 0x8fb   :  { %5311 = vtanh.f32 %v3139_v44 }
 0x8fc   :  { %5313 = vtanh.f32 %v3138_v52 }
 0x905   :  { %v5312_v57 = vpop.eup %5311 }
 0x906   :  { %v5314_v0 = vpop.eup %5313  ;;  %v3155_v7 = vmul.f32 0.5, %v5312_v57 }
 0x907   :  { %v3154_v19 = vmul.f32 0.5, %v5314_v0 }
 0x908   :  { %v3163_v55 = vadd.f32 0.5, %v3155_v7 }
 0x909   :  { %v3162_v2 = vadd.f32 0.5, %v3154_v19 }
 0x90a   :  { %3171 = vst [vmem:[%s6660_s9 + $0x38] sm:$0xff] %v3163_v55 }
 0x90b   :  { %3170 = vst [vmem:[%s6660_s9 + $0x30] sm:$0xff] %v3162_v2 }

</bundles_post_ra>
